<compile_context>
chip_gen: v7x
topology: tpu7x:2x2x1
jax: 0.10.0
libtpu: 0.0.40
codegen_flags: <defaults>
</compile_context>

<pallas_src>
import numpy as np

import jax
import jax.numpy as jnp
from jax.experimental import pallas as pl
from jax.experimental.pallas import tpu as pltpu


def _round_up(a, b):
    return (a + b - 1) // b * b


# ---------------------------------------------------------------------------
# One-off calibration of pltpu.roll's shift convention (cached).
#   +1 : pltpu.roll(x, s) == jnp.roll(x, s)
#   -1 : pltpu.roll(x, s) == jnp.roll(x, -s)
#    0 : undetermined -> use jnp.roll inside the kernel
# ---------------------------------------------------------------------------
_ROLL_MODE = None


def _roll_mode():
    global _ROLL_MODE
    if _ROLL_MODE is not None:
        return _ROLL_MODE

    def probe(o_ref):
        i = jax.lax.broadcasted_iota(jnp.int32, (8, 128), 1)
        o_ref[...] = pltpu.roll(i, 1, axis=1)

    mode = 0
    try:
        r = pl.pallas_call(
            probe, out_shape=jax.ShapeDtypeStruct((8, 128), jnp.int32))()
        first = int(np.asarray(jax.device_get(r))[0, 0])
        if first == 127:          # lane 0 received old lane 127 -> jnp.roll convention
            mode = 1
        elif first == 1:          # lane 0 received old lane 1   -> reversed convention
            mode = -1
    except Exception:
        mode = 0
    _ROLL_MODE = mode
    return mode


def _tpu_hw():
    """Best-effort (VMEM capacity, TensorCores-per-chip); safe fallbacks."""
    vmem_cap = 64 << 20
    ncores = 1
    try:
        info = pltpu.get_tpu_info()
        cap = getattr(info, "vmem_capacity_bytes", None)
        if isinstance(cap, (int, np.integer)) and cap > 0:
            vmem_cap = int(cap)
        for name in ("num_cores", "num_tensorcores", "tensorcore_count",
                     "core_count"):
            v = getattr(info, name, None)
            if isinstance(v, (int, np.integer)) and v > 0:
                ncores = int(v)
                break
    except Exception:
        pass
    return vmem_cap, ncores


def _make_kernel(K, WB, LSEG, NB, C_in, C_out, relu, roll_mode):
    """Build the Pallas kernel for one (K, layout, block) configuration."""
    KKC = K * K * C_in

    def lroll(v, s):
        # Left-roll the lane axis by s: result[:, p] = v[:, (p + s) % LSEG].
        s = s % LSEG
        if s == 0:
            return v
        if roll_mode == 1:
            return pltpu.roll(v, LSEG - s, axis=1)
        if roll_mode == -1:
            return pltpu.roll(v, s, axis=1)
        return jnp.roll(v, -s, axis=1)

    def kernel(x_ref, w_ref, b_ref, o_ref, col_ref):
        # x_ref  : (NB, Cin, LSEG)        bf16/f32 -- NB zero-padded images, each
        #          an (HB, WB) plane flattened row-major into a 128-aligned
        #          lane segment.
        # w_ref  : (Cout, K*K*Cin)        bf16/f32 -- BN-folded weights, column
        #          index t*Cin + ci with t = kh*K + kw.
        # b_ref  : (Cout, 1)              f32      -- BN-folded bias.
        # o_ref  : (NB, Cout, LSEG)
        # col_ref: (K*K*Cin, NB*LSEG)     VMEM scratch -- im2col matrix.

        # Build the im2col matrix.  Zero padding was materialized in the
        # wrapper, so every tap is a pure XLU lane rotation (no masks /
        # compares / selects), with the vertical shift hoisted per kernel row.
        for b in range(NB):
            xb = x_ref[b]                                    # (Cin, LSEG)
            for kh in range(K):
                xr = lroll(xb, kh * WB)                      # hoisted row shift
                for kw in range(K):
                    xs = lroll(xr, kw)                       # small column shift
                    t = kh * K + kw
                    col_ref[pl.ds(t * C_in, C_in),
                            pl.ds(b * LSEG, LSEG)] = xs

        # Single im2col matmul on the MXU: contraction depth K*K*Cin (98-196)
        # instead of 49 depth-Cin matmuls; f32 accumulation.
        acc = jnp.dot(w_ref[...], col_ref[...],
                      preferred_element_type=jnp.float32)    # (Cout, NB*LSEG)
        # TODO(synk): for C_out == 1 (the SpatialGate config) a VPU broadcast
        # multiply + sublane reduce could replace this single-row MXU matmul.
        y = acc + b_ref[...]                                 # folded BN / bias
        if relu:
            y = jnp.maximum(y, 0.0)
        for b in range(NB):                                  # lane-dense stores
            o_ref[b] = y[:, b * LSEG:(b + 1) * LSEG].astype(o_ref.dtype)

    return kernel


def basic_conv(x, weight, conv_bias=None, bn=None, *, padding=0, stride=1,
               dilation=1, groups=1, relu=True, block_target_bytes=None):
    """BasicConv forward: conv2d (stride 1) -> folded eval BatchNorm -> ReLU.

    x         : (N, Cin, H, W)
    weight    : (Cout, Cin, K, K)
    conv_bias : (Cout,) or None
    bn        : None or (gamma, beta, running_mean, running_var, eps)
    """
    # TODO(synk): stride != 1, dilation != 1 and groups != 1 are not implemented
    # (BasicConv defaults and its CSA / SpatialGate usage are 1 / 1 / 1).
    assert stride == 1 and dilation == 1 and groups == 1

    N, C_in, H, W = x.shape
    C_out, C_in_w, K, K2 = weight.shape
    assert K == K2 and C_in_w == C_in
    P = padding
    H_out = H + 2 * P - K + 1
    W_out = W + 2 * P - K + 1
    assert H_out > 0 and W_out > 0

    # ---- fold eval-mode BatchNorm (+ optional conv bias) into the weights ----
    # TODO(synk): training-mode BatchNorm (batch statistics + running-stat
    # update) is not implemented; this is the inference forward.
    w_eff = weight.astype(jnp.float32)
    b_eff = (conv_bias.astype(jnp.float32) if conv_bias is not None
             else jnp.zeros((C_out,), jnp.float32))
    if bn is not None:
        gamma, beta, mean, var, eps = bn
        scale = gamma.astype(jnp.float32) / jnp.sqrt(var.astype(jnp.float32) + eps)
        w_eff = w_eff * scale[:, None, None, None]
        b_eff = beta.astype(jnp.float32) + (b_eff - mean.astype(jnp.float32)) * scale

    # bf16 halves HBM->VMEM DMA bytes and doubles MXU packing; f32 fallback
    # only if Cin is odd (keeps packed sublane stores aligned in all cases).
    io_dtype = jnp.bfloat16 if C_in % 2 == 0 else jnp.float32

    # im2col weight matrix: column index t*Cin + ci with t = kh*K + kw.
    KKC = K * K * C_in
    w_mat = jnp.transpose(w_eff, (0, 2, 3, 1)).reshape(C_out, KKC).astype(io_dtype)
    b_col = b_eff.reshape(C_out, 1)

    # ---- layout plumbing (no HBM transposes): pad & flatten spatial to lanes --
    HB, WB = H + 2 * P, W + 2 * P
    LSEG = _round_up(HB * WB, 128)
    # The in-kernel lane rolls wrap around the LSEG segment.  Every output
    # lane we keep (rows < H_out, cols < W_out) only reads source lanes up to
    # (HB-1)*WB + (WB-1) = HB*WB - 1 < LSEG, so no wrapped (contaminated)
    # value ever reaches a retained output element; contaminated lanes are
    # cropped below.
    assert (H_out - 1 + K - 1) * WB + (W_out - 1 + K - 1) == HB * WB - 1
    assert HB * WB - 1 < LSEG

    xp = jnp.pad(x.astype(jnp.float32), ((0, 0), (0, 0), (P, P), (P, P)))
    xf = xp.reshape(N, C_in, HB * WB)
    xf = jnp.pad(xf, ((0, 0), (0, 0), (0, LSEG - HB * WB)))
    x_in = xf.astype(io_dtype)                               # (N, Cin, LSEG)

    # ---- generation-aware block sizing (include scratch + accumulator) -------
    vmem_cap, ncores = _tpu_hw()
    if block_target_bytes is None:
        # ~12 MiB working set on 128 MiB-VMEM parts (v5e/v6e), ~16 MiB on
        # 64 MiB parts (v7x); both leave headroom under the scoped limit.
        block_target_bytes = (12 << 20) if vmem_cap >= (100 << 20) else (16 << 20)
    vmem_limit = (64 << 20) if vmem_cap >= (100 << 20) else (32 << 20)

    in_isize = jnp.dtype(io_dtype).itemsize
    out_isize = jnp.dtype(x.dtype).itemsize
    per_image = (2 * C_in * LSEG * in_isize          # input block (double-buffered)
                 + 2 * C_out * LSEG * out_isize      # output block (double-buffered)
                 + KKC * LSEG * in_isize             # im2col VMEM scratch
                 + C_out * LSEG * 4)                 # f32 accumulator
    NB = max(1, min(N, block_target_bytes // max(per_image, 1)))
    while N % NB:                                    # blocks must evenly divide N
        NB -= 1
    # Multi-TensorCore chips (v7x): ensure enough grid steps to feed every
    # core; on single-core chips keep the biggest block (fewest grid steps).
    if ncores > 1 and N // NB < min(ncores, N):
        for d in range(NB, 0, -1):
            if N % d == 0 and N // d >= min(ncores, N):
                NB = d
                break
    steps = N // NB
    sem = (pltpu.CORE_PARALLEL if (ncores > 1 and steps % ncores == 0)
           else pltpu.PARALLEL)
    # TODO(synk): very large Cin*H*W would need spatial (K-row halo) tiling;
    # current blocks hold whole padded images, which is fine for CSA shapes.

    kernel = _make_kernel(K, WB, LSEG, NB, C_in, C_out, relu, _roll_mode())

    out3 = pl.pallas_call(
        kernel,
        out_shape=jax.ShapeDtypeStruct((N, C_out, LSEG), x.dtype),
        grid=(steps,),
        in_specs=[
            pl.BlockSpec((NB, C_in, LSEG), lambda s: (s, 0, 0)),
            pl.BlockSpec((C_out, KKC), lambda s: (0, 0)),
            pl.BlockSpec((C_out, 1), lambda s: (0, 0)),
        ],
        out_specs=pl.BlockSpec((NB, C_out, LSEG), lambda s: (s, 0, 0)),
        scratch_shapes=[pltpu.VMEM((KKC, NB * LSEG), io_dtype)],
        compiler_params=pltpu.CompilerParams(
            dimension_semantics=(sem,),
            vmem_limit_bytes=vmem_limit,
        ),
    )(x_in, w_mat, b_col)

    # ---- undo layout plumbing (no transposes): crop back to NCHW -------------
    out = out3[:, :, :HB * WB].reshape(N, C_out, HB, WB)
    return out[:, :, :H_out, :W_out]


def reference_np(x, weight, conv_bias, bn, relu, padding):
    """float64 NumPy reference (host-side verification only)."""
    x = np.asarray(x, np.float64)
    w = np.asarray(weight, np.float64)
    N_, Ci, H_, W_ = x.shape
    Co = w.shape[0]
    K_ = w.shape[2]
    P_ = padding
    Ho, Wo = H_ + 2 * P_ - K_ + 1, W_ + 2 * P_ - K_ + 1
    xpad = np.pad(x, ((0, 0), (0, 0), (P_, P_), (P_, P_)))
    out = np.zeros((N_, Co, Ho, Wo), np.float64)
    for kh in range(K_):
        for kw in range(K_):
            patch = xpad[:, :, kh:kh + Ho, kw:kw + Wo]
            out += np.einsum('oi,nihw->nohw', w[:, :, kh, kw], patch)
    if conv_bias is not None:
        out += np.asarray(conv_bias, np.float64).reshape(1, -1, 1, 1)
    if bn is not None:
        gamma, beta, mean, var, eps = bn
        scale = np.asarray(gamma, np.float64) / np.sqrt(np.asarray(var, np.float64) + eps)
        shift = np.asarray(beta, np.float64) - np.asarray(mean, np.float64) * scale
        out = out * scale.reshape(1, -1, 1, 1) + shift.reshape(1, -1, 1, 1)
    if relu:
        out = np.maximum(out, 0.0)
    return out


if __name__ == "__main__":
    key = jax.random.PRNGKey(0)
    keys = jax.random.split(key, 12)
    eps = 1e-5

    # ---- config 1: BasicConv(4, 8, kernel_size=7, padding=3) with module
    #      defaults relu=True, bn=True, bias=False ----
    N, C_in, H, W = 2, 4, 16, 16
    C_out, K, P = 8, 7, 3

    x = jax.random.normal(keys[0], (N, C_in, H, W), jnp.float32)
    bound = 1.0 / np.sqrt(C_in * K * K)
    weight = jax.random.uniform(keys[1], (C_out, C_in, K, K), jnp.float32, -bound, bound)
    gamma = 1.0 + 0.1 * jax.random.normal(keys[2], (C_out,), jnp.float32)
    beta = 0.1 * jax.random.normal(keys[3], (C_out,), jnp.float32)
    running_mean = 0.1 * jax.random.normal(keys[4], (C_out,), jnp.float32)
    running_var = jax.random.uniform(keys[5], (C_out,), jnp.float32, 0.5, 1.5)
    bn = (gamma, beta, running_mean, running_var, eps)

    out = basic_conv(x, weight, conv_bias=None, bn=bn, padding=P, relu=True)
    out = jax.block_until_ready(out)
    ref = reference_np(x, weight, None, bn, True, P)
    # bf16 inputs/weights (f32 accumulation) -> slightly looser tolerance.
    np.testing.assert_allclose(np.asarray(out, np.float64), ref, rtol=2e-2, atol=2e-2)

    # ---- config 2: the CSA / SpatialGate instantiation
    #      BasicConv(2, 1, 7, stride=1, padding=3, relu=False) ----
    C_in2, C_out2 = 2, 1
    x_g = jax.random.normal(keys[6], (N, C_in2, H, W), jnp.float32)
    bound2 = 1.0 / np.sqrt(C_in2 * K * K)
    weight2 = jax.random.uniform(keys[7], (C_out2, C_in2, K, K), jnp.float32, -bound2, bound2)
    gamma2 = 1.0 + 0.1 * jax.random.normal(keys[8], (C_out2,), jnp.float32)
    beta2 = 0.1 * jax.random.normal(keys[9], (C_out2,), jnp.float32)
    mean2 = 0.1 * jax.random.normal(keys[10], (C_out2,), jnp.float32)
    var2 = jax.random.uniform(keys[11], (C_out2,), jnp.float32, 0.5, 1.5)
    bn2 = (gamma2, beta2, mean2, var2, eps)

    out2 = basic_conv(x_g, weight2, conv_bias=None, bn=bn2, padding=P, relu=False)
    out2 = jax.block_until_ready(out2)
    ref2 = reference_np(x_g, weight2, None, bn2, False, P)
    np.testing.assert_allclose(np.asarray(out2, np.float64), ref2, rtol=2e-2, atol=2e-2)

    print("KERNEL_OK")
</pallas_src>

<mosaic_0001>
module attributes {stable_mosaic.version = 11 : i64} {
  func.func @kernel(%arg0: i32, %arg1: memref<2x4x512xbf16, #tpu.memory_space<vmem>>, %arg2: memref<8x196xbf16, #tpu.memory_space<vmem>>, %arg3: memref<8x1xf32, #tpu.memory_space<vmem>>, %arg4: memref<2x8x512xf32, #tpu.memory_space<vmem>>, %arg5: memref<196x1024xbf16, #tpu.memory_space<vmem>>) attributes {dimension_semantics = [#tpu.dimension_semantics<parallel>], iteration_bounds = array<i64: 1>, scalar_prefetch = 0 : i64, scratch_operands = 1 : i64, tpu.core_type = #tpu.core_type<tc>, window_params = [{transform_indices = @transform_0, window_bounds = array<i64: 2, 4, 512>}, {pipeline_mode = #tpu.pipeline_mode<synchronous>, transform_indices = @transform_1, window_bounds = array<i64: 8, 196>}, {pipeline_mode = #tpu.pipeline_mode<synchronous>, transform_indices = @transform_2, window_bounds = array<i64: 8, 1>}, {transform_indices = @transform_3, window_bounds = array<i64: 2, 8, 512>}]} {
    %c0 = arith.constant 0 : index
    %c0_0 = arith.constant 0 : index
    %c0_1 = arith.constant 0 : index
    %0 = vector.load %arg1[%c0, %c0_0, %c0_1] : memref<2x4x512xbf16, #tpu.memory_space<vmem>>, vector<1x4x512xbf16>
    %1 = vector.shape_cast %0 : vector<1x4x512xbf16> to vector<4x512xbf16>
    %c0_2 = arith.constant 0 : index
    %c0_3 = arith.constant 0 : index
    %2 = vector.load %arg5[%c0_2, %c0_3] : memref<196x1024xbf16, #tpu.memory_space<vmem>>, vector<4x512xbf16>
    tpu.vector_store %arg5[%c0_2, %c0_3], %1 {strides = array<i32>} : memref<196x1024xbf16, #tpu.memory_space<vmem>>, vector<4x512xbf16>,
    %3 = vector.extract_strided_slice %1 {offsets = [0, 1], sizes = [4, 511], strides = [1, 1]} : vector<4x512xbf16> to vector<4x511xbf16>
    %4 = vector.extract_strided_slice %1 {offsets = [0, 0], sizes = [4, 1], strides = [1, 1]} : vector<4x512xbf16> to vector<4x1xbf16>
    %5 = tpu.concatenate %3, %4 in 1 : vector<4x511xbf16>, vector<4x1xbf16> -> vector<4x512xbf16>
    %c4 = arith.constant 4 : index
    %c0_4 = arith.constant 0 : index
    %6 = vector.load %arg5[%c4, %c0_4] : memref<196x1024xbf16, #tpu.memory_space<vmem>>, vector<4x512xbf16>
    tpu.vector_store %arg5[%c4, %c0_4], %5 {strides = array<i32>} : memref<196x1024xbf16, #tpu.memory_space<vmem>>, vector<4x512xbf16>,
    %7 = vector.extract_strided_slice %1 {offsets = [0, 2], sizes = [4, 510], strides = [1, 1]} : vector<4x512xbf16> to vector<4x510xbf16>
    %8 = vector.extract_strided_slice %1 {offsets = [0, 0], sizes = [4, 2], strides = [1, 1]} : vector<4x512xbf16> to vector<4x2xbf16>
    %9 = tpu.concatenate %7, %8 in 1 : vector<4x510xbf16>, vector<4x2xbf16> -> vector<4x512xbf16>
    %c8 = arith.constant 8 : index
    %c0_5 = arith.constant 0 : index
    %10 = vector.load %arg5[%c8, %c0_5] : memref<196x1024xbf16, #tpu.memory_space<vmem>>, vector<4x512xbf16>
    tpu.vector_store %arg5[%c8, %c0_5], %9 {strides = array<i32>} : memref<196x1024xbf16, #tpu.memory_space<vmem>>, vector<4x512xbf16>,
    %11 = vector.extract_strided_slice %1 {offsets = [0, 3], sizes = [4, 509], strides = [1, 1]} : vector<4x512xbf16> to vector<4x509xbf16>
    %12 = vector.extract_strided_slice %1 {offsets = [0, 0], sizes = [4, 3], strides = [1, 1]} : vector<4x512xbf16> to vector<4x3xbf16>
    %13 = tpu.concatenate %11, %12 in 1 : vector<4x509xbf16>, vector<4x3xbf16> -> vector<4x512xbf16>
    %c12 = arith.constant 12 : index
    %c0_6 = arith.constant 0 : index
    %14 = vector.load %arg5[%c12, %c0_6] : memref<196x1024xbf16, #tpu.memory_space<vmem>>, vector<4x512xbf16>
    tpu.vector_store %arg5[%c12, %c0_6], %13 {strides = array<i32>} : memref<196x1024xbf16, #tpu.memory_space<vmem>>, vector<4x512xbf16>,
    %15 = vector.extract_strided_slice %1 {offsets = [0, 4], sizes = [4, 508], strides = [1, 1]} : vector<4x512xbf16> to vector<4x508xbf16>
    %16 = vector.extract_strided_slice %1 {offsets = [0, 0], sizes = [4, 4], strides = [1, 1]} : vector<4x512xbf16> to vector<4x4xbf16>
    %17 = tpu.concatenate %15, %16 in 1 : vector<4x508xbf16>, vector<4x4xbf16> -> vector<4x512xbf16>
    %c16 = arith.constant 16 : index
    %c0_7 = arith.constant 0 : index
    %18 = vector.load %arg5[%c16, %c0_7] : memref<196x1024xbf16, #tpu.memory_space<vmem>>, vector<4x512xbf16>
    tpu.vector_store %arg5[%c16, %c0_7], %17 {strides = array<i32>} : memref<196x1024xbf16, #tpu.memory_space<vmem>>, vector<4x512xbf16>,
    %19 = vector.extract_strided_slice %1 {offsets = [0, 5], sizes = [4, 507], strides = [1, 1]} : vector<4x512xbf16> to vector<4x507xbf16>
    %20 = vector.extract_strided_slice %1 {offsets = [0, 0], sizes = [4, 5], strides = [1, 1]} : vector<4x512xbf16> to vector<4x5xbf16>
    %21 = tpu.concatenate %19, %20 in 1 : vector<4x507xbf16>, vector<4x5xbf16> -> vector<4x512xbf16>
    %c20 = arith.constant 20 : index
    %c0_8 = arith.constant 0 : index
    %22 = vector.load %arg5[%c20, %c0_8] : memref<196x1024xbf16, #tpu.memory_space<vmem>>, vector<4x512xbf16>
    tpu.vector_store %arg5[%c20, %c0_8], %21 {strides = array<i32>} : memref<196x1024xbf16, #tpu.memory_space<vmem>>, vector<4x512xbf16>,
    %23 = vector.extract_strided_slice %1 {offsets = [0, 6], sizes = [4, 506], strides = [1, 1]} : vector<4x512xbf16> to vector<4x506xbf16>
    %24 = vector.extract_strided_slice %1 {offsets = [0, 0], sizes = [4, 6], strides = [1, 1]} : vector<4x512xbf16> to vector<4x6xbf16>
    %25 = tpu.concatenate %23, %24 in 1 : vector<4x506xbf16>, vector<4x6xbf16> -> vector<4x512xbf16>
    %c24 = arith.constant 24 : index
    %c0_9 = arith.constant 0 : index
    %26 = vector.load %arg5[%c24, %c0_9] : memref<196x1024xbf16, #tpu.memory_space<vmem>>, vector<4x512xbf16>
    tpu.vector_store %arg5[%c24, %c0_9], %25 {strides = array<i32>} : memref<196x1024xbf16, #tpu.memory_space<vmem>>, vector<4x512xbf16>,
    %27 = vector.extract_strided_slice %1 {offsets = [0, 22], sizes = [4, 490], strides = [1, 1]} : vector<4x512xbf16> to vector<4x490xbf16>
    %28 = vector.extract_strided_slice %1 {offsets = [0, 0], sizes = [4, 22], strides = [1, 1]} : vector<4x512xbf16> to vector<4x22xbf16>
    %29 = tpu.concatenate %27, %28 in 1 : vector<4x490xbf16>, vector<4x22xbf16> -> vector<4x512xbf16>
    %c28 = arith.constant 28 : index
    %c0_10 = arith.constant 0 : index
    %30 = vector.load %arg5[%c28, %c0_10] : memref<196x1024xbf16, #tpu.memory_space<vmem>>, vector<4x512xbf16>
    tpu.vector_store %arg5[%c28, %c0_10], %29 {strides = array<i32>} : memref<196x1024xbf16, #tpu.memory_space<vmem>>, vector<4x512xbf16>,
    %31 = vector.extract_strided_slice %29 {offsets = [0, 1], sizes = [4, 511], strides = [1, 1]} : vector<4x512xbf16> to vector<4x511xbf16>
    %32 = vector.extract_strided_slice %29 {offsets = [0, 0], sizes = [4, 1], strides = [1, 1]} : vector<4x512xbf16> to vector<4x1xbf16>
    %33 = tpu.concatenate %31, %32 in 1 : vector<4x511xbf16>, vector<4x1xbf16> -> vector<4x512xbf16>
    %c32 = arith.constant 32 : index
    %c0_11 = arith.constant 0 : index
    %34 = vector.load %arg5[%c32, %c0_11] : memref<196x1024xbf16, #tpu.memory_space<vmem>>, vector<4x512xbf16>
    tpu.vector_store %arg5[%c32, %c0_11], %33 {strides = array<i32>} : memref<196x1024xbf16, #tpu.memory_space<vmem>>, vector<4x512xbf16>,
    %35 = vector.extract_strided_slice %29 {offsets = [0, 2], sizes = [4, 510], strides = [1, 1]} : vector<4x512xbf16> to vector<4x510xbf16>
    %36 = vector.extract_strided_slice %29 {offsets = [0, 0], sizes = [4, 2], strides = [1, 1]} : vector<4x512xbf16> to vector<4x2xbf16>
    %37 = tpu.concatenate %35, %36 in 1 : vector<4x510xbf16>, vector<4x2xbf16> -> vector<4x512xbf16>
    %c36 = arith.constant 36 : index
    %c0_12 = arith.constant 0 : index
    %38 = vector.load %arg5[%c36, %c0_12] : memref<196x1024xbf16, #tpu.memory_space<vmem>>, vector<4x512xbf16>
    tpu.vector_store %arg5[%c36, %c0_12], %37 {strides = array<i32>} : memref<196x1024xbf16, #tpu.memory_space<vmem>>, vector<4x512xbf16>,
    %39 = vector.extract_strided_slice %29 {offsets = [0, 3], sizes = [4, 509], strides = [1, 1]} : vector<4x512xbf16> to vector<4x509xbf16>
    %40 = vector.extract_strided_slice %29 {offsets = [0, 0], sizes = [4, 3], strides = [1, 1]} : vector<4x512xbf16> to vector<4x3xbf16>
    %41 = tpu.concatenate %39, %40 in 1 : vector<4x509xbf16>, vector<4x3xbf16> -> vector<4x512xbf16>
    %c40 = arith.constant 40 : index
    %c0_13 = arith.constant 0 : index
    %42 = vector.load %arg5[%c40, %c0_13] : memref<196x1024xbf16, #tpu.memory_space<vmem>>, vector<4x512xbf16>
    tpu.vector_store %arg5[%c40, %c0_13], %41 {strides = array<i32>} : memref<196x1024xbf16, #tpu.memory_space<vmem>>, vector<4x512xbf16>,
    %43 = vector.extract_strided_slice %29 {offsets = [0, 4], sizes = [4, 508], strides = [1, 1]} : vector<4x512xbf16> to vector<4x508xbf16>
    %44 = vector.extract_strided_slice %29 {offsets = [0, 0], sizes = [4, 4], strides = [1, 1]} : vector<4x512xbf16> to vector<4x4xbf16>
    %45 = tpu.concatenate %43, %44 in 1 : vector<4x508xbf16>, vector<4x4xbf16> -> vector<4x512xbf16>
    %c44 = arith.constant 44 : index
    %c0_14 = arith.constant 0 : index
    %46 = vector.load %arg5[%c44, %c0_14] : memref<196x1024xbf16, #tpu.memory_space<vmem>>, vector<4x512xbf16>
    tpu.vector_store %arg5[%c44, %c0_14], %45 {strides = array<i32>} : memref<196x1024xbf16, #tpu.memory_space<vmem>>, vector<4x512xbf16>,
    %47 = vector.extract_strided_slice %29 {offsets = [0, 5], sizes = [4, 507], strides = [1, 1]} : vector<4x512xbf16> to vector<4x507xbf16>
    %48 = vector.extract_strided_slice %29 {offsets = [0, 0], sizes = [4, 5], strides = [1, 1]} : vector<4x512xbf16> to vector<4x5xbf16>
    %49 = tpu.concatenate %47, %48 in 1 : vector<4x507xbf16>, vector<4x5xbf16> -> vector<4x512xbf16>
    %c48 = arith.constant 48 : index
    %c0_15 = arith.constant 0 : index
    %50 = vector.load %arg5[%c48, %c0_15] : memref<196x1024xbf16, #tpu.memory_space<vmem>>, vector<4x512xbf16>
    tpu.vector_store %arg5[%c48, %c0_15], %49 {strides = array<i32>} : memref<196x1024xbf16, #tpu.memory_space<vmem>>, vector<4x512xbf16>,
    %51 = vector.extract_strided_slice %29 {offsets = [0, 6], sizes = [4, 506], strides = [1, 1]} : vector<4x512xbf16> to vector<4x506xbf16>
    %52 = vector.extract_strided_slice %29 {offsets = [0, 0], sizes = [4, 6], strides = [1, 1]} : vector<4x512xbf16> to vector<4x6xbf16>
    %53 = tpu.concatenate %51, %52 in 1 : vector<4x506xbf16>, vector<4x6xbf16> -> vector<4x512xbf16>
    %c52 = arith.constant 52 : index
    %c0_16 = arith.constant 0 : index
    %54 = vector.load %arg5[%c52, %c0_16] : memref<196x1024xbf16, #tpu.memory_space<vmem>>, vector<4x512xbf16>
    tpu.vector_store %arg5[%c52, %c0_16], %53 {strides = array<i32>} : memref<196x1024xbf16, #tpu.memory_space<vmem>>, vector<4x512xbf16>,
    %55 = vector.extract_strided_slice %1 {offsets = [0, 44], sizes = [4, 468], strides = [1, 1]} : vector<4x512xbf16> to vector<4x468xbf16>
    %56 = vector.extract_strided_slice %1 {offsets = [0, 0], sizes = [4, 44], strides = [1, 1]} : vector<4x512xbf16> to vector<4x44xbf16>
    %57 = tpu.concatenate %55, %56 in 1 : vector<4x468xbf16>, vector<4x44xbf16> -> vector<4x512xbf16>
    %c56 = arith.constant 56 : index
    %c0_17 = arith.constant 0 : index
    %58 = vector.load %arg5[%c56, %c0_17] : memref<196x1024xbf16, #tpu.memory_space<vmem>>, vector<4x512xbf16>
    tpu.vector_store %arg5[%c56, %c0_17], %57 {strides = array<i32>} : memref<196x1024xbf16, #tpu.memory_space<vmem>>, vector<4x512xbf16>,
    %59 = vector.extract_strided_slice %57 {offsets = [0, 1], sizes = [4, 511], strides = [1, 1]} : vector<4x512xbf16> to vector<4x511xbf16>
    %60 = vector.extract_strided_slice %57 {offsets = [0, 0], sizes = [4, 1], strides = [1, 1]} : vector<4x512xbf16> to vector<4x1xbf16>
    %61 = tpu.concatenate %59, %60 in 1 : vector<4x511xbf16>, vector<4x1xbf16> -> vector<4x512xbf16>
    %c60 = arith.constant 60 : index
    %c0_18 = arith.constant 0 : index
    %62 = vector.load %arg5[%c60, %c0_18] : memref<196x1024xbf16, #tpu.memory_space<vmem>>, vector<4x512xbf16>
    tpu.vector_store %arg5[%c60, %c0_18], %61 {strides = array<i32>} : memref<196x1024xbf16, #tpu.memory_space<vmem>>, vector<4x512xbf16>,
    %63 = vector.extract_strided_slice %57 {offsets = [0, 2], sizes = [4, 510], strides = [1, 1]} : vector<4x512xbf16> to vector<4x510xbf16>
    %64 = vector.extract_strided_slice %57 {offsets = [0, 0], sizes = [4, 2], strides = [1, 1]} : vector<4x512xbf16> to vector<4x2xbf16>
    %65 = tpu.concatenate %63, %64 in 1 : vector<4x510xbf16>, vector<4x2xbf16> -> vector<4x512xbf16>
    %c64 = arith.constant 64 : index
    %c0_19 = arith.constant 0 : index
    %66 = vector.load %arg5[%c64, %c0_19] : memref<196x1024xbf16, #tpu.memory_space<vmem>>, vector<4x512xbf16>
    tpu.vector_store %arg5[%c64, %c0_19], %65 {strides = array<i32>} : memref<196x1024xbf16, #tpu.memory_space<vmem>>, vector<4x512xbf16>,
    %67 = vector.extract_strided_slice %57 {offsets = [0, 3], sizes = [4, 509], strides = [1, 1]} : vector<4x512xbf16> to vector<4x509xbf16>
    %68 = vector.extract_strided_slice %57 {offsets = [0, 0], sizes = [4, 3], strides = [1, 1]} : vector<4x512xbf16> to vector<4x3xbf16>
    %69 = tpu.concatenate %67, %68 in 1 : vector<4x509xbf16>, vector<4x3xbf16> -> vector<4x512xbf16>
    %c68 = arith.constant 68 : index
    %c0_20 = arith.constant 0 : index
    %70 = vector.load %arg5[%c68, %c0_20] : memref<196x1024xbf16, #tpu.memory_space<vmem>>, vector<4x512xbf16>
    tpu.vector_store %arg5[%c68, %c0_20], %69 {strides = array<i32>} : memref<196x1024xbf16, #tpu.memory_space<vmem>>, vector<4x512xbf16>,
    %71 = vector.extract_strided_slice %57 {offsets = [0, 4], sizes = [4, 508], strides = [1, 1]} : vector<4x512xbf16> to vector<4x508xbf16>
    %72 = vector.extract_strided_slice %57 {offsets = [0, 0], sizes = [4, 4], strides = [1, 1]} : vector<4x512xbf16> to vector<4x4xbf16>
    %73 = tpu.concatenate %71, %72 in 1 : vector<4x508xbf16>, vector<4x4xbf16> -> vector<4x512xbf16>
    %c72 = arith.constant 72 : index
    %c0_21 = arith.constant 0 : index
    %74 = vector.load %arg5[%c72, %c0_21] : memref<196x1024xbf16, #tpu.memory_space<vmem>>, vector<4x512xbf16>
    tpu.vector_store %arg5[%c72, %c0_21], %73 {strides = array<i32>} : memref<196x1024xbf16, #tpu.memory_space<vmem>>, vector<4x512xbf16>,
    %75 = vector.extract_strided_slice %57 {offsets = [0, 5], sizes = [4, 507], strides = [1, 1]} : vector<4x512xbf16> to vector<4x507xbf16>
    %76 = vector.extract_strided_slice %57 {offsets = [0, 0], sizes = [4, 5], strides = [1, 1]} : vector<4x512xbf16> to vector<4x5xbf16>
    %77 = tpu.concatenate %75, %76 in 1 : vector<4x507xbf16>, vector<4x5xbf16> -> vector<4x512xbf16>
    %c76 = arith.constant 76 : index
    %c0_22 = arith.constant 0 : index
    %78 = vector.load %arg5[%c76, %c0_22] : memref<196x1024xbf16, #tpu.memory_space<vmem>>, vector<4x512xbf16>
    tpu.vector_store %arg5[%c76, %c0_22], %77 {strides = array<i32>} : memref<196x1024xbf16, #tpu.memory_space<vmem>>, vector<4x512xbf16>,
    %79 = vector.extract_strided_slice %57 {offsets = [0, 6], sizes = [4, 506], strides = [1, 1]} : vector<4x512xbf16> to vector<4x506xbf16>
    %80 = vector.extract_strided_slice %57 {offsets = [0, 0], sizes = [4, 6], strides = [1, 1]} : vector<4x512xbf16> to vector<4x6xbf16>
    %81 = tpu.concatenate %79, %80 in 1 : vector<4x506xbf16>, vector<4x6xbf16> -> vector<4x512xbf16>
    %c80 = arith.constant 80 : index
    %c0_23 = arith.constant 0 : index
    %82 = vector.load %arg5[%c80, %c0_23] : memref<196x1024xbf16, #tpu.memory_space<vmem>>, vector<4x512xbf16>
    tpu.vector_store %arg5[%c80, %c0_23], %81 {strides = array<i32>} : memref<196x1024xbf16, #tpu.memory_space<vmem>>, vector<4x512xbf16>,
    %83 = vector.extract_strided_slice %1 {offsets = [0, 66], sizes = [4, 446], strides = [1, 1]} : vector<4x512xbf16> to vector<4x446xbf16>
    %84 = vector.extract_strided_slice %1 {offsets = [0, 0], sizes = [4, 66], strides = [1, 1]} : vector<4x512xbf16> to vector<4x66xbf16>
    %85 = tpu.concatenate %83, %84 in 1 : vector<4x446xbf16>, vector<4x66xbf16> -> vector<4x512xbf16>
    %c84 = arith.constant 84 : index
    %c0_24 = arith.constant 0 : index
    %86 = vector.load %arg5[%c84, %c0_24] : memref<196x1024xbf16, #tpu.memory_space<vmem>>, vector<4x512xbf16>
    tpu.vector_store %arg5[%c84, %c0_24], %85 {strides = array<i32>} : memref<196x1024xbf16, #tpu.memory_space<vmem>>, vector<4x512xbf16>,
    %87 = vector.extract_strided_slice %85 {offsets = [0, 1], sizes = [4, 511], strides = [1, 1]} : vector<4x512xbf16> to vector<4x511xbf16>
    %88 = vector.extract_strided_slice %85 {offsets = [0, 0], sizes = [4, 1], strides = [1, 1]} : vector<4x512xbf16> to vector<4x1xbf16>
    %89 = tpu.concatenate %87, %88 in 1 : vector<4x511xbf16>, vector<4x1xbf16> -> vector<4x512xbf16>
    %c88 = arith.constant 88 : index
    %c0_25 = arith.constant 0 : index
    %90 = vector.load %arg5[%c88, %c0_25] : memref<196x1024xbf16, #tpu.memory_space<vmem>>, vector<4x512xbf16>
    tpu.vector_store %arg5[%c88, %c0_25], %89 {strides = array<i32>} : memref<196x1024xbf16, #tpu.memory_space<vmem>>, vector<4x512xbf16>,
    %91 = vector.extract_strided_slice %85 {offsets = [0, 2], sizes = [4, 510], strides = [1, 1]} : vector<4x512xbf16> to vector<4x510xbf16>
    %92 = vector.extract_strided_slice %85 {offsets = [0, 0], sizes = [4, 2], strides = [1, 1]} : vector<4x512xbf16> to vector<4x2xbf16>
    %93 = tpu.concatenate %91, %92 in 1 : vector<4x510xbf16>, vector<4x2xbf16> -> vector<4x512xbf16>
    %c92 = arith.constant 92 : index
    %c0_26 = arith.constant 0 : index
    %94 = vector.load %arg5[%c92, %c0_26] : memref<196x1024xbf16, #tpu.memory_space<vmem>>, vector<4x512xbf16>
    tpu.vector_store %arg5[%c92, %c0_26], %93 {strides = array<i32>} : memref<196x1024xbf16, #tpu.memory_space<vmem>>, vector<4x512xbf16>,
    %95 = vector.extract_strided_slice %85 {offsets = [0, 3], sizes = [4, 509], strides = [1, 1]} : vector<4x512xbf16> to vector<4x509xbf16>
    %96 = vector.extract_strided_slice %85 {offsets = [0, 0], sizes = [4, 3], strides = [1, 1]} : vector<4x512xbf16> to vector<4x3xbf16>
    %97 = tpu.concatenate %95, %96 in 1 : vector<4x509xbf16>, vector<4x3xbf16> -> vector<4x512xbf16>
    %c96 = arith.constant 96 : index
    %c0_27 = arith.constant 0 : index
    %98 = vector.load %arg5[%c96, %c0_27] : memref<196x1024xbf16, #tpu.memory_space<vmem>>, vector<4x512xbf16>
    tpu.vector_store %arg5[%c96, %c0_27], %97 {strides = array<i32>} : memref<196x1024xbf16, #tpu.memory_space<vmem>>, vector<4x512xbf16>,
    %99 = vector.extract_strided_slice %85 {offsets = [0, 4], sizes = [4, 508], strides = [1, 1]} : vector<4x512xbf16> to vector<4x508xbf16>
    %100 = vector.extract_strided_slice %85 {offsets = [0, 0], sizes = [4, 4], strides = [1, 1]} : vector<4x512xbf16> to vector<4x4xbf16>
    %101 = tpu.concatenate %99, %100 in 1 : vector<4x508xbf16>, vector<4x4xbf16> -> vector<4x512xbf16>
    %c100 = arith.constant 100 : index
    %c0_28 = arith.constant 0 : index
    %102 = vector.load %arg5[%c100, %c0_28] : memref<196x1024xbf16, #tpu.memory_space<vmem>>, vector<4x512xbf16>
    tpu.vector_store %arg5[%c100, %c0_28], %101 {strides = array<i32>} : memref<196x1024xbf16, #tpu.memory_space<vmem>>, vector<4x512xbf16>,
    %103 = vector.extract_strided_slice %85 {offsets = [0, 5], sizes = [4, 507], strides = [1, 1]} : vector<4x512xbf16> to vector<4x507xbf16>
    %104 = vector.extract_strided_slice %85 {offsets = [0, 0], sizes = [4, 5], strides = [1, 1]} : vector<4x512xbf16> to vector<4x5xbf16>
    %105 = tpu.concatenate %103, %104 in 1 : vector<4x507xbf16>, vector<4x5xbf16> -> vector<4x512xbf16>
    %c104 = arith.constant 104 : index
    %c0_29 = arith.constant 0 : index
    %106 = vector.load %arg5[%c104, %c0_29] : memref<196x1024xbf16, #tpu.memory_space<vmem>>, vector<4x512xbf16>
    tpu.vector_store %arg5[%c104, %c0_29], %105 {strides = array<i32>} : memref<196x1024xbf16, #tpu.memory_space<vmem>>, vector<4x512xbf16>,
    %107 = vector.extract_strided_slice %85 {offsets = [0, 6], sizes = [4, 506], strides = [1, 1]} : vector<4x512xbf16> to vector<4x506xbf16>
    %108 = vector.extract_strided_slice %85 {offsets = [0, 0], sizes = [4, 6], strides = [1, 1]} : vector<4x512xbf16> to vector<4x6xbf16>
    %109 = tpu.concatenate %107, %108 in 1 : vector<4x506xbf16>, vector<4x6xbf16> -> vector<4x512xbf16>
    %c108 = arith.constant 108 : index
    %c0_30 = arith.constant 0 : index
    %110 = vector.load %arg5[%c108, %c0_30] : memref<196x1024xbf16, #tpu.memory_space<vmem>>, vector<4x512xbf16>
    tpu.vector_store %arg5[%c108, %c0_30], %109 {strides = array<i32>} : memref<196x1024xbf16, #tpu.memory_space<vmem>>, vector<4x512xbf16>,
    %111 = vector.extract_strided_slice %1 {offsets = [0, 88], sizes = [4, 424], strides = [1, 1]} : vector<4x512xbf16> to vector<4x424xbf16>
    %112 = vector.extract_strided_slice %1 {offsets = [0, 0], sizes = [4, 88], strides = [1, 1]} : vector<4x512xbf16> to vector<4x88xbf16>
    %113 = tpu.concatenate %111, %112 in 1 : vector<4x424xbf16>, vector<4x88xbf16> -> vector<4x512xbf16>
    %c112 = arith.constant 112 : index
    %c0_31 = arith.constant 0 : index
    %114 = vector.load %arg5[%c112, %c0_31] : memref<196x1024xbf16, #tpu.memory_space<vmem>>, vector<4x512xbf16>
    tpu.vector_store %arg5[%c112, %c0_31], %113 {strides = array<i32>} : memref<196x1024xbf16, #tpu.memory_space<vmem>>, vector<4x512xbf16>,
    %115 = vector.extract_strided_slice %113 {offsets = [0, 1], sizes = [4, 511], strides = [1, 1]} : vector<4x512xbf16> to vector<4x511xbf16>
    %116 = vector.extract_strided_slice %113 {offsets = [0, 0], sizes = [4, 1], strides = [1, 1]} : vector<4x512xbf16> to vector<4x1xbf16>
    %117 = tpu.concatenate %115, %116 in 1 : vector<4x511xbf16>, vector<4x1xbf16> -> vector<4x512xbf16>
    %c116 = arith.constant 116 : index
    %c0_32 = arith.constant 0 : index
    %118 = vector.load %arg5[%c116, %c0_32] : memref<196x1024xbf16, #tpu.memory_space<vmem>>, vector<4x512xbf16>
    tpu.vector_store %arg5[%c116, %c0_32], %117 {strides = array<i32>} : memref<196x1024xbf16, #tpu.memory_space<vmem>>, vector<4x512xbf16>,
    %119 = vector.extract_strided_slice %113 {offsets = [0, 2], sizes = [4, 510], strides = [1, 1]} : vector<4x512xbf16> to vector<4x510xbf16>
    %120 = vector.extract_strided_slice %113 {offsets = [0, 0], sizes = [4, 2], strides = [1, 1]} : vector<4x512xbf16> to vector<4x2xbf16>
    %121 = tpu.concatenate %119, %120 in 1 : vector<4x510xbf16>, vector<4x2xbf16> -> vector<4x512xbf16>
    %c120 = arith.constant 120 : index
    %c0_33 = arith.constant 0 : index
    %122 = vector.load %arg5[%c120, %c0_33] : memref<196x1024xbf16, #tpu.memory_space<vmem>>, vector<4x512xbf16>
    tpu.vector_store %arg5[%c120, %c0_33], %121 {strides = array<i32>} : memref<196x1024xbf16, #tpu.memory_space<vmem>>, vector<4x512xbf16>,
    %123 = vector.extract_strided_slice %113 {offsets = [0, 3], sizes = [4, 509], strides = [1, 1]} : vector<4x512xbf16> to vector<4x509xbf16>
    %124 = vector.extract_strided_slice %113 {offsets = [0, 0], sizes = [4, 3], strides = [1, 1]} : vector<4x512xbf16> to vector<4x3xbf16>
    %125 = tpu.concatenate %123, %124 in 1 : vector<4x509xbf16>, vector<4x3xbf16> -> vector<4x512xbf16>
    %c124 = arith.constant 124 : index
    %c0_34 = arith.constant 0 : index
    %126 = vector.load %arg5[%c124, %c0_34] : memref<196x1024xbf16, #tpu.memory_space<vmem>>, vector<4x512xbf16>
    tpu.vector_store %arg5[%c124, %c0_34], %125 {strides = array<i32>} : memref<196x1024xbf16, #tpu.memory_space<vmem>>, vector<4x512xbf16>,
    %127 = vector.extract_strided_slice %113 {offsets = [0, 4], sizes = [4, 508], strides = [1, 1]} : vector<4x512xbf16> to vector<4x508xbf16>
    %128 = vector.extract_strided_slice %113 {offsets = [0, 0], sizes = [4, 4], strides = [1, 1]} : vector<4x512xbf16> to vector<4x4xbf16>
    %129 = tpu.concatenate %127, %128 in 1 : vector<4x508xbf16>, vector<4x4xbf16> -> vector<4x512xbf16>
    %c128 = arith.constant 128 : index
    %c0_35 = arith.constant 0 : index
    %130 = vector.load %arg5[%c128, %c0_35] : memref<196x1024xbf16, #tpu.memory_space<vmem>>, vector<4x512xbf16>
    tpu.vector_store %arg5[%c128, %c0_35], %129 {strides = array<i32>} : memref<196x1024xbf16, #tpu.memory_space<vmem>>, vector<4x512xbf16>,
    %131 = vector.extract_strided_slice %113 {offsets = [0, 5], sizes = [4, 507], strides = [1, 1]} : vector<4x512xbf16> to vector<4x507xbf16>
    %132 = vector.extract_strided_slice %113 {offsets = [0, 0], sizes = [4, 5], strides = [1, 1]} : vector<4x512xbf16> to vector<4x5xbf16>
    %133 = tpu.concatenate %131, %132 in 1 : vector<4x507xbf16>, vector<4x5xbf16> -> vector<4x512xbf16>
    %c132 = arith.constant 132 : index
    %c0_36 = arith.constant 0 : index
    %134 = vector.load %arg5[%c132, %c0_36] : memref<196x1024xbf16, #tpu.memory_space<vmem>>, vector<4x512xbf16>
    tpu.vector_store %arg5[%c132, %c0_36], %133 {strides = array<i32>} : memref<196x1024xbf16, #tpu.memory_space<vmem>>, vector<4x512xbf16>,
    %135 = vector.extract_strided_slice %113 {offsets = [0, 6], sizes = [4, 506], strides = [1, 1]} : vector<4x512xbf16> to vector<4x506xbf16>
    %136 = vector.extract_strided_slice %113 {offsets = [0, 0], sizes = [4, 6], strides = [1, 1]} : vector<4x512xbf16> to vector<4x6xbf16>
    %137 = tpu.concatenate %135, %136 in 1 : vector<4x506xbf16>, vector<4x6xbf16> -> vector<4x512xbf16>
    %c136 = arith.constant 136 : index
    %c0_37 = arith.constant 0 : index
    %138 = vector.load %arg5[%c136, %c0_37] : memref<196x1024xbf16, #tpu.memory_space<vmem>>, vector<4x512xbf16>
    tpu.vector_store %arg5[%c136, %c0_37], %137 {strides = array<i32>} : memref<196x1024xbf16, #tpu.memory_space<vmem>>, vector<4x512xbf16>,
    %139 = vector.extract_strided_slice %1 {offsets = [0, 110], sizes = [4, 402], strides = [1, 1]} : vector<4x512xbf16> to vector<4x402xbf16>
    %140 = vector.extract_strided_slice %1 {offsets = [0, 0], sizes = [4, 110], strides = [1, 1]} : vector<4x512xbf16> to vector<4x110xbf16>
    %141 = tpu.concatenate %139, %140 in 1 : vector<4x402xbf16>, vector<4x110xbf16> -> vector<4x512xbf16>
    %c140 = arith.constant 140 : index
    %c0_38 = arith.constant 0 : index
    %142 = vector.load %arg5[%c140, %c0_38] : memref<196x1024xbf16, #tpu.memory_space<vmem>>, vector<4x512xbf16>
    tpu.vector_store %arg5[%c140, %c0_38], %141 {strides = array<i32>} : memref<196x1024xbf16, #tpu.memory_space<vmem>>, vector<4x512xbf16>,
    %143 = vector.extract_strided_slice %141 {offsets = [0, 1], sizes = [4, 511], strides = [1, 1]} : vector<4x512xbf16> to vector<4x511xbf16>
    %144 = vector.extract_strided_slice %141 {offsets = [0, 0], sizes = [4, 1], strides = [1, 1]} : vector<4x512xbf16> to vector<4x1xbf16>
    %145 = tpu.concatenate %143, %144 in 1 : vector<4x511xbf16>, vector<4x1xbf16> -> vector<4x512xbf16>
    %c144 = arith.constant 144 : index
    %c0_39 = arith.constant 0 : index
    %146 = vector.load %arg5[%c144, %c0_39] : memref<196x1024xbf16, #tpu.memory_space<vmem>>, vector<4x512xbf16>
    tpu.vector_store %arg5[%c144, %c0_39], %145 {strides = array<i32>} : memref<196x1024xbf16, #tpu.memory_space<vmem>>, vector<4x512xbf16>,
    %147 = vector.extract_strided_slice %141 {offsets = [0, 2], sizes = [4, 510], strides = [1, 1]} : vector<4x512xbf16> to vector<4x510xbf16>
    %148 = vector.extract_strided_slice %141 {offsets = [0, 0], sizes = [4, 2], strides = [1, 1]} : vector<4x512xbf16> to vector<4x2xbf16>
    %149 = tpu.concatenate %147, %148 in 1 : vector<4x510xbf16>, vector<4x2xbf16> -> vector<4x512xbf16>
    %c148 = arith.constant 148 : index
    %c0_40 = arith.constant 0 : index
    %150 = vector.load %arg5[%c148, %c0_40] : memref<196x1024xbf16, #tpu.memory_space<vmem>>, vector<4x512xbf16>
    tpu.vector_store %arg5[%c148, %c0_40], %149 {strides = array<i32>} : memref<196x1024xbf16, #tpu.memory_space<vmem>>, vector<4x512xbf16>,
    %151 = vector.extract_strided_slice %141 {offsets = [0, 3], sizes = [4, 509], strides = [1, 1]} : vector<4x512xbf16> to vector<4x509xbf16>
    %152 = vector.extract_strided_slice %141 {offsets = [0, 0], sizes = [4, 3], strides = [1, 1]} : vector<4x512xbf16> to vector<4x3xbf16>
    %153 = tpu.concatenate %151, %152 in 1 : vector<4x509xbf16>, vector<4x3xbf16> -> vector<4x512xbf16>
    %c152 = arith.constant 152 : index
    %c0_41 = arith.constant 0 : index
    %154 = vector.load %arg5[%c152, %c0_41] : memref<196x1024xbf16, #tpu.memory_space<vmem>>, vector<4x512xbf16>
    tpu.vector_store %arg5[%c152, %c0_41], %153 {strides = array<i32>} : memref<196x1024xbf16, #tpu.memory_space<vmem>>, vector<4x512xbf16>,
    %155 = vector.extract_strided_slice %141 {offsets = [0, 4], sizes = [4, 508], strides = [1, 1]} : vector<4x512xbf16> to vector<4x508xbf16>
    %156 = vector.extract_strided_slice %141 {offsets = [0, 0], sizes = [4, 4], strides = [1, 1]} : vector<4x512xbf16> to vector<4x4xbf16>
    %157 = tpu.concatenate %155, %156 in 1 : vector<4x508xbf16>, vector<4x4xbf16> -> vector<4x512xbf16>
    %c156 = arith.constant 156 : index
    %c0_42 = arith.constant 0 : index
    %158 = vector.load %arg5[%c156, %c0_42] : memref<196x1024xbf16, #tpu.memory_space<vmem>>, vector<4x512xbf16>
    tpu.vector_store %arg5[%c156, %c0_42], %157 {strides = array<i32>} : memref<196x1024xbf16, #tpu.memory_space<vmem>>, vector<4x512xbf16>,
    %159 = vector.extract_strided_slice %141 {offsets = [0, 5], sizes = [4, 507], strides = [1, 1]} : vector<4x512xbf16> to vector<4x507xbf16>
    %160 = vector.extract_strided_slice %141 {offsets = [0, 0], sizes = [4, 5], strides = [1, 1]} : vector<4x512xbf16> to vector<4x5xbf16>
    %161 = tpu.concatenate %159, %160 in 1 : vector<4x507xbf16>, vector<4x5xbf16> -> vector<4x512xbf16>
    %c160 = arith.constant 160 : index
    %c0_43 = arith.constant 0 : index
    %162 = vector.load %arg5[%c160, %c0_43] : memref<196x1024xbf16, #tpu.memory_space<vmem>>, vector<4x512xbf16>
    tpu.vector_store %arg5[%c160, %c0_43], %161 {strides = array<i32>} : memref<196x1024xbf16, #tpu.memory_space<vmem>>, vector<4x512xbf16>,
    %163 = vector.extract_strided_slice %141 {offsets = [0, 6], sizes = [4, 506], strides = [1, 1]} : vector<4x512xbf16> to vector<4x506xbf16>
    %164 = vector.extract_strided_slice %141 {offsets = [0, 0], sizes = [4, 6], strides = [1, 1]} : vector<4x512xbf16> to vector<4x6xbf16>
    %165 = tpu.concatenate %163, %164 in 1 : vector<4x506xbf16>, vector<4x6xbf16> -> vector<4x512xbf16>
    %c164 = arith.constant 164 : index
    %c0_44 = arith.constant 0 : index
    %166 = vector.load %arg5[%c164, %c0_44] : memref<196x1024xbf16, #tpu.memory_space<vmem>>, vector<4x512xbf16>
    tpu.vector_store %arg5[%c164, %c0_44], %165 {strides = array<i32>} : memref<196x1024xbf16, #tpu.memory_space<vmem>>, vector<4x512xbf16>,
    %167 = vector.extract_strided_slice %1 {offsets = [0, 132], sizes = [4, 380], strides = [1, 1]} : vector<4x512xbf16> to vector<4x380xbf16>
    %168 = vector.extract_strided_slice %1 {offsets = [0, 0], sizes = [4, 132], strides = [1, 1]} : vector<4x512xbf16> to vector<4x132xbf16>
    %169 = tpu.concatenate %167, %168 in 1 : vector<4x380xbf16>, vector<4x132xbf16> -> vector<4x512xbf16>
    %c168 = arith.constant 168 : index
    %c0_45 = arith.constant 0 : index
    %170 = vector.load %arg5[%c168, %c0_45] : memref<196x1024xbf16, #tpu.memory_space<vmem>>, vector<4x512xbf16>
    tpu.vector_store %arg5[%c168, %c0_45], %169 {strides = array<i32>} : memref<196x1024xbf16, #tpu.memory_space<vmem>>, vector<4x512xbf16>,
    %171 = vector.extract_strided_slice %169 {offsets = [0, 1], sizes = [4, 511], strides = [1, 1]} : vector<4x512xbf16> to vector<4x511xbf16>
    %172 = vector.extract_strided_slice %169 {offsets = [0, 0], sizes = [4, 1], strides = [1, 1]} : vector<4x512xbf16> to vector<4x1xbf16>
    %173 = tpu.concatenate %171, %172 in 1 : vector<4x511xbf16>, vector<4x1xbf16> -> vector<4x512xbf16>
    %c172 = arith.constant 172 : index
    %c0_46 = arith.constant 0 : index
    %174 = vector.load %arg5[%c172, %c0_46] : memref<196x1024xbf16, #tpu.memory_space<vmem>>, vector<4x512xbf16>
    tpu.vector_store %arg5[%c172, %c0_46], %173 {strides = array<i32>} : memref<196x1024xbf16, #tpu.memory_space<vmem>>, vector<4x512xbf16>,
    %175 = vector.extract_strided_slice %169 {offsets = [0, 2], sizes = [4, 510], strides = [1, 1]} : vector<4x512xbf16> to vector<4x510xbf16>
    %176 = vector.extract_strided_slice %169 {offsets = [0, 0], sizes = [4, 2], strides = [1, 1]} : vector<4x512xbf16> to vector<4x2xbf16>
    %177 = tpu.concatenate %175, %176 in 1 : vector<4x510xbf16>, vector<4x2xbf16> -> vector<4x512xbf16>
    %c176 = arith.constant 176 : index
    %c0_47 = arith.constant 0 : index
    %178 = vector.load %arg5[%c176, %c0_47] : memref<196x1024xbf16, #tpu.memory_space<vmem>>, vector<4x512xbf16>
    tpu.vector_store %arg5[%c176, %c0_47], %177 {strides = array<i32>} : memref<196x1024xbf16, #tpu.memory_space<vmem>>, vector<4x512xbf16>,
    %179 = vector.extract_strided_slice %169 {offsets = [0, 3], sizes = [4, 509], strides = [1, 1]} : vector<4x512xbf16> to vector<4x509xbf16>
    %180 = vector.extract_strided_slice %169 {offsets = [0, 0], sizes = [4, 3], strides = [1, 1]} : vector<4x512xbf16> to vector<4x3xbf16>
    %181 = tpu.concatenate %179, %180 in 1 : vector<4x509xbf16>, vector<4x3xbf16> -> vector<4x512xbf16>
    %c180 = arith.constant 180 : index
    %c0_48 = arith.constant 0 : index
    %182 = vector.load %arg5[%c180, %c0_48] : memref<196x1024xbf16, #tpu.memory_space<vmem>>, vector<4x512xbf16>
    tpu.vector_store %arg5[%c180, %c0_48], %181 {strides = array<i32>} : memref<196x1024xbf16, #tpu.memory_space<vmem>>, vector<4x512xbf16>,
    %183 = vector.extract_strided_slice %169 {offsets = [0, 4], sizes = [4, 508], strides = [1, 1]} : vector<4x512xbf16> to vector<4x508xbf16>
    %184 = vector.extract_strided_slice %169 {offsets = [0, 0], sizes = [4, 4], strides = [1, 1]} : vector<4x512xbf16> to vector<4x4xbf16>
    %185 = tpu.concatenate %183, %184 in 1 : vector<4x508xbf16>, vector<4x4xbf16> -> vector<4x512xbf16>
    %c184 = arith.constant 184 : index
    %c0_49 = arith.constant 0 : index
    %186 = vector.load %arg5[%c184, %c0_49] : memref<196x1024xbf16, #tpu.memory_space<vmem>>, vector<4x512xbf16>
    tpu.vector_store %arg5[%c184, %c0_49], %185 {strides = array<i32>} : memref<196x1024xbf16, #tpu.memory_space<vmem>>, vector<4x512xbf16>,
    %187 = vector.extract_strided_slice %169 {offsets = [0, 5], sizes = [4, 507], strides = [1, 1]} : vector<4x512xbf16> to vector<4x507xbf16>
    %188 = vector.extract_strided_slice %169 {offsets = [0, 0], sizes = [4, 5], strides = [1, 1]} : vector<4x512xbf16> to vector<4x5xbf16>
    %189 = tpu.concatenate %187, %188 in 1 : vector<4x507xbf16>, vector<4x5xbf16> -> vector<4x512xbf16>
    %c188 = arith.constant 188 : index
    %c0_50 = arith.constant 0 : index
    %190 = vector.load %arg5[%c188, %c0_50] : memref<196x1024xbf16, #tpu.memory_space<vmem>>, vector<4x512xbf16>
    tpu.vector_store %arg5[%c188, %c0_50], %189 {strides = array<i32>} : memref<196x1024xbf16, #tpu.memory_space<vmem>>, vector<4x512xbf16>,
    %191 = vector.extract_strided_slice %169 {offsets = [0, 6], sizes = [4, 506], strides = [1, 1]} : vector<4x512xbf16> to vector<4x506xbf16>
    %192 = vector.extract_strided_slice %169 {offsets = [0, 0], sizes = [4, 6], strides = [1, 1]} : vector<4x512xbf16> to vector<4x6xbf16>
    %193 = tpu.concatenate %191, %192 in 1 : vector<4x506xbf16>, vector<4x6xbf16> -> vector<4x512xbf16>
    %c192 = arith.constant 192 : index
    %c0_51 = arith.constant 0 : index
    %194 = vector.load %arg5[%c192, %c0_51] : memref<196x1024xbf16, #tpu.memory_space<vmem>>, vector<4x512xbf16>
    tpu.vector_store %arg5[%c192, %c0_51], %193 {strides = array<i32>} : memref<196x1024xbf16, #tpu.memory_space<vmem>>, vector<4x512xbf16>,
    %c1 = arith.constant 1 : index
    %c0_52 = arith.constant 0 : index
    %c0_53 = arith.constant 0 : index
    %195 = vector.load %arg1[%c1, %c0_52, %c0_53] : memref<2x4x512xbf16, #tpu.memory_space<vmem>>, vector<1x4x512xbf16>
    %196 = vector.shape_cast %195 : vector<1x4x512xbf16> to vector<4x512xbf16>
    %c0_54 = arith.constant 0 : index
    %c512 = arith.constant 512 : index
    %197 = vector.load %arg5[%c0_54, %c512] : memref<196x1024xbf16, #tpu.memory_space<vmem>>, vector<4x512xbf16>
    tpu.vector_store %arg5[%c0_54, %c512], %196 {strides = array<i32>} : memref<196x1024xbf16, #tpu.memory_space<vmem>>, vector<4x512xbf16>,
    %198 = vector.extract_strided_slice %196 {offsets = [0, 1], sizes = [4, 511], strides = [1, 1]} : vector<4x512xbf16> to vector<4x511xbf16>
    %199 = vector.extract_strided_slice %196 {offsets = [0, 0], sizes = [4, 1], strides = [1, 1]} : vector<4x512xbf16> to vector<4x1xbf16>
    %200 = tpu.concatenate %198, %199 in 1 : vector<4x511xbf16>, vector<4x1xbf16> -> vector<4x512xbf16>
    %c4_55 = arith.constant 4 : index
    %c512_56 = arith.constant 512 : index
    %201 = vector.load %arg5[%c4_55, %c512_56] : memref<196x1024xbf16, #tpu.memory_space<vmem>>, vector<4x512xbf16>
    tpu.vector_store %arg5[%c4_55, %c512_56], %200 {strides = array<i32>} : memref<196x1024xbf16, #tpu.memory_space<vmem>>, vector<4x512xbf16>,
    %202 = vector.extract_strided_slice %196 {offsets = [0, 2], sizes = [4, 510], strides = [1, 1]} : vector<4x512xbf16> to vector<4x510xbf16>
    %203 = vector.extract_strided_slice %196 {offsets = [0, 0], sizes = [4, 2], strides = [1, 1]} : vector<4x512xbf16> to vector<4x2xbf16>
    %204 = tpu.concatenate %202, %203 in 1 : vector<4x510xbf16>, vector<4x2xbf16> -> vector<4x512xbf16>
    %c8_57 = arith.constant 8 : index
    %c512_58 = arith.constant 512 : index
    %205 = vector.load %arg5[%c8_57, %c512_58] : memref<196x1024xbf16, #tpu.memory_space<vmem>>, vector<4x512xbf16>
    tpu.vector_store %arg5[%c8_57, %c512_58], %204 {strides = array<i32>} : memref<196x1024xbf16, #tpu.memory_space<vmem>>, vector<4x512xbf16>,
    %206 = vector.extract_strided_slice %196 {offsets = [0, 3], sizes = [4, 509], strides = [1, 1]} : vector<4x512xbf16> to vector<4x509xbf16>
    %207 = vector.extract_strided_slice %196 {offsets = [0, 0], sizes = [4, 3], strides = [1, 1]} : vector<4x512xbf16> to vector<4x3xbf16>
    %208 = tpu.concatenate %206, %207 in 1 : vector<4x509xbf16>, vector<4x3xbf16> -> vector<4x512xbf16>
    %c12_59 = arith.constant 12 : index
    %c512_60 = arith.constant 512 : index
    %209 = vector.load %arg5[%c12_59, %c512_60] : memref<196x1024xbf16, #tpu.memory_space<vmem>>, vector<4x512xbf16>
    tpu.vector_store %arg5[%c12_59, %c512_60], %208 {strides = array<i32>} : memref<196x1024xbf16, #tpu.memory_space<vmem>>, vector<4x512xbf16>,
    %210 = vector.extract_strided_slice %196 {offsets = [0, 4], sizes = [4, 508], strides = [1, 1]} : vector<4x512xbf16> to vector<4x508xbf16>
    %211 = vector.extract_strided_slice %196 {offsets = [0, 0], sizes = [4, 4], strides = [1, 1]} : vector<4x512xbf16> to vector<4x4xbf16>
    %212 = tpu.concatenate %210, %211 in 1 : vector<4x508xbf16>, vector<4x4xbf16> -> vector<4x512xbf16>
    %c16_61 = arith.constant 16 : index
    %c512_62 = arith.constant 512 : index
    %213 = vector.load %arg5[%c16_61, %c512_62] : memref<196x1024xbf16, #tpu.memory_space<vmem>>, vector<4x512xbf16>
    tpu.vector_store %arg5[%c16_61, %c512_62], %212 {strides = array<i32>} : memref<196x1024xbf16, #tpu.memory_space<vmem>>, vector<4x512xbf16>,
    %214 = vector.extract_strided_slice %196 {offsets = [0, 5], sizes = [4, 507], strides = [1, 1]} : vector<4x512xbf16> to vector<4x507xbf16>
    %215 = vector.extract_strided_slice %196 {offsets = [0, 0], sizes = [4, 5], strides = [1, 1]} : vector<4x512xbf16> to vector<4x5xbf16>
    %216 = tpu.concatenate %214, %215 in 1 : vector<4x507xbf16>, vector<4x5xbf16> -> vector<4x512xbf16>
    %c20_63 = arith.constant 20 : index
    %c512_64 = arith.constant 512 : index
    %217 = vector.load %arg5[%c20_63, %c512_64] : memref<196x1024xbf16, #tpu.memory_space<vmem>>, vector<4x512xbf16>
    tpu.vector_store %arg5[%c20_63, %c512_64], %216 {strides = array<i32>} : memref<196x1024xbf16, #tpu.memory_space<vmem>>, vector<4x512xbf16>,
    %218 = vector.extract_strided_slice %196 {offsets = [0, 6], sizes = [4, 506], strides = [1, 1]} : vector<4x512xbf16> to vector<4x506xbf16>
    %219 = vector.extract_strided_slice %196 {offsets = [0, 0], sizes = [4, 6], strides = [1, 1]} : vector<4x512xbf16> to vector<4x6xbf16>
    %220 = tpu.concatenate %218, %219 in 1 : vector<4x506xbf16>, vector<4x6xbf16> -> vector<4x512xbf16>
    %c24_65 = arith.constant 24 : index
    %c512_66 = arith.constant 512 : index
    %221 = vector.load %arg5[%c24_65, %c512_66] : memref<196x1024xbf16, #tpu.memory_space<vmem>>, vector<4x512xbf16>
    tpu.vector_store %arg5[%c24_65, %c512_66], %220 {strides = array<i32>} : memref<196x1024xbf16, #tpu.memory_space<vmem>>, vector<4x512xbf16>,
    %222 = vector.extract_strided_slice %196 {offsets = [0, 22], sizes = [4, 490], strides = [1, 1]} : vector<4x512xbf16> to vector<4x490xbf16>
    %223 = vector.extract_strided_slice %196 {offsets = [0, 0], sizes = [4, 22], strides = [1, 1]} : vector<4x512xbf16> to vector<4x22xbf16>
    %224 = tpu.concatenate %222, %223 in 1 : vector<4x490xbf16>, vector<4x22xbf16> -> vector<4x512xbf16>
    %c28_67 = arith.constant 28 : index
    %c512_68 = arith.constant 512 : index
    %225 = vector.load %arg5[%c28_67, %c512_68] : memref<196x1024xbf16, #tpu.memory_space<vmem>>, vector<4x512xbf16>
    tpu.vector_store %arg5[%c28_67, %c512_68], %224 {strides = array<i32>} : memref<196x1024xbf16, #tpu.memory_space<vmem>>, vector<4x512xbf16>,
    %226 = vector.extract_strided_slice %224 {offsets = [0, 1], sizes = [4, 511], strides = [1, 1]} : vector<4x512xbf16> to vector<4x511xbf16>
    %227 = vector.extract_strided_slice %224 {offsets = [0, 0], sizes = [4, 1], strides = [1, 1]} : vector<4x512xbf16> to vector<4x1xbf16>
    %228 = tpu.concatenate %226, %227 in 1 : vector<4x511xbf16>, vector<4x1xbf16> -> vector<4x512xbf16>
    %c32_69 = arith.constant 32 : index
    %c512_70 = arith.constant 512 : index
    %229 = vector.load %arg5[%c32_69, %c512_70] : memref<196x1024xbf16, #tpu.memory_space<vmem>>, vector<4x512xbf16>
    tpu.vector_store %arg5[%c32_69, %c512_70], %228 {strides = array<i32>} : memref<196x1024xbf16, #tpu.memory_space<vmem>>, vector<4x512xbf16>,
    %230 = vector.extract_strided_slice %224 {offsets = [0, 2], sizes = [4, 510], strides = [1, 1]} : vector<4x512xbf16> to vector<4x510xbf16>
    %231 = vector.extract_strided_slice %224 {offsets = [0, 0], sizes = [4, 2], strides = [1, 1]} : vector<4x512xbf16> to vector<4x2xbf16>
    %232 = tpu.concatenate %230, %231 in 1 : vector<4x510xbf16>, vector<4x2xbf16> -> vector<4x512xbf16>
    %c36_71 = arith.constant 36 : index
    %c512_72 = arith.constant 512 : index
    %233 = vector.load %arg5[%c36_71, %c512_72] : memref<196x1024xbf16, #tpu.memory_space<vmem>>, vector<4x512xbf16>
    tpu.vector_store %arg5[%c36_71, %c512_72], %232 {strides = array<i32>} : memref<196x1024xbf16, #tpu.memory_space<vmem>>, vector<4x512xbf16>,
    %234 = vector.extract_strided_slice %224 {offsets = [0, 3], sizes = [4, 509], strides = [1, 1]} : vector<4x512xbf16> to vector<4x509xbf16>
    %235 = vector.extract_strided_slice %224 {offsets = [0, 0], sizes = [4, 3], strides = [1, 1]} : vector<4x512xbf16> to vector<4x3xbf16>
    %236 = tpu.concatenate %234, %235 in 1 : vector<4x509xbf16>, vector<4x3xbf16> -> vector<4x512xbf16>
    %c40_73 = arith.constant 40 : index
    %c512_74 = arith.constant 512 : index
    %237 = vector.load %arg5[%c40_73, %c512_74] : memref<196x1024xbf16, #tpu.memory_space<vmem>>, vector<4x512xbf16>
    tpu.vector_store %arg5[%c40_73, %c512_74], %236 {strides = array<i32>} : memref<196x1024xbf16, #tpu.memory_space<vmem>>, vector<4x512xbf16>,
    %238 = vector.extract_strided_slice %224 {offsets = [0, 4], sizes = [4, 508], strides = [1, 1]} : vector<4x512xbf16> to vector<4x508xbf16>
    %239 = vector.extract_strided_slice %224 {offsets = [0, 0], sizes = [4, 4], strides = [1, 1]} : vector<4x512xbf16> to vector<4x4xbf16>
    %240 = tpu.concatenate %238, %239 in 1 : vector<4x508xbf16>, vector<4x4xbf16> -> vector<4x512xbf16>
    %c44_75 = arith.constant 44 : index
    %c512_76 = arith.constant 512 : index
    %241 = vector.load %arg5[%c44_75, %c512_76] : memref<196x1024xbf16, #tpu.memory_space<vmem>>, vector<4x512xbf16>
    tpu.vector_store %arg5[%c44_75, %c512_76], %240 {strides = array<i32>} : memref<196x1024xbf16, #tpu.memory_space<vmem>>, vector<4x512xbf16>,
    %242 = vector.extract_strided_slice %224 {offsets = [0, 5], sizes = [4, 507], strides = [1, 1]} : vector<4x512xbf16> to vector<4x507xbf16>
    %243 = vector.extract_strided_slice %224 {offsets = [0, 0], sizes = [4, 5], strides = [1, 1]} : vector<4x512xbf16> to vector<4x5xbf16>
    %244 = tpu.concatenate %242, %243 in 1 : vector<4x507xbf16>, vector<4x5xbf16> -> vector<4x512xbf16>
    %c48_77 = arith.constant 48 : index
    %c512_78 = arith.constant 512 : index
    %245 = vector.load %arg5[%c48_77, %c512_78] : memref<196x1024xbf16, #tpu.memory_space<vmem>>, vector<4x512xbf16>
    tpu.vector_store %arg5[%c48_77, %c512_78], %244 {strides = array<i32>} : memref<196x1024xbf16, #tpu.memory_space<vmem>>, vector<4x512xbf16>,
    %246 = vector.extract_strided_slice %224 {offsets = [0, 6], sizes = [4, 506], strides = [1, 1]} : vector<4x512xbf16> to vector<4x506xbf16>
    %247 = vector.extract_strided_slice %224 {offsets = [0, 0], sizes = [4, 6], strides = [1, 1]} : vector<4x512xbf16> to vector<4x6xbf16>
    %248 = tpu.concatenate %246, %247 in 1 : vector<4x506xbf16>, vector<4x6xbf16> -> vector<4x512xbf16>
    %c52_79 = arith.constant 52 : index
    %c512_80 = arith.constant 512 : index
    %249 = vector.load %arg5[%c52_79, %c512_80] : memref<196x1024xbf16, #tpu.memory_space<vmem>>, vector<4x512xbf16>
    tpu.vector_store %arg5[%c52_79, %c512_80], %248 {strides = array<i32>} : memref<196x1024xbf16, #tpu.memory_space<vmem>>, vector<4x512xbf16>,
    %250 = vector.extract_strided_slice %196 {offsets = [0, 44], sizes = [4, 468], strides = [1, 1]} : vector<4x512xbf16> to vector<4x468xbf16>
    %251 = vector.extract_strided_slice %196 {offsets = [0, 0], sizes = [4, 44], strides = [1, 1]} : vector<4x512xbf16> to vector<4x44xbf16>
    %252 = tpu.concatenate %250, %251 in 1 : vector<4x468xbf16>, vector<4x44xbf16> -> vector<4x512xbf16>
    %c56_81 = arith.constant 56 : index
    %c512_82 = arith.constant 512 : index
    %253 = vector.load %arg5[%c56_81, %c512_82] : memref<196x1024xbf16, #tpu.memory_space<vmem>>, vector<4x512xbf16>
    tpu.vector_store %arg5[%c56_81, %c512_82], %252 {strides = array<i32>} : memref<196x1024xbf16, #tpu.memory_space<vmem>>, vector<4x512xbf16>,
    %254 = vector.extract_strided_slice %252 {offsets = [0, 1], sizes = [4, 511], strides = [1, 1]} : vector<4x512xbf16> to vector<4x511xbf16>
    %255 = vector.extract_strided_slice %252 {offsets = [0, 0], sizes = [4, 1], strides = [1, 1]} : vector<4x512xbf16> to vector<4x1xbf16>
    %256 = tpu.concatenate %254, %255 in 1 : vector<4x511xbf16>, vector<4x1xbf16> -> vector<4x512xbf16>
    %c60_83 = arith.constant 60 : index
    %c512_84 = arith.constant 512 : index
    %257 = vector.load %arg5[%c60_83, %c512_84] : memref<196x1024xbf16, #tpu.memory_space<vmem>>, vector<4x512xbf16>
    tpu.vector_store %arg5[%c60_83, %c512_84], %256 {strides = array<i32>} : memref<196x1024xbf16, #tpu.memory_space<vmem>>, vector<4x512xbf16>,
    %258 = vector.extract_strided_slice %252 {offsets = [0, 2], sizes = [4, 510], strides = [1, 1]} : vector<4x512xbf16> to vector<4x510xbf16>
    %259 = vector.extract_strided_slice %252 {offsets = [0, 0], sizes = [4, 2], strides = [1, 1]} : vector<4x512xbf16> to vector<4x2xbf16>
    %260 = tpu.concatenate %258, %259 in 1 : vector<4x510xbf16>, vector<4x2xbf16> -> vector<4x512xbf16>
    %c64_85 = arith.constant 64 : index
    %c512_86 = arith.constant 512 : index
    %261 = vector.load %arg5[%c64_85, %c512_86] : memref<196x1024xbf16, #tpu.memory_space<vmem>>, vector<4x512xbf16>
    tpu.vector_store %arg5[%c64_85, %c512_86], %260 {strides = array<i32>} : memref<196x1024xbf16, #tpu.memory_space<vmem>>, vector<4x512xbf16>,
    %262 = vector.extract_strided_slice %252 {offsets = [0, 3], sizes = [4, 509], strides = [1, 1]} : vector<4x512xbf16> to vector<4x509xbf16>
    %263 = vector.extract_strided_slice %252 {offsets = [0, 0], sizes = [4, 3], strides = [1, 1]} : vector<4x512xbf16> to vector<4x3xbf16>
    %264 = tpu.concatenate %262, %263 in 1 : vector<4x509xbf16>, vector<4x3xbf16> -> vector<4x512xbf16>
    %c68_87 = arith.constant 68 : index
    %c512_88 = arith.constant 512 : index
    %265 = vector.load %arg5[%c68_87, %c512_88] : memref<196x1024xbf16, #tpu.memory_space<vmem>>, vector<4x512xbf16>
    tpu.vector_store %arg5[%c68_87, %c512_88], %264 {strides = array<i32>} : memref<196x1024xbf16, #tpu.memory_space<vmem>>, vector<4x512xbf16>,
    %266 = vector.extract_strided_slice %252 {offsets = [0, 4], sizes = [4, 508], strides = [1, 1]} : vector<4x512xbf16> to vector<4x508xbf16>
    %267 = vector.extract_strided_slice %252 {offsets = [0, 0], sizes = [4, 4], strides = [1, 1]} : vector<4x512xbf16> to vector<4x4xbf16>
    %268 = tpu.concatenate %266, %267 in 1 : vector<4x508xbf16>, vector<4x4xbf16> -> vector<4x512xbf16>
    %c72_89 = arith.constant 72 : index
    %c512_90 = arith.constant 512 : index
    %269 = vector.load %arg5[%c72_89, %c512_90] : memref<196x1024xbf16, #tpu.memory_space<vmem>>, vector<4x512xbf16>
    tpu.vector_store %arg5[%c72_89, %c512_90], %268 {strides = array<i32>} : memref<196x1024xbf16, #tpu.memory_space<vmem>>, vector<4x512xbf16>,
    %270 = vector.extract_strided_slice %252 {offsets = [0, 5], sizes = [4, 507], strides = [1, 1]} : vector<4x512xbf16> to vector<4x507xbf16>
    %271 = vector.extract_strided_slice %252 {offsets = [0, 0], sizes = [4, 5], strides = [1, 1]} : vector<4x512xbf16> to vector<4x5xbf16>
    %272 = tpu.concatenate %270, %271 in 1 : vector<4x507xbf16>, vector<4x5xbf16> -> vector<4x512xbf16>
    %c76_91 = arith.constant 76 : index
    %c512_92 = arith.constant 512 : index
    %273 = vector.load %arg5[%c76_91, %c512_92] : memref<196x1024xbf16, #tpu.memory_space<vmem>>, vector<4x512xbf16>
    tpu.vector_store %arg5[%c76_91, %c512_92], %272 {strides = array<i32>} : memref<196x1024xbf16, #tpu.memory_space<vmem>>, vector<4x512xbf16>,
    %274 = vector.extract_strided_slice %252 {offsets = [0, 6], sizes = [4, 506], strides = [1, 1]} : vector<4x512xbf16> to vector<4x506xbf16>
    %275 = vector.extract_strided_slice %252 {offsets = [0, 0], sizes = [4, 6], strides = [1, 1]} : vector<4x512xbf16> to vector<4x6xbf16>
    %276 = tpu.concatenate %274, %275 in 1 : vector<4x506xbf16>, vector<4x6xbf16> -> vector<4x512xbf16>
    %c80_93 = arith.constant 80 : index
    %c512_94 = arith.constant 512 : index
    %277 = vector.load %arg5[%c80_93, %c512_94] : memref<196x1024xbf16, #tpu.memory_space<vmem>>, vector<4x512xbf16>
    tpu.vector_store %arg5[%c80_93, %c512_94], %276 {strides = array<i32>} : memref<196x1024xbf16, #tpu.memory_space<vmem>>, vector<4x512xbf16>,
    %278 = vector.extract_strided_slice %196 {offsets = [0, 66], sizes = [4, 446], strides = [1, 1]} : vector<4x512xbf16> to vector<4x446xbf16>
    %279 = vector.extract_strided_slice %196 {offsets = [0, 0], sizes = [4, 66], strides = [1, 1]} : vector<4x512xbf16> to vector<4x66xbf16>
    %280 = tpu.concatenate %278, %279 in 1 : vector<4x446xbf16>, vector<4x66xbf16> -> vector<4x512xbf16>
    %c84_95 = arith.constant 84 : index
    %c512_96 = arith.constant 512 : index
    %281 = vector.load %arg5[%c84_95, %c512_96] : memref<196x1024xbf16, #tpu.memory_space<vmem>>, vector<4x512xbf16>
    tpu.vector_store %arg5[%c84_95, %c512_96], %280 {strides = array<i32>} : memref<196x1024xbf16, #tpu.memory_space<vmem>>, vector<4x512xbf16>,
    %282 = vector.extract_strided_slice %280 {offsets = [0, 1], sizes = [4, 511], strides = [1, 1]} : vector<4x512xbf16> to vector<4x511xbf16>
    %283 = vector.extract_strided_slice %280 {offsets = [0, 0], sizes = [4, 1], strides = [1, 1]} : vector<4x512xbf16> to vector<4x1xbf16>
    %284 = tpu.concatenate %282, %283 in 1 : vector<4x511xbf16>, vector<4x1xbf16> -> vector<4x512xbf16>
    %c88_97 = arith.constant 88 : index
    %c512_98 = arith.constant 512 : index
    %285 = vector.load %arg5[%c88_97, %c512_98] : memref<196x1024xbf16, #tpu.memory_space<vmem>>, vector<4x512xbf16>
    tpu.vector_store %arg5[%c88_97, %c512_98], %284 {strides = array<i32>} : memref<196x1024xbf16, #tpu.memory_space<vmem>>, vector<4x512xbf16>,
    %286 = vector.extract_strided_slice %280 {offsets = [0, 2], sizes = [4, 510], strides = [1, 1]} : vector<4x512xbf16> to vector<4x510xbf16>
    %287 = vector.extract_strided_slice %280 {offsets = [0, 0], sizes = [4, 2], strides = [1, 1]} : vector<4x512xbf16> to vector<4x2xbf16>
    %288 = tpu.concatenate %286, %287 in 1 : vector<4x510xbf16>, vector<4x2xbf16> -> vector<4x512xbf16>
    %c92_99 = arith.constant 92 : index
    %c512_100 = arith.constant 512 : index
    %289 = vector.load %arg5[%c92_99, %c512_100] : memref<196x1024xbf16, #tpu.memory_space<vmem>>, vector<4x512xbf16>
    tpu.vector_store %arg5[%c92_99, %c512_100], %288 {strides = array<i32>} : memref<196x1024xbf16, #tpu.memory_space<vmem>>, vector<4x512xbf16>,
    %290 = vector.extract_strided_slice %280 {offsets = [0, 3], sizes = [4, 509], strides = [1, 1]} : vector<4x512xbf16> to vector<4x509xbf16>
    %291 = vector.extract_strided_slice %280 {offsets = [0, 0], sizes = [4, 3], strides = [1, 1]} : vector<4x512xbf16> to vector<4x3xbf16>
    %292 = tpu.concatenate %290, %291 in 1 : vector<4x509xbf16>, vector<4x3xbf16> -> vector<4x512xbf16>
    %c96_101 = arith.constant 96 : index
    %c512_102 = arith.constant 512 : index
    %293 = vector.load %arg5[%c96_101, %c512_102] : memref<196x1024xbf16, #tpu.memory_space<vmem>>, vector<4x512xbf16>
    tpu.vector_store %arg5[%c96_101, %c512_102], %292 {strides = array<i32>} : memref<196x1024xbf16, #tpu.memory_space<vmem>>, vector<4x512xbf16>,
    %294 = vector.extract_strided_slice %280 {offsets = [0, 4], sizes = [4, 508], strides = [1, 1]} : vector<4x512xbf16> to vector<4x508xbf16>
    %295 = vector.extract_strided_slice %280 {offsets = [0, 0], sizes = [4, 4], strides = [1, 1]} : vector<4x512xbf16> to vector<4x4xbf16>
    %296 = tpu.concatenate %294, %295 in 1 : vector<4x508xbf16>, vector<4x4xbf16> -> vector<4x512xbf16>
    %c100_103 = arith.constant 100 : index
    %c512_104 = arith.constant 512 : index
    %297 = vector.load %arg5[%c100_103, %c512_104] : memref<196x1024xbf16, #tpu.memory_space<vmem>>, vector<4x512xbf16>
    tpu.vector_store %arg5[%c100_103, %c512_104], %296 {strides = array<i32>} : memref<196x1024xbf16, #tpu.memory_space<vmem>>, vector<4x512xbf16>,
    %298 = vector.extract_strided_slice %280 {offsets = [0, 5], sizes = [4, 507], strides = [1, 1]} : vector<4x512xbf16> to vector<4x507xbf16>
    %299 = vector.extract_strided_slice %280 {offsets = [0, 0], sizes = [4, 5], strides = [1, 1]} : vector<4x512xbf16> to vector<4x5xbf16>
    %300 = tpu.concatenate %298, %299 in 1 : vector<4x507xbf16>, vector<4x5xbf16> -> vector<4x512xbf16>
    %c104_105 = arith.constant 104 : index
    %c512_106 = arith.constant 512 : index
    %301 = vector.load %arg5[%c104_105, %c512_106] : memref<196x1024xbf16, #tpu.memory_space<vmem>>, vector<4x512xbf16>
    tpu.vector_store %arg5[%c104_105, %c512_106], %300 {strides = array<i32>} : memref<196x1024xbf16, #tpu.memory_space<vmem>>, vector<4x512xbf16>,
    %302 = vector.extract_strided_slice %280 {offsets = [0, 6], sizes = [4, 506], strides = [1, 1]} : vector<4x512xbf16> to vector<4x506xbf16>
    %303 = vector.extract_strided_slice %280 {offsets = [0, 0], sizes = [4, 6], strides = [1, 1]} : vector<4x512xbf16> to vector<4x6xbf16>
    %304 = tpu.concatenate %302, %303 in 1 : vector<4x506xbf16>, vector<4x6xbf16> -> vector<4x512xbf16>
    %c108_107 = arith.constant 108 : index
    %c512_108 = arith.constant 512 : index
    %305 = vector.load %arg5[%c108_107, %c512_108] : memref<196x1024xbf16, #tpu.memory_space<vmem>>, vector<4x512xbf16>
    tpu.vector_store %arg5[%c108_107, %c512_108], %304 {strides = array<i32>} : memref<196x1024xbf16, #tpu.memory_space<vmem>>, vector<4x512xbf16>,
    %306 = vector.extract_strided_slice %196 {offsets = [0, 88], sizes = [4, 424], strides = [1, 1]} : vector<4x512xbf16> to vector<4x424xbf16>
    %307 = vector.extract_strided_slice %196 {offsets = [0, 0], sizes = [4, 88], strides = [1, 1]} : vector<4x512xbf16> to vector<4x88xbf16>
    %308 = tpu.concatenate %306, %307 in 1 : vector<4x424xbf16>, vector<4x88xbf16> -> vector<4x512xbf16>
    %c112_109 = arith.constant 112 : index
    %c512_110 = arith.constant 512 : index
    %309 = vector.load %arg5[%c112_109, %c512_110] : memref<196x1024xbf16, #tpu.memory_space<vmem>>, vector<4x512xbf16>
    tpu.vector_store %arg5[%c112_109, %c512_110], %308 {strides = array<i32>} : memref<196x1024xbf16, #tpu.memory_space<vmem>>, vector<4x512xbf16>,
    %310 = vector.extract_strided_slice %308 {offsets = [0, 1], sizes = [4, 511], strides = [1, 1]} : vector<4x512xbf16> to vector<4x511xbf16>
    %311 = vector.extract_strided_slice %308 {offsets = [0, 0], sizes = [4, 1], strides = [1, 1]} : vector<4x512xbf16> to vector<4x1xbf16>
    %312 = tpu.concatenate %310, %311 in 1 : vector<4x511xbf16>, vector<4x1xbf16> -> vector<4x512xbf16>
    %c116_111 = arith.constant 116 : index
    %c512_112 = arith.constant 512 : index
    %313 = vector.load %arg5[%c116_111, %c512_112] : memref<196x1024xbf16, #tpu.memory_space<vmem>>, vector<4x512xbf16>
    tpu.vector_store %arg5[%c116_111, %c512_112], %312 {strides = array<i32>} : memref<196x1024xbf16, #tpu.memory_space<vmem>>, vector<4x512xbf16>,
    %314 = vector.extract_strided_slice %308 {offsets = [0, 2], sizes = [4, 510], strides = [1, 1]} : vector<4x512xbf16> to vector<4x510xbf16>
    %315 = vector.extract_strided_slice %308 {offsets = [0, 0], sizes = [4, 2], strides = [1, 1]} : vector<4x512xbf16> to vector<4x2xbf16>
    %316 = tpu.concatenate %314, %315 in 1 : vector<4x510xbf16>, vector<4x2xbf16> -> vector<4x512xbf16>
    %c120_113 = arith.constant 120 : index
    %c512_114 = arith.constant 512 : index
    %317 = vector.load %arg5[%c120_113, %c512_114] : memref<196x1024xbf16, #tpu.memory_space<vmem>>, vector<4x512xbf16>
    tpu.vector_store %arg5[%c120_113, %c512_114], %316 {strides = array<i32>} : memref<196x1024xbf16, #tpu.memory_space<vmem>>, vector<4x512xbf16>,
    %318 = vector.extract_strided_slice %308 {offsets = [0, 3], sizes = [4, 509], strides = [1, 1]} : vector<4x512xbf16> to vector<4x509xbf16>
    %319 = vector.extract_strided_slice %308 {offsets = [0, 0], sizes = [4, 3], strides = [1, 1]} : vector<4x512xbf16> to vector<4x3xbf16>
    %320 = tpu.concatenate %318, %319 in 1 : vector<4x509xbf16>, vector<4x3xbf16> -> vector<4x512xbf16>
    %c124_115 = arith.constant 124 : index
    %c512_116 = arith.constant 512 : index
    %321 = vector.load %arg5[%c124_115, %c512_116] : memref<196x1024xbf16, #tpu.memory_space<vmem>>, vector<4x512xbf16>
    tpu.vector_store %arg5[%c124_115, %c512_116], %320 {strides = array<i32>} : memref<196x1024xbf16, #tpu.memory_space<vmem>>, vector<4x512xbf16>,
    %322 = vector.extract_strided_slice %308 {offsets = [0, 4], sizes = [4, 508], strides = [1, 1]} : vector<4x512xbf16> to vector<4x508xbf16>
    %323 = vector.extract_strided_slice %308 {offsets = [0, 0], sizes = [4, 4], strides = [1, 1]} : vector<4x512xbf16> to vector<4x4xbf16>
    %324 = tpu.concatenate %322, %323 in 1 : vector<4x508xbf16>, vector<4x4xbf16> -> vector<4x512xbf16>
    %c128_117 = arith.constant 128 : index
    %c512_118 = arith.constant 512 : index
    %325 = vector.load %arg5[%c128_117, %c512_118] : memref<196x1024xbf16, #tpu.memory_space<vmem>>, vector<4x512xbf16>
    tpu.vector_store %arg5[%c128_117, %c512_118], %324 {strides = array<i32>} : memref<196x1024xbf16, #tpu.memory_space<vmem>>, vector<4x512xbf16>,
    %326 = vector.extract_strided_slice %308 {offsets = [0, 5], sizes = [4, 507], strides = [1, 1]} : vector<4x512xbf16> to vector<4x507xbf16>
    %327 = vector.extract_strided_slice %308 {offsets = [0, 0], sizes = [4, 5], strides = [1, 1]} : vector<4x512xbf16> to vector<4x5xbf16>
    %328 = tpu.concatenate %326, %327 in 1 : vector<4x507xbf16>, vector<4x5xbf16> -> vector<4x512xbf16>
    %c132_119 = arith.constant 132 : index
    %c512_120 = arith.constant 512 : index
    %329 = vector.load %arg5[%c132_119, %c512_120] : memref<196x1024xbf16, #tpu.memory_space<vmem>>, vector<4x512xbf16>
    tpu.vector_store %arg5[%c132_119, %c512_120], %328 {strides = array<i32>} : memref<196x1024xbf16, #tpu.memory_space<vmem>>, vector<4x512xbf16>,
    %330 = vector.extract_strided_slice %308 {offsets = [0, 6], sizes = [4, 506], strides = [1, 1]} : vector<4x512xbf16> to vector<4x506xbf16>
    %331 = vector.extract_strided_slice %308 {offsets = [0, 0], sizes = [4, 6], strides = [1, 1]} : vector<4x512xbf16> to vector<4x6xbf16>
    %332 = tpu.concatenate %330, %331 in 1 : vector<4x506xbf16>, vector<4x6xbf16> -> vector<4x512xbf16>
    %c136_121 = arith.constant 136 : index
    %c512_122 = arith.constant 512 : index
    %333 = vector.load %arg5[%c136_121, %c512_122] : memref<196x1024xbf16, #tpu.memory_space<vmem>>, vector<4x512xbf16>
    tpu.vector_store %arg5[%c136_121, %c512_122], %332 {strides = array<i32>} : memref<196x1024xbf16, #tpu.memory_space<vmem>>, vector<4x512xbf16>,
    %334 = vector.extract_strided_slice %196 {offsets = [0, 110], sizes = [4, 402], strides = [1, 1]} : vector<4x512xbf16> to vector<4x402xbf16>
    %335 = vector.extract_strided_slice %196 {offsets = [0, 0], sizes = [4, 110], strides = [1, 1]} : vector<4x512xbf16> to vector<4x110xbf16>
    %336 = tpu.concatenate %334, %335 in 1 : vector<4x402xbf16>, vector<4x110xbf16> -> vector<4x512xbf16>
    %c140_123 = arith.constant 140 : index
    %c512_124 = arith.constant 512 : index
    %337 = vector.load %arg5[%c140_123, %c512_124] : memref<196x1024xbf16, #tpu.memory_space<vmem>>, vector<4x512xbf16>
    tpu.vector_store %arg5[%c140_123, %c512_124], %336 {strides = array<i32>} : memref<196x1024xbf16, #tpu.memory_space<vmem>>, vector<4x512xbf16>,
    %338 = vector.extract_strided_slice %336 {offsets = [0, 1], sizes = [4, 511], strides = [1, 1]} : vector<4x512xbf16> to vector<4x511xbf16>
    %339 = vector.extract_strided_slice %336 {offsets = [0, 0], sizes = [4, 1], strides = [1, 1]} : vector<4x512xbf16> to vector<4x1xbf16>
    %340 = tpu.concatenate %338, %339 in 1 : vector<4x511xbf16>, vector<4x1xbf16> -> vector<4x512xbf16>
    %c144_125 = arith.constant 144 : index
    %c512_126 = arith.constant 512 : index
    %341 = vector.load %arg5[%c144_125, %c512_126] : memref<196x1024xbf16, #tpu.memory_space<vmem>>, vector<4x512xbf16>
    tpu.vector_store %arg5[%c144_125, %c512_126], %340 {strides = array<i32>} : memref<196x1024xbf16, #tpu.memory_space<vmem>>, vector<4x512xbf16>,
    %342 = vector.extract_strided_slice %336 {offsets = [0, 2], sizes = [4, 510], strides = [1, 1]} : vector<4x512xbf16> to vector<4x510xbf16>
    %343 = vector.extract_strided_slice %336 {offsets = [0, 0], sizes = [4, 2], strides = [1, 1]} : vector<4x512xbf16> to vector<4x2xbf16>
    %344 = tpu.concatenate %342, %343 in 1 : vector<4x510xbf16>, vector<4x2xbf16> -> vector<4x512xbf16>
    %c148_127 = arith.constant 148 : index
    %c512_128 = arith.constant 512 : index
    %345 = vector.load %arg5[%c148_127, %c512_128] : memref<196x1024xbf16, #tpu.memory_space<vmem>>, vector<4x512xbf16>
    tpu.vector_store %arg5[%c148_127, %c512_128], %344 {strides = array<i32>} : memref<196x1024xbf16, #tpu.memory_space<vmem>>, vector<4x512xbf16>,
    %346 = vector.extract_strided_slice %336 {offsets = [0, 3], sizes = [4, 509], strides = [1, 1]} : vector<4x512xbf16> to vector<4x509xbf16>
    %347 = vector.extract_strided_slice %336 {offsets = [0, 0], sizes = [4, 3], strides = [1, 1]} : vector<4x512xbf16> to vector<4x3xbf16>
    %348 = tpu.concatenate %346, %347 in 1 : vector<4x509xbf16>, vector<4x3xbf16> -> vector<4x512xbf16>
    %c152_129 = arith.constant 152 : index
    %c512_130 = arith.constant 512 : index
    %349 = vector.load %arg5[%c152_129, %c512_130] : memref<196x1024xbf16, #tpu.memory_space<vmem>>, vector<4x512xbf16>
    tpu.vector_store %arg5[%c152_129, %c512_130], %348 {strides = array<i32>} : memref<196x1024xbf16, #tpu.memory_space<vmem>>, vector<4x512xbf16>,
    %350 = vector.extract_strided_slice %336 {offsets = [0, 4], sizes = [4, 508], strides = [1, 1]} : vector<4x512xbf16> to vector<4x508xbf16>
    %351 = vector.extract_strided_slice %336 {offsets = [0, 0], sizes = [4, 4], strides = [1, 1]} : vector<4x512xbf16> to vector<4x4xbf16>
    %352 = tpu.concatenate %350, %351 in 1 : vector<4x508xbf16>, vector<4x4xbf16> -> vector<4x512xbf16>
    %c156_131 = arith.constant 156 : index
    %c512_132 = arith.constant 512 : index
    %353 = vector.load %arg5[%c156_131, %c512_132] : memref<196x1024xbf16, #tpu.memory_space<vmem>>, vector<4x512xbf16>
    tpu.vector_store %arg5[%c156_131, %c512_132], %352 {strides = array<i32>} : memref<196x1024xbf16, #tpu.memory_space<vmem>>, vector<4x512xbf16>,
    %354 = vector.extract_strided_slice %336 {offsets = [0, 5], sizes = [4, 507], strides = [1, 1]} : vector<4x512xbf16> to vector<4x507xbf16>
    %355 = vector.extract_strided_slice %336 {offsets = [0, 0], sizes = [4, 5], strides = [1, 1]} : vector<4x512xbf16> to vector<4x5xbf16>
    %356 = tpu.concatenate %354, %355 in 1 : vector<4x507xbf16>, vector<4x5xbf16> -> vector<4x512xbf16>
    %c160_133 = arith.constant 160 : index
    %c512_134 = arith.constant 512 : index
    %357 = vector.load %arg5[%c160_133, %c512_134] : memref<196x1024xbf16, #tpu.memory_space<vmem>>, vector<4x512xbf16>
    tpu.vector_store %arg5[%c160_133, %c512_134], %356 {strides = array<i32>} : memref<196x1024xbf16, #tpu.memory_space<vmem>>, vector<4x512xbf16>,
    %358 = vector.extract_strided_slice %336 {offsets = [0, 6], sizes = [4, 506], strides = [1, 1]} : vector<4x512xbf16> to vector<4x506xbf16>
    %359 = vector.extract_strided_slice %336 {offsets = [0, 0], sizes = [4, 6], strides = [1, 1]} : vector<4x512xbf16> to vector<4x6xbf16>
    %360 = tpu.concatenate %358, %359 in 1 : vector<4x506xbf16>, vector<4x6xbf16> -> vector<4x512xbf16>
    %c164_135 = arith.constant 164 : index
    %c512_136 = arith.constant 512 : index
    %361 = vector.load %arg5[%c164_135, %c512_136] : memref<196x1024xbf16, #tpu.memory_space<vmem>>, vector<4x512xbf16>
    tpu.vector_store %arg5[%c164_135, %c512_136], %360 {strides = array<i32>} : memref<196x1024xbf16, #tpu.memory_space<vmem>>, vector<4x512xbf16>,
    %362 = vector.extract_strided_slice %196 {offsets = [0, 132], sizes = [4, 380], strides = [1, 1]} : vector<4x512xbf16> to vector<4x380xbf16>
    %363 = vector.extract_strided_slice %196 {offsets = [0, 0], sizes = [4, 132], strides = [1, 1]} : vector<4x512xbf16> to vector<4x132xbf16>
    %364 = tpu.concatenate %362, %363 in 1 : vector<4x380xbf16>, vector<4x132xbf16> -> vector<4x512xbf16>
    %c168_137 = arith.constant 168 : index
    %c512_138 = arith.constant 512 : index
    %365 = vector.load %arg5[%c168_137, %c512_138] : memref<196x1024xbf16, #tpu.memory_space<vmem>>, vector<4x512xbf16>
    tpu.vector_store %arg5[%c168_137, %c512_138], %364 {strides = array<i32>} : memref<196x1024xbf16, #tpu.memory_space<vmem>>, vector<4x512xbf16>,
    %366 = vector.extract_strided_slice %364 {offsets = [0, 1], sizes = [4, 511], strides = [1, 1]} : vector<4x512xbf16> to vector<4x511xbf16>
    %367 = vector.extract_strided_slice %364 {offsets = [0, 0], sizes = [4, 1], strides = [1, 1]} : vector<4x512xbf16> to vector<4x1xbf16>
    %368 = tpu.concatenate %366, %367 in 1 : vector<4x511xbf16>, vector<4x1xbf16> -> vector<4x512xbf16>
    %c172_139 = arith.constant 172 : index
    %c512_140 = arith.constant 512 : index
    %369 = vector.load %arg5[%c172_139, %c512_140] : memref<196x1024xbf16, #tpu.memory_space<vmem>>, vector<4x512xbf16>
    tpu.vector_store %arg5[%c172_139, %c512_140], %368 {strides = array<i32>} : memref<196x1024xbf16, #tpu.memory_space<vmem>>, vector<4x512xbf16>,
    %370 = vector.extract_strided_slice %364 {offsets = [0, 2], sizes = [4, 510], strides = [1, 1]} : vector<4x512xbf16> to vector<4x510xbf16>
    %371 = vector.extract_strided_slice %364 {offsets = [0, 0], sizes = [4, 2], strides = [1, 1]} : vector<4x512xbf16> to vector<4x2xbf16>
    %372 = tpu.concatenate %370, %371 in 1 : vector<4x510xbf16>, vector<4x2xbf16> -> vector<4x512xbf16>
    %c176_141 = arith.constant 176 : index
    %c512_142 = arith.constant 512 : index
    %373 = vector.load %arg5[%c176_141, %c512_142] : memref<196x1024xbf16, #tpu.memory_space<vmem>>, vector<4x512xbf16>
    tpu.vector_store %arg5[%c176_141, %c512_142], %372 {strides = array<i32>} : memref<196x1024xbf16, #tpu.memory_space<vmem>>, vector<4x512xbf16>,
    %374 = vector.extract_strided_slice %364 {offsets = [0, 3], sizes = [4, 509], strides = [1, 1]} : vector<4x512xbf16> to vector<4x509xbf16>
    %375 = vector.extract_strided_slice %364 {offsets = [0, 0], sizes = [4, 3], strides = [1, 1]} : vector<4x512xbf16> to vector<4x3xbf16>
    %376 = tpu.concatenate %374, %375 in 1 : vector<4x509xbf16>, vector<4x3xbf16> -> vector<4x512xbf16>
    %c180_143 = arith.constant 180 : index
    %c512_144 = arith.constant 512 : index
    %377 = vector.load %arg5[%c180_143, %c512_144] : memref<196x1024xbf16, #tpu.memory_space<vmem>>, vector<4x512xbf16>
    tpu.vector_store %arg5[%c180_143, %c512_144], %376 {strides = array<i32>} : memref<196x1024xbf16, #tpu.memory_space<vmem>>, vector<4x512xbf16>,
    %378 = vector.extract_strided_slice %364 {offsets = [0, 4], sizes = [4, 508], strides = [1, 1]} : vector<4x512xbf16> to vector<4x508xbf16>
    %379 = vector.extract_strided_slice %364 {offsets = [0, 0], sizes = [4, 4], strides = [1, 1]} : vector<4x512xbf16> to vector<4x4xbf16>
    %380 = tpu.concatenate %378, %379 in 1 : vector<4x508xbf16>, vector<4x4xbf16> -> vector<4x512xbf16>
    %c184_145 = arith.constant 184 : index
    %c512_146 = arith.constant 512 : index
    %381 = vector.load %arg5[%c184_145, %c512_146] : memref<196x1024xbf16, #tpu.memory_space<vmem>>, vector<4x512xbf16>
    tpu.vector_store %arg5[%c184_145, %c512_146], %380 {strides = array<i32>} : memref<196x1024xbf16, #tpu.memory_space<vmem>>, vector<4x512xbf16>,
    %382 = vector.extract_strided_slice %364 {offsets = [0, 5], sizes = [4, 507], strides = [1, 1]} : vector<4x512xbf16> to vector<4x507xbf16>
    %383 = vector.extract_strided_slice %364 {offsets = [0, 0], sizes = [4, 5], strides = [1, 1]} : vector<4x512xbf16> to vector<4x5xbf16>
    %384 = tpu.concatenate %382, %383 in 1 : vector<4x507xbf16>, vector<4x5xbf16> -> vector<4x512xbf16>
    %c188_147 = arith.constant 188 : index
    %c512_148 = arith.constant 512 : index
    %385 = vector.load %arg5[%c188_147, %c512_148] : memref<196x1024xbf16, #tpu.memory_space<vmem>>, vector<4x512xbf16>
    tpu.vector_store %arg5[%c188_147, %c512_148], %384 {strides = array<i32>} : memref<196x1024xbf16, #tpu.memory_space<vmem>>, vector<4x512xbf16>,
    %386 = vector.extract_strided_slice %364 {offsets = [0, 6], sizes = [4, 506], strides = [1, 1]} : vector<4x512xbf16> to vector<4x506xbf16>
    %387 = vector.extract_strided_slice %364 {offsets = [0, 0], sizes = [4, 6], strides = [1, 1]} : vector<4x512xbf16> to vector<4x6xbf16>
    %388 = tpu.concatenate %386, %387 in 1 : vector<4x506xbf16>, vector<4x6xbf16> -> vector<4x512xbf16>
    %c192_149 = arith.constant 192 : index
    %c512_150 = arith.constant 512 : index
    %389 = vector.load %arg5[%c192_149, %c512_150] : memref<196x1024xbf16, #tpu.memory_space<vmem>>, vector<4x512xbf16>
    tpu.vector_store %arg5[%c192_149, %c512_150], %388 {strides = array<i32>} : memref<196x1024xbf16, #tpu.memory_space<vmem>>, vector<4x512xbf16>,
    %c0_151 = arith.constant 0 : index
    %c0_152 = arith.constant 0 : index
    %390 = vector.load %arg2[%c0_151, %c0_152] : memref<8x196xbf16, #tpu.memory_space<vmem>>, vector<8x196xbf16>
    %c0_153 = arith.constant 0 : index
    %c0_154 = arith.constant 0 : index
    %391 = vector.load %arg5[%c0_153, %c0_154] : memref<196x1024xbf16, #tpu.memory_space<vmem>>, vector<196x1024xbf16>
    %cst = arith.constant dense<0.000000e+00> : vector<8x1024xf32>
    %392 = tpu.matmul %390, %391, %cst {dimension_numbers = #tpu.dot_dimension_numbers<[1], [0], [0], [1], [0, 0, 1, 1], [], []>} : vector<8x196xbf16>, vector<196x1024xbf16>, vector<8x1024xf32> -> vector<8x1024xf32>
    %c0_155 = arith.constant 0 : index
    %c0_156 = arith.constant 0 : index
    %393 = vector.load %arg3[%c0_155, %c0_156] : memref<8x1xf32, #tpu.memory_space<vmem>>, vector<8x1xf32>
    %394 = vector.broadcast %393 : vector<8x1xf32> to vector<8x1024xf32>
    %395 = arith.addf %392, %394 : vector<8x1024xf32>
    %cst_157 = arith.constant 0.000000e+00 : f32
    %396 = vector.broadcast %cst_157 : f32 to vector<8x1024xf32>
    %397 = arith.maximumf %395, %396 : vector<8x1024xf32>
    %398 = vector.extract_strided_slice %397 {offsets = [0, 0], sizes = [8, 512], strides = [1, 1]} : vector<8x1024xf32> to vector<8x512xf32>
    %c0_158 = arith.constant 0 : index
    %c0_159 = arith.constant 0 : index
    %c0_160 = arith.constant 0 : index
    %399 = vector.load %arg4[%c0_158, %c0_159, %c0_160] : memref<2x8x512xf32, #tpu.memory_space<vmem>>, vector<1x8x512xf32>
    %400 = vector.shape_cast %399 : vector<1x8x512xf32> to vector<8x512xf32>
    %401 = vector.shape_cast %398 : vector<8x512xf32> to vector<1x8x512xf32>
    tpu.vector_store %arg4[%c0_158, %c0_159, %c0_160], %401 {strides = array<i32>} : memref<2x8x512xf32, #tpu.memory_space<vmem>>, vector<1x8x512xf32>,
    %402 = vector.extract_strided_slice %397 {offsets = [0, 512], sizes = [8, 512], strides = [1, 1]} : vector<8x1024xf32> to vector<8x512xf32>
    %c1_161 = arith.constant 1 : index
    %c0_162 = arith.constant 0 : index
    %c0_163 = arith.constant 0 : index
    %403 = vector.load %arg4[%c1_161, %c0_162, %c0_163] : memref<2x8x512xf32, #tpu.memory_space<vmem>>, vector<1x8x512xf32>
    %404 = vector.shape_cast %403 : vector<1x8x512xf32> to vector<8x512xf32>
    %405 = vector.shape_cast %402 : vector<8x512xf32> to vector<1x8x512xf32>
    tpu.vector_store %arg4[%c1_161, %c0_162, %c0_163], %405 {strides = array<i32>} : memref<2x8x512xf32, #tpu.memory_space<vmem>>, vector<1x8x512xf32>,
    return
  }
  func.func @transform_0(%arg0: i32) -> (i32, i32, i32) {
    %c0_i32 = arith.constant 0 : i32
    %c0_i32_0 = arith.constant 0 : i32
    %c0_i32_1 = arith.constant 0 : i32
    return %arg0, %c0_i32, %c0_i32_0 : i32, i32, i32
  }
  func.func @transform_1(%arg0: i32) -> (i32, i32) {
    %c0_i32 = arith.constant 0 : i32
    %c0_i32_0 = arith.constant 0 : i32
    %c0_i32_1 = arith.constant 0 : i32
    return %c0_i32, %c0_i32_0 : i32, i32
  }
  func.func @transform_2(%arg0: i32) -> (i32, i32) {
    %c0_i32 = arith.constant 0 : i32
    %c0_i32_0 = arith.constant 0 : i32
    %c0_i32_1 = arith.constant 0 : i32
    return %c0_i32, %c0_i32_0 : i32, i32
  }
  func.func @transform_3(%arg0: i32) -> (i32, i32, i32) {
    %c0_i32 = arith.constant 0 : i32
    %c0_i32_0 = arith.constant 0 : i32
    %c0_i32_1 = arith.constant 0 : i32
    return %arg0, %c0_i32, %c0_i32_0 : i32, i32, i32
  }
}

</mosaic_0001>

<bundles_post_ra>
// kernel: tpu_custom_call.1
= control target key start
LH: loop header
LB: loop body
LE: loop exit
PB: predicated region body
PF: predicated region fallthrough
CT: control target
= control target key end

     0   :  { %8 = vsyncpa [#allocation4], 0  ;;  %s5072_s0 = inlined_call_operand.hbm [shape: bf16[2,4,512], index: 0, kind: input, shape index: {}]   ;;  %s5073_s1 = inlined_call_operand.vmem [shape: bf16[8,196], index: 1, kind: input, shape index: {}]   ;;  %s5074_s2 = inlined_call_operand.vmem [shape: f32[8,1], index: 2, kind: input, shape index: {}]   ;;  %s5075_s3 = inlined_call_operand.hbm [shape: f32[2,8,512], index: 3, kind: output, shape index: {}]  }
   0x1   :  { %9 = vsyncpa [#allocation5], 0  ;;  %s3785_s12 = smov [#allocation3]   ;;  %s3737_s16 = scalar_lea.hbm %s5072_s0, 256 }
   0x2   :  { %s15_s13 = sshll.u32 %s3785_s12, 4  ;;  %p3738_p0 = scmp.ne.s32.totalorder %s5072_s0, %s3737_s16  ;;  %s16_s13 = int_to_ptr.vmem [resolvable:$true] %s15_s13 }
   0x3   :  { %p3741_p1 = scmp.lt.u32.totalorder %s3737_s16, %s5072_s0 }
   0x5   :  { %p3743_p2 = pnand %p3741_p1, %p3738_p0 }
   0x7   :  { %3746 = shalt.err (!%p3743_p2)
}
   0x8   :  { %s3747_s21 = scalar_lea.vmem %s16_s13, 256  ;;  %p3752_p4 = scmp.lt.s32.totalorder %s16_s13, %s16_s13 }
   0x9   :  { %p3748_p3 = scmp.ne.s32.totalorder %s16_s13, %s3747_s21  ;;  %p3753_p5 = scmp.lt.s32.totalorder %s3747_s21, %s3747_s21 }
   0xb   :  { %p3754_p6 = por %p3753_p5, %p3752_p4 }
   0xd   :  { %p3755_p7 = pnand %p3754_p6, %p3748_p3 }
   0xf   :  { %3758 = shalt.err (!%p3755_p7)
}
  0x10   :  { %s3786_s22 = smov 128   ;;  %s3787_s23 = smov 8  }
  0x11   :  { %21 = dma.hbm_to_vmem [thread:$0]  %s5072_s0, 256, %s16_s13, [#allocation4], %s3786_s22, %s3786_s22, %s3787_s23  }
  0x12   :  { %3781 = dma.done.wait [#allocation4], 256  }
  0x13   :  { %3782 = vsyncadd [#allocation4], 4294967040  ;;  %v36_v0 = vlaneseq  ;;  %v3788_v1 = vmov 1983009808   ;;  %v30_v6 = vld [vmem:[#allocation3] sm:$0xff]  ;;  %s3789_s26 = smov 127  }
  0x14   :  { %v34_v2 = vunpack.c.l.s4 %v3788_v1  ;;  %3397 = vst.sshfl [vmem:[#allocation2] sm:$0xf pattern:$0x76325410] %v30_v6  ;;  %v32_v8 = vcombine.high %v30_v6, %v30_v6  ;;  %s3790_s0 = smov 126   ;;  %s3791_s27 = smov 125  }
  0x15   :  { %v37_v3 = vshrl.u32 %v36_v0, 7  ;;  %s3792_s28 = smov 124   ;;  %s3793_s29 = smov 123   ;;  %vm61_vm0 = vcmask 1039360   ;;  %vm90_vm1 = vcmask 1031168   ;;  %vm117_vm2 = vcmask 1022976  }
  0x16   :  { %v35_v4 = vunpack.c.0.s8 %v34_v2  ;;  %3398 = vst.sshfl [vmem:[#allocation2 + $0x8] sm:$0xf pattern:$0x76325410] %v32_v8  ;;  %s3794_s30 = smov 122   ;;  %s3795_s4 = smov 106  }
  0x17   :  { %s3796_s5 = smov 84   ;;  %vm146_vm3 = vcmask 1014784   ;;  %vm173_vm4 = vcmask 1006592   ;;  %vm202_vm5 = vcmask 998400   ;;  %vm229_vm6 = vcmask 867328   ;;  %s3797_s6 = smov 62  }
  0x18   :  { %v3836_v5 = vsub.s32 %v35_v4, %v37_v3  ;;  %vm414_vm7 = vcmask 687104   ;;  %vm597_vm8 = vcmask 506880   ;;  %s3798_s7 = smov 40   ;;  %vm782_vm9 = vcmask 326656   ;;  %s3799_s8 = smov 18  }
  0x19   :  { %vm965_vm10 = vcmask 146432   ;;  %vm3170_vm11 = vcmask 556032   ;;  %vm3174_vm12 = vcmask 1041408  }
  0x1a   :  { %v3839_v7 = vrot.slane %v30_v6, %v3836_v5  ;;  %v3844_v9 = vrot.slane %v32_v8, %v3836_v5 }
  0x1c   :  { %53 = vrot.lane.b32.xlu0 %v3839_v7, %s3789_s26  ;;  %57 = vrot.lane.b32.xlu1 %v3844_v9, %s3789_s26  ;;  %v3850_v10 = vcombine.high %v3839_v7, %v3839_v7  ;;  %v3858_v11 = vcombine.high %v3844_v9, %v3844_v9 }
  0x20   :  { %82 = vrot.lane.b32.xlu0 %v3839_v7, %s3790_s0  ;;  %84 = vrot.lane.b32.xlu1 %v3850_v10, %s3790_s0 }
  0x24   :  { %55 = vrot.lane.b32.xlu0 %v3850_v10, %s3789_s26  ;;  %59 = vrot.lane.b32.xlu1 %v3858_v11, %s3789_s26 }
  0x28   :  { %86 = vrot.lane.b32.xlu0 %v3844_v9, %s3790_s0  ;;  %88 = vrot.lane.b32.xlu1 %v3858_v11, %s3790_s0 }
  0x2c   :  { %109 = vrot.lane.b32.xlu0 %v3839_v7, %s3791_s27  ;;  %111 = vrot.lane.b32.xlu1 %v3850_v10, %s3791_s27 }
  0x30   :  { %113 = vrot.lane.b32.xlu0 %v3844_v9, %s3791_s27  ;;  %115 = vrot.lane.b32.xlu1 %v3858_v11, %s3791_s27 }
  0x34   :  { %138 = vrot.lane.b32.xlu0 %v3839_v7, %s3792_s28  ;;  %140 = vrot.lane.b32.xlu1 %v3850_v10, %s3792_s28 }
  0x38   :  { %142 = vrot.lane.b32.xlu0 %v3844_v9, %s3792_s28  ;;  %144 = vrot.lane.b32.xlu1 %v3858_v11, %s3792_s28 }
  0x3c   :  { %165 = vrot.lane.b32.xlu0 %v3839_v7, %s3793_s29  ;;  %167 = vrot.lane.b32.xlu1 %v3850_v10, %s3793_s29 }
  0x40   :  { %169 = vrot.lane.b32.xlu0 %v3844_v9, %s3793_s29  ;;  %171 = vrot.lane.b32.xlu1 %v3858_v11, %s3793_s29 }
  0x44   :  { %194 = vrot.lane.b32.xlu0 %v3839_v7, %s3794_s30  ;;  %196 = vrot.lane.b32.xlu1 %v3850_v10, %s3794_s30 }
  0x48   :  { %198 = vrot.lane.b32.xlu0 %v3844_v9, %s3794_s30  ;;  %200 = vrot.lane.b32.xlu1 %v3858_v11, %s3794_s30 }
  0x4c   :  { %221 = vrot.lane.b32.xlu0 %v3839_v7, %s3795_s4  ;;  %223 = vrot.lane.b32.xlu1 %v3850_v10, %s3795_s4 }
  0x50   :  { %225 = vrot.lane.b32.xlu0 %v3844_v9, %s3795_s4  ;;  %227 = vrot.lane.b32.xlu1 %v3858_v11, %s3795_s4 }
  0x54   :  { %406 = vrot.lane.b32.xlu0 %v3839_v7, %s3796_s5  ;;  %408 = vrot.lane.b32.xlu1 %v3850_v10, %s3796_s5 }
  0x58   :  { %410 = vrot.lane.b32.xlu0 %v3844_v9, %s3796_s5  ;;  %412 = vrot.lane.b32.xlu1 %v3858_v11, %s3796_s5 }
  0x8e   :  { %v54_v12 = vpop.permute.xlu0 %53  ;;  %v58_v13 = vpop.permute.xlu1 %57 }
  0x92   :  { %v83_v14 = vpop.permute.xlu0 %82  ;;  %v85_v15 = vpop.permute.xlu1 %84 }
  0x93   :  { %v91_v26 = vsel %vm90_vm1, %v83_v14, %v85_v15 }
  0x96   :  { %v56_v16 = vpop.permute.xlu0 %55  ;;  %v60_v20 = vpop.permute.xlu1 %59 }
  0x97   :  { %v62_v17 = vsel %vm61_vm0, %v54_v12, %v56_v16  ;;  %v63_v18 = vsel %vm61_vm0, %v56_v16, %v58_v13  ;;  %v64_v21 = vsel %vm61_vm0, %v58_v13, %v60_v20  ;;  %v68_v22 = vsel %vm61_vm0, %v60_v20, %v54_v12 }
  0x98   :  { %v3399_v19 = vcombine.low %v62_v17, %v63_v18  ;;  %v3400_v24 = vcombine.low %v64_v21, %v68_v22 }
  0x9a   :  { %v76_v23 = vrot.slane %v3399_v19, 6  ;;  %v87_v25 = vpop.permute.xlu0 %86  ;;  %v77_v28 = vrot.slane %v3400_v24, 6  ;;  %v89_v30 = vpop.permute.xlu1 %88 }
  0x9b   :  { %v92_v27 = vsel %vm90_vm1, %v85_v15, %v87_v25  ;;  %v93_v31 = vsel %vm90_vm1, %v87_v25, %v89_v30  ;;  %v97_v32 = vsel %vm90_vm1, %v89_v30, %v83_v14 }
  0x9c   :  { %80 = vst [vmem:[#allocation2] sm:$0xcc] %v76_v23  ;;  %v3401_v29 = vcombine.low %v91_v26, %v92_v27  ;;  %81 = vst [vmem:[#allocation2 + $0x8] sm:$0xcc] %v77_v28  ;;  %v3402_v33 = vcombine.low %v93_v31, %v97_v32 }
  0x9e   :  { %107 = vst [vmem:[#allocation2 + $0x20] sm:$0x33] %v3401_v29  ;;  %v110_v34 = vpop.permute.xlu0 %109  ;;  %108 = vst [vmem:[#allocation2 + $0x28] sm:$0x33] %v3402_v33  ;;  %v112_v35 = vpop.permute.xlu1 %111 }
  0x9f   :  { %v118_v37 = vsel %vm117_vm2, %v110_v34, %v112_v35 }
  0xa2   :  { %v114_v36 = vpop.permute.xlu0 %113  ;;  %v116_v40 = vpop.permute.xlu1 %115 }
  0xa3   :  { %v119_v38 = vsel %vm117_vm2, %v112_v35, %v114_v36  ;;  %v120_v41 = vsel %vm117_vm2, %v114_v36, %v116_v40  ;;  %v124_v42 = vsel %vm117_vm2, %v116_v40, %v110_v34  ;;  %v2558_v59 = vld [vmem:[#allocation2] sm:$0xff]  ;;  %v2559_v0 = vld [vmem:[#allocation2 + $0x8] sm:$0xff] }
  0xa4   :  { %v3403_v39 = vcombine.low %v118_v37, %v119_v38  ;;  %v3404_v44 = vcombine.low %v120_v41, %v124_v42 }
  0xa6   :  { %v132_v43 = vrot.slane %v3403_v39, 6  ;;  %v139_v45 = vpop.permute.xlu0 %138  ;;  %v133_v46 = vrot.slane %v3404_v44, 6  ;;  %v141_v47 = vpop.permute.xlu1 %140 }
  0xa7   :  { %v3929_v49 = vsel %vm146_vm3, %v139_v45, %v141_v47 }
  0xa8   :  { %136 = vst [vmem:[#allocation2 + $0x20] sm:$0xcc] %v132_v43  ;;  %137 = vst [vmem:[#allocation2 + $0x28] sm:$0xcc] %v133_v46 }
  0xaa   :  { %v143_v48 = vpop.permute.xlu0 %142  ;;  %v145_v52 = vpop.permute.xlu1 %144 }
  0xab   :  { %v3932_v50 = vsel %vm146_vm3, %v141_v47, %v143_v48  ;;  %v3937_v53 = vsel %vm146_vm3, %v143_v48, %v145_v52  ;;  %v3940_v54 = vsel %vm146_vm3, %v145_v52, %v139_v45 }
  0xac   :  { %v3405_v51 = vcombine.low %v3929_v49, %v3932_v50  ;;  %v3406_v55 = vcombine.low %v3937_v53, %v3940_v54  ;;  %v3481_v56 = vcombine.low %v3932_v50, %v3937_v53  ;;  %v3482_v57 = vcombine.low %v3940_v54, %v3929_v49 }
  0xae   :  { %163 = vst [vmem:[#allocation2 + $0x40] sm:$0x33] %v3405_v51  ;;  %v166_v58 = vpop.permute.xlu0 %165  ;;  %164 = vst [vmem:[#allocation2 + $0x48] sm:$0x33] %v3406_v55  ;;  %v168_v61 = vpop.permute.xlu1 %167 }
  0xaf   :  { %v2562_v60 = vld [vmem:[#allocation2 + $0x20] sm:$0xff]  ;;  %1146 = vst [vmem:[#allocation2 + $0x2a0] sm:$0x33] %v3481_v56  ;;  %1147 = vst [vmem:[#allocation2 + $0x2a8] sm:$0x33] %v3482_v57  ;;  %v2563_v1 = vld [vmem:[#allocation2 + $0x28] sm:$0xff]  ;;  %v174_v6 = vsel %vm173_vm4, %v166_v58, %v168_v61 }
  0xb0   :  { %v3596_v62 = vcombine.high %v2558_v59, %v2562_v60  ;;  %v3595_v63 = vcombine.low %v2558_v59, %v2562_v60  ;;  %v3598_v3 = vcombine.high %v2559_v0, %v2563_v1  ;;  %v3597_v4 = vcombine.low %v2559_v0, %v2563_v1 }
  0xb2   :  { %v170_v2 = vpop.permute.xlu0 %169  ;;  %3199 = vmatprep.subr.bf16.mxu0 %v3596_v62  ;;  %3240 = vmatprep.subr.bf16.mxu1 %v3598_v3  ;;  %v172_v13 = vpop.permute.xlu1 %171 }
  0xb3   :  { %v175_v8 = vsel %vm173_vm4, %v168_v61, %v170_v2  ;;  %3200 = vmatpush1.bf16.msra.mxu0 %v3595_v63  ;;  %v176_v14 = vsel %vm173_vm4, %v170_v2, %v172_v13  ;;  %v180_v15 = vsel %vm173_vm4, %v172_v13, %v166_v58  ;;  %3241 = vmatpush1.bf16.msra.mxu1 %v3597_v4 }
  0xb4   :  { %v3407_v12 = vcombine.low %v174_v6, %v175_v8  ;;  %v3408_v17 = vcombine.low %v176_v14, %v180_v15 }
  0xb6   :  { %v188_v16 = vrot.slane %v3407_v12, 6  ;;  %v195_v18 = vpop.permute.xlu0 %194  ;;  %v189_v19 = vrot.slane %v3408_v17, 6  ;;  %v197_v20 = vpop.permute.xlu1 %196 }
  0xb7   :  { %v203_v22 = vsel %vm202_vm5, %v195_v18, %v197_v20 }
  0xb8   :  { %192 = vst [vmem:[#allocation2 + $0x40] sm:$0xcc] %v188_v16  ;;  %193 = vst [vmem:[#allocation2 + $0x48] sm:$0xcc] %v189_v19 }
  0xba   :  { %v199_v21 = vpop.permute.xlu0 %198  ;;  %v201_v25 = vpop.permute.xlu1 %200 }
  0xbb   :  { %v204_v23 = vsel %vm202_vm5, %v197_v20, %v199_v21  ;;  %v205_v26 = vsel %vm202_vm5, %v199_v21, %v201_v25  ;;  %v209_v27 = vsel %vm202_vm5, %v201_v25, %v195_v18 }
  0xbc   :  { %v3409_v24 = vcombine.low %v203_v22, %v204_v23  ;;  %v3410_v28 = vcombine.low %v205_v26, %v209_v27 }
  0xbe   :  { %219 = vst [vmem:[#allocation2 + $0x60] sm:$0x33] %v3409_v24  ;;  %v222_v29 = vpop.permute.xlu0 %221  ;;  %220 = vst [vmem:[#allocation2 + $0x68] sm:$0x33] %v3410_v28  ;;  %v224_v30 = vpop.permute.xlu1 %223 }
  0xbf   :  { %v230_v31 = vsel %vm229_vm6, %v222_v29, %v224_v30  ;;  %v2566_v55 = vld [vmem:[#allocation2 + $0x40] sm:$0xff]  ;;  %v2567_v59 = vld [vmem:[#allocation2 + $0x48] sm:$0xff] }
  0xc0   :  { %250 = vrot.lane.b32.xlu0 %v230_v31, %s3789_s26 }
  0xc2   :  { %v226_v32 = vpop.permute.xlu0 %225  ;;  %v228_v35 = vpop.permute.xlu1 %227 }
  0xc3   :  { %v231_v33 = vsel %vm229_vm6, %v224_v30, %v226_v32  ;;  %v232_v36 = vsel %vm229_vm6, %v226_v32, %v228_v35  ;;  %v236_v37 = vsel %vm229_vm6, %v228_v35, %v222_v29 }
  0xc4   :  { %v3411_v34 = vcombine.low %v230_v31, %v231_v33  ;;  %252 = vrot.lane.b32.xlu1 %v231_v33, %s3789_s26  ;;  %v3412_v39 = vcombine.low %v232_v36, %v236_v37  ;;  %275 = vrot.lane.b32.xlu0 %v230_v31, %s3790_s0 }
  0xc6   :  { %v244_v38 = vrot.slane %v3411_v34, 6  ;;  %v407_v40 = vpop.permute.xlu0 %406  ;;  %v245_v41 = vrot.slane %v3412_v39, 6  ;;  %v409_v42 = vpop.permute.xlu1 %408 }
  0xc7   :  { %v415_v43 = vsel %vm414_vm7, %v407_v40, %v409_v42 }
  0xc8   :  { %248 = vst [vmem:[#allocation2 + $0x60] sm:$0xcc] %v244_v38  ;;  %277 = vrot.lane.b32.xlu1 %v231_v33, %s3790_s0  ;;  %249 = vst [vmem:[#allocation2 + $0x68] sm:$0xcc] %v245_v41  ;;  %302 = vrot.lane.b32.xlu0 %v230_v31, %s3791_s27 }
  0xca   :  { %v411_v44 = vpop.permute.xlu0 %410  ;;  %v413_v47 = vpop.permute.xlu1 %412 }
  0xcb   :  { %v416_v45 = vsel %vm414_vm7, %v409_v42, %v411_v44  ;;  %v417_v48 = vsel %vm414_vm7, %v411_v44, %v413_v47  ;;  %v421_v51 = vsel %vm414_vm7, %v413_v47, %v407_v40 }
  0xcc   :  { %304 = vrot.lane.b32.xlu1 %v231_v33, %s3791_s27  ;;  %v3425_v46 = vcombine.low %v415_v43, %v416_v45  ;;  %327 = vrot.lane.b32.xlu0 %v230_v31, %s3792_s28  ;;  %v3426_v52 = vcombine.low %v417_v48, %v421_v51 }
  0xce   :  { %431 = vst [vmem:[#allocation2 + $0xe0] sm:$0x33] %v3425_v46  ;;  %432 = vst [vmem:[#allocation2 + $0xe8] sm:$0x33] %v3426_v52 }
  0xcf   :  { %v2570_v56 = vld [vmem:[#allocation2 + $0x60] sm:$0xff]  ;;  %v2571_v60 = vld [vmem:[#allocation2 + $0x68] sm:$0xff] }
  0xd0   :  { %329 = vrot.lane.b32.xlu1 %v231_v33, %s3792_s28  ;;  %v3604_v57 = vcombine.high %v2566_v55, %v2570_v56  ;;  %v3603_v58 = vcombine.low %v2566_v55, %v2570_v56  ;;  %354 = vrot.lane.b32.xlu0 %v230_v31, %s3793_s29  ;;  %v3606_v61 = vcombine.high %v2567_v59, %v2571_v60 }
  0xd1   :  { %v3605_v62 = vcombine.low %v2567_v59, %v2571_v60 }
  0xd2   :  { %3201 = vmatprep.subr.bf16.mxu0 %v3604_v57  ;;  %3242 = vmatprep.subr.bf16.mxu1 %v3606_v61 }
  0xd3   :  { %3202 = vmatpush1.bf16.msra.mxu0 %v3603_v58  ;;  %3243 = vmatpush1.bf16.msra.mxu1 %v3605_v62 }
  0xd4   :  { %356 = vrot.lane.b32.xlu1 %v231_v33, %s3793_s29  ;;  %379 = vrot.lane.b32.xlu0 %v230_v31, %s3794_s30 }
  0xd8   :  { %381 = vrot.lane.b32.xlu1 %v231_v33, %s3794_s30  ;;  %433 = vrot.lane.b32.xlu0 %v415_v43, %s3789_s26 }
  0xdc   :  { %435 = vrot.lane.b32.xlu1 %v416_v45, %s3789_s26  ;;  %460 = vrot.lane.b32.xlu0 %v415_v43, %s3790_s0 }
  0xe0   :  { %462 = vrot.lane.b32.xlu1 %v416_v45, %s3790_s0  ;;  %485 = vrot.lane.b32.xlu0 %v415_v43, %s3791_s27 }
  0xe4   :  { %487 = vrot.lane.b32.xlu1 %v416_v45, %s3791_s27  ;;  %254 = vrot.lane.b32.xlu0 %v232_v36, %s3789_s26 }
  0xe8   :  { %256 = vrot.lane.b32.xlu1 %v236_v37, %s3789_s26  ;;  %279 = vrot.lane.b32.xlu0 %v232_v36, %s3790_s0 }
  0xec   :  { %281 = vrot.lane.b32.xlu1 %v236_v37, %s3790_s0  ;;  %306 = vrot.lane.b32.xlu0 %v232_v36, %s3791_s27 }
  0xf0   :  { %308 = vrot.lane.b32.xlu1 %v236_v37, %s3791_s27  ;;  %331 = vrot.lane.b32.xlu0 %v232_v36, %s3792_s28 }
  0xf4   :  { %333 = vrot.lane.b32.xlu1 %v236_v37, %s3792_s28  ;;  %358 = vrot.lane.b32.xlu0 %v232_v36, %s3793_s29 }
  0xf8   :  { %360 = vrot.lane.b32.xlu1 %v236_v37, %s3793_s29  ;;  %383 = vrot.lane.b32.xlu0 %v232_v36, %s3794_s30 }
  0xfc   :  { %385 = vrot.lane.b32.xlu1 %v236_v37, %s3794_s30  ;;  %437 = vrot.lane.b32.xlu0 %v417_v48, %s3789_s26 }
 0x100   :  { %439 = vrot.lane.b32.xlu1 %v421_v51, %s3789_s26  ;;  %464 = vrot.lane.b32.xlu0 %v417_v48, %s3790_s0 }
 0x104   :  { %466 = vrot.lane.b32.xlu1 %v421_v51, %s3790_s0  ;;  %489 = vrot.lane.b32.xlu0 %v417_v48, %s3791_s27 }
 0x108   :  { %491 = vrot.lane.b32.xlu1 %v421_v51, %s3791_s27  ;;  %512 = vrot.lane.b32.xlu0 %v415_v43, %s3792_s28 }
 0x10c   :  { %514 = vrot.lane.b32.xlu1 %v416_v45, %s3792_s28  ;;  %516 = vrot.lane.b32.xlu0 %v417_v48, %s3792_s28 }
 0x110   :  { %518 = vrot.lane.b32.xlu1 %v421_v51, %s3792_s28  ;;  %537 = vrot.lane.b32.xlu0 %v415_v43, %s3793_s29 }
 0x114   :  { %539 = vrot.lane.b32.xlu1 %v416_v45, %s3793_s29  ;;  %541 = vrot.lane.b32.xlu0 %v417_v48, %s3793_s29 }
 0x118   :  { %543 = vrot.lane.b32.xlu1 %v421_v51, %s3793_s29  ;;  %564 = vrot.lane.b32.xlu0 %v415_v43, %s3794_s30 }
 0x11c   :  { %566 = vrot.lane.b32.xlu1 %v416_v45, %s3794_s30  ;;  %568 = vrot.lane.b32.xlu0 %v417_v48, %s3794_s30 }
 0x120   :  { %570 = vrot.lane.b32.xlu1 %v421_v51, %s3794_s30  ;;  %589 = vrot.lane.b32.xlu0 %v3839_v7, %s3797_s6 }
 0x124   :  { %591 = vrot.lane.b32.xlu1 %v3850_v10, %s3797_s6  ;;  %593 = vrot.lane.b32.xlu0 %v3844_v9, %s3797_s6 }
 0x128   :  { %595 = vrot.lane.b32.xlu1 %v3858_v11, %s3797_s6 }
 0x132   :  { %v251_v63 = vpop.permute.xlu0 %250 }
 0x136   :  { %v253_v0 = vpop.permute.xlu1 %252  ;;  %v276_v1 = vpop.permute.xlu0 %275 }
 0x137   :  { %v258_v23 = vsel %vm61_vm0, %v251_v63, %v253_v0 }
 0x13a   :  { %v278_v2 = vpop.permute.xlu1 %277  ;;  %v303_v3 = vpop.permute.xlu0 %302 }
 0x13b   :  { %v283_v31 = vsel %vm90_vm1, %v276_v1, %v278_v2 }
 0x13e   :  { %v305_v4 = vpop.permute.xlu1 %304  ;;  %v328_v6 = vpop.permute.xlu0 %327 }
 0x13f   :  { %v310_v40 = vsel %vm117_vm2, %v303_v3, %v305_v4 }
 0x142   :  { %v330_v8 = vpop.permute.xlu1 %329  ;;  %v355_v12 = vpop.permute.xlu0 %354 }
 0x143   :  { %v335_v51 = vsel %vm146_vm3, %v328_v6, %v330_v8 }
 0x146   :  { %v357_v13 = vpop.permute.xlu1 %356  ;;  %v4020_v14 = vpop.permute.xlu0 %379 }
 0x147   :  { %v362_v62 = vsel %vm173_vm4, %v355_v12, %v357_v13 }
 0x14a   :  { %v4022_v15 = vpop.permute.xlu1 %381  ;;  %v4024_v16 = vpop.permute.xlu0 %433 }
 0x14e   :  { %v4026_v17 = vpop.permute.xlu1 %435  ;;  %v4028_v18 = vpop.permute.xlu0 %460 }
 0x152   :  { %v4030_v19 = vpop.permute.xlu1 %462  ;;  %v4032_v20 = vpop.permute.xlu0 %485 }
 0x156   :  { %v4034_v21 = vpop.permute.xlu1 %487  ;;  %v255_v22 = vpop.permute.xlu0 %254 }
 0x157   :  { %v259_v24 = vsel %vm61_vm0, %v253_v0, %v255_v22 }
 0x158   :  { %v3413_v25 = vcombine.low %v258_v23, %v259_v24 }
 0x15a   :  { %v257_v26 = vpop.permute.xlu1 %256  ;;  %273 = vst [vmem:[#allocation2 + $0x80] sm:$0x33] %v3413_v25  ;;  %v280_v30 = vpop.permute.xlu0 %279 }
 0x15b   :  { %v260_v27 = vsel %vm61_vm0, %v255_v22, %v257_v26  ;;  %v263_v28 = vsel %vm61_vm0, %v257_v26, %v251_v63  ;;  %v284_v32 = vsel %vm90_vm1, %v278_v2, %v280_v30 }
 0x15c   :  { %v3414_v29 = vcombine.low %v260_v27, %v263_v28  ;;  %v3415_v33 = vcombine.low %v283_v31, %v284_v32 }
 0x15e   :  { %274 = vst [vmem:[#allocation2 + $0x88] sm:$0x33] %v3414_v29  ;;  %v282_v34 = vpop.permute.xlu1 %281  ;;  %v296_v37 = vrot.slane %v3415_v33, 6  ;;  %v307_v39 = vpop.permute.xlu0 %306  ;;  %v441_v29 = vsel %vm61_vm0, %v4024_v16, %v4026_v17 }
 0x15f   :  { %v285_v35 = vsel %vm90_vm1, %v280_v30, %v282_v34  ;;  %v288_v36 = vsel %vm90_vm1, %v282_v34, %v276_v1  ;;  %v311_v41 = vsel %vm117_vm2, %v305_v4, %v307_v39 }
 0x160   :  { %v3416_v38 = vcombine.low %v285_v35, %v288_v36  ;;  %300 = vst [vmem:[#allocation2 + $0x80] sm:$0xcc] %v296_v37  ;;  %v3417_v43 = vcombine.low %v310_v40, %v311_v41 }
 0x162   :  { %v297_v42 = vrot.slane %v3416_v38, 6  ;;  %v309_v44 = vpop.permute.xlu1 %308  ;;  %325 = vst [vmem:[#allocation2 + $0xa0] sm:$0x33] %v3417_v43  ;;  %v332_v48 = vpop.permute.xlu0 %331 }
 0x163   :  { %v312_v45 = vsel %vm117_vm2, %v307_v39, %v309_v44  ;;  %v315_v46 = vsel %vm117_vm2, %v309_v44, %v303_v3  ;;  %v336_v52 = vsel %vm146_vm3, %v330_v8, %v332_v48  ;;  %v468_v44 = vsel %vm90_vm1, %v4028_v18, %v4030_v19 }
 0x164   :  { %301 = vst [vmem:[#allocation2 + $0x88] sm:$0xcc] %v297_v42  ;;  %v3418_v47 = vcombine.low %v312_v45, %v315_v46  ;;  %v3419_v55 = vcombine.low %v335_v51, %v336_v52 }
 0x166   :  { %326 = vst [vmem:[#allocation2 + $0xa8] sm:$0x33] %v3418_v47  ;;  %v334_v56 = vpop.permute.xlu1 %333  ;;  %v348_v59 = vrot.slane %v3419_v55, 6  ;;  %v359_v61 = vpop.permute.xlu0 %358 }
 0x167   :  { %v337_v57 = vsel %vm146_vm3, %v332_v48, %v334_v56  ;;  %v340_v58 = vsel %vm146_vm3, %v334_v56, %v328_v6  ;;  %v363_v63 = vsel %vm173_vm4, %v357_v13, %v359_v61  ;;  %v387_v6 = vsel %vm202_vm5, %v4020_v14, %v4022_v15  ;;  %v2574_v31 = vld [vmem:[#allocation2 + $0x80] sm:$0xff] }
 0x168   :  { %v3420_v60 = vcombine.low %v337_v57, %v340_v58  ;;  %352 = vst [vmem:[#allocation2 + $0xa0] sm:$0xcc] %v348_v59  ;;  %v3421_v1 = vcombine.low %v362_v62, %v363_v63 }
 0x16a   :  { %v349_v0 = vrot.slane %v3420_v60, 6  ;;  %v361_v2 = vpop.permute.xlu1 %360  ;;  %377 = vst [vmem:[#allocation2 + $0xc0] sm:$0x33] %v3421_v1  ;;  %v384_v22 = vpop.permute.xlu0 %383 }
 0x16b   :  { %v364_v3 = vsel %vm173_vm4, %v359_v61, %v361_v2  ;;  %v367_v4 = vsel %vm173_vm4, %v361_v2, %v355_v12  ;;  %v388_v23 = vsel %vm202_vm5, %v4022_v15, %v384_v22  ;;  %v2575_v38 = vld [vmem:[#allocation2 + $0x88] sm:$0xff] }
 0x16c   :  { %353 = vst [vmem:[#allocation2 + $0xa8] sm:$0xcc] %v349_v0  ;;  %v3422_v8 = vcombine.low %v364_v3, %v367_v4  ;;  %v3423_v13 = vcombine.low %v387_v6, %v388_v23 }
 0x16e   :  { %378 = vst [vmem:[#allocation2 + $0xc8] sm:$0x33] %v3422_v8  ;;  %v386_v24 = vpop.permute.xlu1 %385  ;;  %v400_v12 = vrot.slane %v3423_v13, 6  ;;  %v438_v28 = vpop.permute.xlu0 %437 }
 0x16f   :  { %v389_v25 = vsel %vm202_vm5, %v384_v22, %v386_v24  ;;  %v392_v26 = vsel %vm202_vm5, %v386_v24, %v4020_v14  ;;  %v442_v30 = vsel %vm61_vm0, %v4026_v17, %v438_v28  ;;  %v2578_v15 = vld [vmem:[#allocation2 + $0xa0] sm:$0xff] }
 0x170   :  { %v3424_v27 = vcombine.low %v389_v25, %v392_v26  ;;  %404 = vst [vmem:[#allocation2 + $0xc0] sm:$0xcc] %v400_v12  ;;  %v3427_v33 = vcombine.low %v441_v29, %v442_v30  ;;  %v3612_v35 = vcombine.high %v2574_v31, %v2578_v15  ;;  %v3611_v36 = vcombine.low %v2574_v31, %v2578_v15 }
 0x172   :  { %v401_v32 = vrot.slane %v3424_v27, 6  ;;  %v440_v34 = vpop.permute.xlu1 %439  ;;  %v454_v40 = vrot.slane %v3427_v33, 6  ;;  %v465_v42 = vpop.permute.xlu0 %464  ;;  %3203 = vmatprep.subr.bf16.mxu0 %v3612_v35 }
 0x173   :  { %v443_v14 = vsel %vm61_vm0, %v438_v28, %v440_v34  ;;  %v446_v37 = vsel %vm61_vm0, %v440_v34, %v4024_v16  ;;  %v2579_v39 = vld [vmem:[#allocation2 + $0xa8] sm:$0xff]  ;;  %v469_v45 = vsel %vm90_vm1, %v4030_v19, %v465_v42  ;;  %3204 = vmatpush1.bf16.msra.mxu0 %v3611_v36  ;;  %v493_v19 = vsel %vm117_vm2, %v4032_v20, %v4034_v21 }
 0x174   :  { %405 = vst [vmem:[#allocation2 + $0xc8] sm:$0xcc] %v401_v32  ;;  %v3428_v41 = vcombine.low %v443_v14, %v446_v37  ;;  %v3614_v17 = vcombine.high %v2575_v38, %v2579_v39  ;;  %v3613_v43 = vcombine.low %v2575_v38, %v2579_v39  ;;  %458 = vst [vmem:[#allocation2 + $0xe0] sm:$0xcc] %v454_v40 }
 0x175   :  { %v3429_v16 = vcombine.low %v468_v44, %v469_v45 }
 0x176   :  { %v455_v46 = vrot.slane %v3428_v41, 6  ;;  %3244 = vmatprep.subr.bf16.mxu1 %v3614_v17  ;;  %v467_v47 = vpop.permute.xlu1 %466  ;;  %v490_v55 = vpop.permute.xlu0 %489 }
 0x177   :  { %v470_v48 = vsel %vm90_vm1, %v465_v42, %v467_v47  ;;  %v473_v51 = vsel %vm90_vm1, %v467_v47, %v4028_v18  ;;  %3245 = vmatpush1.bf16.msra.mxu1 %v3613_v43  ;;  %483 = vst [vmem:[#allocation2 + $0x100] sm:$0x33] %v3429_v16  ;;  %v494_v56 = vsel %vm117_vm2, %v4034_v21, %v490_v55  ;;  %v2582_v63 = vld [vmem:[#allocation2 + $0xc0] sm:$0xff] }
 0x178   :  { %459 = vst [vmem:[#allocation2 + $0xe8] sm:$0xcc] %v455_v46  ;;  %v3430_v52 = vcombine.low %v470_v48, %v473_v51  ;;  %v3431_v57 = vcombine.low %v493_v19, %v494_v56 }
 0x17a   :  { %484 = vst [vmem:[#allocation2 + $0x108] sm:$0x33] %v3430_v52  ;;  %v492_v58 = vpop.permute.xlu1 %491  ;;  %v506_v60 = vrot.slane %v3431_v57, 6  ;;  %v513_v62 = vpop.permute.xlu0 %512 }
 0x17b   :  { %v495_v59 = vsel %vm117_vm2, %v490_v55, %v492_v58  ;;  %v498_v18 = vsel %vm117_vm2, %v492_v58, %v4032_v20  ;;  %v2586_v0 = vld [vmem:[#allocation2 + $0xe0] sm:$0xff]  ;;  %v2583_v8 = vld [vmem:[#allocation2 + $0xc8] sm:$0xff] }
 0x17c   :  { %v3432_v61 = vcombine.low %v495_v59, %v498_v18  ;;  %510 = vst [vmem:[#allocation2 + $0x100] sm:$0xcc] %v506_v60  ;;  %v3620_v3 = vcombine.high %v2582_v63, %v2586_v0  ;;  %v3619_v4 = vcombine.low %v2582_v63, %v2586_v0 }
 0x17e   :  { %v507_v1 = vrot.slane %v3432_v61, 6  ;;  %v515_v2 = vpop.permute.xlu1 %514  ;;  %v517_v22 = vpop.permute.xlu0 %516  ;;  %3205 = vmatprep.subr.bf16.mxu0 %v3620_v3 }
 0x17f   :  { %v2587_v21 = vld [vmem:[#allocation2 + $0xe8] sm:$0xff]  ;;  %v520_v13 = vsel %vm146_vm3, %v513_v62, %v515_v2  ;;  %v521_v20 = vsel %vm146_vm3, %v515_v2, %v517_v22  ;;  %3206 = vmatpush1.bf16.msra.mxu0 %v3619_v4 }
 0x180   :  { %511 = vst [vmem:[#allocation2 + $0x108] sm:$0xcc] %v507_v1  ;;  %v3622_v6 = vcombine.high %v2583_v8, %v2587_v21  ;;  %v3621_v23 = vcombine.low %v2583_v8, %v2587_v21  ;;  %v3433_v24 = vcombine.low %v520_v13, %v521_v20 }
 0x182   :  { %3246 = vmatprep.subr.bf16.mxu1 %v3622_v6  ;;  %v519_v25 = vpop.permute.xlu1 %518  ;;  %535 = vst [vmem:[#allocation2 + $0x120] sm:$0x33] %v3433_v24  ;;  %v538_v28 = vpop.permute.xlu0 %537 }
 0x183   :  { %v522_v26 = vsel %vm146_vm3, %v517_v22, %v519_v25  ;;  %v525_v12 = vsel %vm146_vm3, %v519_v25, %v513_v62  ;;  %3247 = vmatpush1.bf16.msra.mxu1 %v3621_v23  ;;  %v2590_v47 = vld [vmem:[#allocation2 + $0x100] sm:$0xff] }
 0x184   :  { %v3434_v27 = vcombine.low %v522_v26, %v525_v12 }
 0x186   :  { %536 = vst [vmem:[#allocation2 + $0x128] sm:$0x33] %v3434_v27  ;;  %v540_v29 = vpop.permute.xlu1 %539  ;;  %v542_v30 = vpop.permute.xlu0 %541 }
 0x187   :  { %v545_v31 = vsel %vm173_vm4, %v538_v28, %v540_v29  ;;  %v546_v15 = vsel %vm173_vm4, %v540_v29, %v542_v30  ;;  %v2591_v56 = vld [vmem:[#allocation2 + $0x108] sm:$0xff] }
 0x188   :  { %v3435_v32 = vcombine.low %v545_v31, %v546_v15 }
 0x18a   :  { %v544_v33 = vpop.permute.xlu1 %543  ;;  %v558_v36 = vrot.slane %v3435_v32, 6  ;;  %v565_v37 = vpop.permute.xlu0 %564 }
 0x18b   :  { %v547_v34 = vsel %vm173_vm4, %v542_v30, %v544_v33  ;;  %v550_v35 = vsel %vm173_vm4, %v544_v33, %v538_v28 }
 0x18c   :  { %v3436_v14 = vcombine.low %v547_v34, %v550_v35  ;;  %562 = vst [vmem:[#allocation2 + $0x120] sm:$0xcc] %v558_v36 }
 0x18e   :  { %v559_v38 = vrot.slane %v3436_v14, 6  ;;  %v567_v39 = vpop.permute.xlu1 %566  ;;  %v569_v40 = vpop.permute.xlu0 %568 }
 0x18f   :  { %v572_v41 = vsel %vm202_vm5, %v565_v37, %v567_v39  ;;  %v573_v42 = vsel %vm202_vm5, %v567_v39, %v569_v40 }
 0x190   :  { %563 = vst [vmem:[#allocation2 + $0x128] sm:$0xcc] %v559_v38  ;;  %v3437_v17 = vcombine.low %v572_v41, %v573_v42 }
 0x192   :  { %v571_v43 = vpop.permute.xlu1 %570  ;;  %587 = vst [vmem:[#allocation2 + $0x140] sm:$0x33] %v3437_v17  ;;  %v590_v16 = vpop.permute.xlu0 %589 }
 0x193   :  { %v574_v44 = vsel %vm202_vm5, %v569_v40, %v571_v43  ;;  %v577_v45 = vsel %vm202_vm5, %v571_v43, %v565_v37  ;;  %v2594_v48 = vld [vmem:[#allocation2 + $0x120] sm:$0xff] }
 0x194   :  { %v3438_v46 = vcombine.low %v574_v44, %v577_v45  ;;  %v3628_v52 = vcombine.high %v2590_v47, %v2594_v48  ;;  %v3627_v55 = vcombine.low %v2590_v47, %v2594_v48 }
 0x196   :  { %588 = vst [vmem:[#allocation2 + $0x148] sm:$0x33] %v3438_v46  ;;  %v592_v51 = vpop.permute.xlu1 %591  ;;  %v594_v58 = vpop.permute.xlu0 %593  ;;  %3207 = vmatprep.subr.bf16.mxu0 %v3628_v52 }
 0x197   :  { %v598_v19 = vsel %vm597_vm8, %v590_v16, %v592_v51  ;;  %v2595_v57 = vld [vmem:[#allocation2 + $0x128] sm:$0xff]  ;;  %v599_v60 = vsel %vm597_vm8, %v592_v51, %v594_v58  ;;  %3208 = vmatpush1.bf16.msra.mxu0 %v3627_v55 }
 0x198   :  { %618 = vrot.lane.b32.xlu0 %v598_v19, %s3789_s26  ;;  %v3630_v59 = vcombine.high %v2591_v56, %v2595_v57  ;;  %v3629_v18 = vcombine.low %v2591_v56, %v2595_v57  ;;  %v3439_v61 = vcombine.low %v598_v19, %v599_v60  ;;  %620 = vrot.lane.b32.xlu1 %v599_v60, %s3789_s26 }
 0x19a   :  { %3248 = vmatprep.subr.bf16.mxu1 %v3630_v59  ;;  %v596_v62 = vpop.permute.xlu1 %595  ;;  %v612_v1 = vrot.slane %v3439_v61, 6 }
 0x19b   :  { %v600_v63 = vsel %vm597_vm8, %v594_v58, %v596_v62  ;;  %v604_v0 = vsel %vm597_vm8, %v596_v62, %v590_v16  ;;  %3249 = vmatpush1.bf16.msra.mxu1 %v3629_v18 }
 0x19c   :  { %v3440_v2 = vcombine.low %v600_v63, %v604_v0  ;;  %622 = vrot.lane.b32.xlu0 %v600_v63, %s3789_s26  ;;  %616 = vst [vmem:[#allocation2 + $0x140] sm:$0xcc] %v612_v1  ;;  %624 = vrot.lane.b32.xlu1 %v604_v0, %s3789_s26 }
 0x19e   :  { %v613_v3 = vrot.slane %v3440_v2, 6 }
 0x1a0   :  { %617 = vst [vmem:[#allocation2 + $0x148] sm:$0xcc] %v613_v3  ;;  %643 = vrot.lane.b32.xlu0 %v598_v19, %s3790_s0  ;;  %645 = vrot.lane.b32.xlu1 %v599_v60, %s3790_s0 }
 0x1a3   :  { %v2598_v45 = vld [vmem:[#allocation2 + $0x140] sm:$0xff] }
 0x1a4   :  { %647 = vrot.lane.b32.xlu0 %v600_v63, %s3790_s0  ;;  %649 = vrot.lane.b32.xlu1 %v604_v0, %s3790_s0 }
 0x1a7   :  { %v2599_v51 = vld [vmem:[#allocation2 + $0x148] sm:$0xff] }
 0x1a8   :  { %670 = vrot.lane.b32.xlu0 %v598_v19, %s3791_s27  ;;  %672 = vrot.lane.b32.xlu1 %v599_v60, %s3791_s27 }
 0x1ac   :  { %674 = vrot.lane.b32.xlu0 %v600_v63, %s3791_s27  ;;  %676 = vrot.lane.b32.xlu1 %v604_v0, %s3791_s27 }
 0x1b0   :  { %695 = vrot.lane.b32.xlu0 %v598_v19, %s3792_s28  ;;  %697 = vrot.lane.b32.xlu1 %v599_v60, %s3792_s28 }
 0x1b4   :  { %699 = vrot.lane.b32.xlu0 %v600_v63, %s3792_s28  ;;  %701 = vrot.lane.b32.xlu1 %v604_v0, %s3792_s28 }
 0x1b8   :  { %722 = vrot.lane.b32.xlu0 %v598_v19, %s3793_s29  ;;  %724 = vrot.lane.b32.xlu1 %v599_v60, %s3793_s29 }
 0x1bc   :  { %726 = vrot.lane.b32.xlu0 %v600_v63, %s3793_s29  ;;  %728 = vrot.lane.b32.xlu1 %v604_v0, %s3793_s29 }
 0x1c0   :  { %747 = vrot.lane.b32.xlu0 %v598_v19, %s3794_s30  ;;  %749 = vrot.lane.b32.xlu1 %v599_v60, %s3794_s30 }
 0x1c4   :  { %751 = vrot.lane.b32.xlu0 %v600_v63, %s3794_s30  ;;  %753 = vrot.lane.b32.xlu1 %v604_v0, %s3794_s30 }
 0x1c8   :  { %774 = vrot.lane.b32.xlu0 %v3839_v7, %s3798_s7  ;;  %776 = vrot.lane.b32.xlu1 %v3850_v10, %s3798_s7 }
 0x1cc   :  { %778 = vrot.lane.b32.xlu0 %v3844_v9, %s3798_s7  ;;  %780 = vrot.lane.b32.xlu1 %v3858_v11, %s3798_s7 }
 0x20a   :  { %v619_v4 = vpop.permute.xlu0 %618  ;;  %v621_v8 = vpop.permute.xlu1 %620 }
 0x20b   :  { %v626_v22 = vsel %vm61_vm0, %v619_v4, %v621_v8 }
 0x20e   :  { %v623_v21 = vpop.permute.xlu0 %622  ;;  %v625_v13 = vpop.permute.xlu1 %624 }
 0x20f   :  { %v627_v6 = vsel %vm61_vm0, %v621_v8, %v623_v21  ;;  %v628_v20 = vsel %vm61_vm0, %v623_v21, %v625_v13  ;;  %v631_v24 = vsel %vm61_vm0, %v625_v13, %v619_v4 }
 0x210   :  { %v3441_v23 = vcombine.low %v626_v22, %v627_v6  ;;  %v3442_v25 = vcombine.low %v628_v20, %v631_v24 }
 0x212   :  { %641 = vst [vmem:[#allocation2 + $0x160] sm:$0x33] %v3441_v23  ;;  %v644_v26 = vpop.permute.xlu0 %643  ;;  %642 = vst [vmem:[#allocation2 + $0x168] sm:$0x33] %v3442_v25  ;;  %v646_v12 = vpop.permute.xlu1 %645 }
 0x213   :  { %v651_v28 = vsel %vm90_vm1, %v644_v26, %v646_v12 }
 0x216   :  { %v648_v27 = vpop.permute.xlu0 %647  ;;  %v650_v31 = vpop.permute.xlu1 %649 }
 0x217   :  { %v652_v29 = vsel %vm90_vm1, %v646_v12, %v648_v27  ;;  %v653_v15 = vsel %vm90_vm1, %v648_v27, %v650_v31  ;;  %v656_v32 = vsel %vm90_vm1, %v650_v31, %v644_v26 }
 0x218   :  { %v3443_v30 = vcombine.low %v651_v28, %v652_v29  ;;  %v3444_v34 = vcombine.low %v653_v15, %v656_v32 }
 0x21a   :  { %v664_v33 = vrot.slane %v3443_v30, 6  ;;  %v671_v35 = vpop.permute.xlu0 %670  ;;  %v665_v36 = vrot.slane %v3444_v34, 6  ;;  %v673_v14 = vpop.permute.xlu1 %672 }
 0x21b   :  { %v678_v38 = vsel %vm117_vm2, %v671_v35, %v673_v14 }
 0x21c   :  { %668 = vst [vmem:[#allocation2 + $0x160] sm:$0xcc] %v664_v33  ;;  %669 = vst [vmem:[#allocation2 + $0x168] sm:$0xcc] %v665_v36 }
 0x21e   :  { %v675_v37 = vpop.permute.xlu0 %674  ;;  %v677_v41 = vpop.permute.xlu1 %676 }
 0x21f   :  { %v679_v39 = vsel %vm117_vm2, %v673_v14, %v675_v37  ;;  %v680_v42 = vsel %vm117_vm2, %v675_v37, %v677_v41  ;;  %v683_v17 = vsel %vm117_vm2, %v677_v41, %v671_v35 }
 0x220   :  { %v3445_v40 = vcombine.low %v678_v38, %v679_v39  ;;  %v3446_v43 = vcombine.low %v680_v42, %v683_v17 }
 0x222   :  { %693 = vst [vmem:[#allocation2 + $0x180] sm:$0x33] %v3445_v40  ;;  %v696_v44 = vpop.permute.xlu0 %695  ;;  %694 = vst [vmem:[#allocation2 + $0x188] sm:$0x33] %v3446_v43  ;;  %v698_v16 = vpop.permute.xlu1 %697 }
 0x223   :  { %v2602_v46 = vld [vmem:[#allocation2 + $0x160] sm:$0xff]  ;;  %v2603_v52 = vld [vmem:[#allocation2 + $0x168] sm:$0xff]  ;;  %v703_v57 = vsel %vm146_vm3, %v696_v44, %v698_v16 }
 0x224   :  { %v3636_v47 = vcombine.high %v2598_v45, %v2602_v46  ;;  %v3635_v48 = vcombine.low %v2598_v45, %v2602_v46  ;;  %v3638_v19 = vcombine.high %v2599_v51, %v2603_v52  ;;  %v3637_v56 = vcombine.low %v2599_v51, %v2603_v52  ;;  %v4196_v52 = vld [vmem:[#allocation3 + $0x8] sm:$0xff] }
 0x225   :  { %3495 = vst.sshfl [vmem:[#allocation2 + $0x10] sm:$0xf pattern:$0x76325410] %v4196_v52 }
 0x226   :  { %v700_v55 = vpop.permute.xlu0 %699  ;;  %3209 = vmatprep.subr.bf16.mxu0 %v3636_v47  ;;  %3250 = vmatprep.subr.bf16.mxu1 %v3638_v19  ;;  %v702_v18 = vpop.permute.xlu1 %701 }
 0x227   :  { %v704_v58 = vsel %vm146_vm3, %v698_v16, %v700_v55  ;;  %3210 = vmatpush1.bf16.msra.mxu0 %v3635_v48  ;;  %v705_v60 = vsel %vm146_vm3, %v700_v55, %v702_v18  ;;  %v708_v61 = vsel %vm146_vm3, %v702_v18, %v696_v44  ;;  %3251 = vmatpush1.bf16.msra.mxu1 %v3637_v56 }
 0x228   :  { %v3447_v59 = vcombine.low %v703_v57, %v704_v58  ;;  %v3448_v63 = vcombine.low %v705_v60, %v708_v61 }
 0x22a   :  { %v716_v62 = vrot.slane %v3447_v59, 6  ;;  %v723_v0 = vpop.permute.xlu0 %722  ;;  %v717_v1 = vrot.slane %v3448_v63, 6  ;;  %v725_v2 = vpop.permute.xlu1 %724 }
 0x22b   :  { %v730_v4 = vsel %vm173_vm4, %v723_v0, %v725_v2 }
 0x22c   :  { %720 = vst [vmem:[#allocation2 + $0x180] sm:$0xcc] %v716_v62  ;;  %721 = vst [vmem:[#allocation2 + $0x188] sm:$0xcc] %v717_v1 }
 0x22e   :  { %v727_v3 = vpop.permute.xlu0 %726  ;;  %v729_v22 = vpop.permute.xlu1 %728 }
 0x22f   :  { %v731_v8 = vsel %vm173_vm4, %v725_v2, %v727_v3  ;;  %v732_v6 = vsel %vm173_vm4, %v727_v3, %v729_v22  ;;  %v735_v23 = vsel %vm173_vm4, %v729_v22, %v723_v0 }
 0x230   :  { %v3449_v21 = vcombine.low %v730_v4, %v731_v8  ;;  %v3450_v13 = vcombine.low %v732_v6, %v735_v23 }
 0x232   :  { %745 = vst [vmem:[#allocation2 + $0x1a0] sm:$0x33] %v3449_v21  ;;  %v748_v20 = vpop.permute.xlu0 %747  ;;  %746 = vst [vmem:[#allocation2 + $0x1a8] sm:$0x33] %v3450_v13  ;;  %v750_v24 = vpop.permute.xlu1 %749 }
 0x233   :  { %v755_v26 = vsel %vm202_vm5, %v748_v20, %v750_v24  ;;  %v2606_v42 = vld [vmem:[#allocation2 + $0x180] sm:$0xff]  ;;  %v2607_v45 = vld [vmem:[#allocation2 + $0x188] sm:$0xff] }
 0x236   :  { %v752_v25 = vpop.permute.xlu0 %751  ;;  %v754_v28 = vpop.permute.xlu1 %753 }
 0x237   :  { %v756_v12 = vsel %vm202_vm5, %v750_v24, %v752_v25  ;;  %v757_v29 = vsel %vm202_vm5, %v752_v25, %v754_v28  ;;  %v760_v30 = vsel %vm202_vm5, %v754_v28, %v748_v20 }
 0x238   :  { %v3451_v27 = vcombine.low %v755_v26, %v756_v12  ;;  %v3452_v15 = vcombine.low %v757_v29, %v760_v30 }
 0x23a   :  { %v768_v31 = vrot.slane %v3451_v27, 6  ;;  %v775_v32 = vpop.permute.xlu0 %774  ;;  %v769_v33 = vrot.slane %v3452_v15, 6  ;;  %v777_v34 = vpop.permute.xlu1 %776 }
 0x23b   :  { %v783_v35 = vsel %vm782_vm9, %v775_v32, %v777_v34 }
 0x23c   :  { %772 = vst [vmem:[#allocation2 + $0x1a0] sm:$0xcc] %v768_v31  ;;  %773 = vst [vmem:[#allocation2 + $0x1a8] sm:$0xcc] %v769_v33  ;;  %801 = vrot.lane.b32.xlu0 %v783_v35, %s3789_s26 }
 0x23e   :  { %v779_v36 = vpop.permute.xlu0 %778  ;;  %v781_v38 = vpop.permute.xlu1 %780 }
 0x23f   :  { %v784_v14 = vsel %vm782_vm9, %v777_v34, %v779_v36  ;;  %v785_v39 = vsel %vm782_vm9, %v779_v36, %v781_v38  ;;  %v789_v40 = vsel %vm782_vm9, %v781_v38, %v775_v32 }
 0x240   :  { %v3453_v37 = vcombine.low %v783_v35, %v784_v14  ;;  %803 = vrot.lane.b32.xlu1 %v784_v14, %s3789_s26  ;;  %v3454_v41 = vcombine.low %v785_v39, %v789_v40  ;;  %805 = vrot.lane.b32.xlu0 %v785_v39, %s3789_s26 }
 0x242   :  { %799 = vst [vmem:[#allocation2 + $0x1c0] sm:$0x33] %v3453_v37  ;;  %800 = vst [vmem:[#allocation2 + $0x1c8] sm:$0x33] %v3454_v41 }
 0x243   :  { %v2610_v17 = vld [vmem:[#allocation2 + $0x1a0] sm:$0xff]  ;;  %v2611_v46 = vld [vmem:[#allocation2 + $0x1a8] sm:$0xff] }
 0x244   :  { %807 = vrot.lane.b32.xlu1 %v789_v40, %s3789_s26  ;;  %v3644_v43 = vcombine.high %v2606_v42, %v2610_v17  ;;  %v3643_v44 = vcombine.low %v2606_v42, %v2610_v17  ;;  %828 = vrot.lane.b32.xlu0 %v783_v35, %s3790_s0  ;;  %v3646_v16 = vcombine.high %v2607_v45, %v2611_v46 }
 0x245   :  { %v3645_v47 = vcombine.low %v2607_v45, %v2611_v46 }
 0x246   :  { %3211 = vmatprep.subr.bf16.mxu0 %v3644_v43  ;;  %3252 = vmatprep.subr.bf16.mxu1 %v3646_v16 }
 0x247   :  { %3212 = vmatpush1.bf16.msra.mxu0 %v3643_v44  ;;  %3253 = vmatpush1.bf16.msra.mxu1 %v3645_v47 }
 0x248   :  { %830 = vrot.lane.b32.xlu1 %v784_v14, %s3790_s0  ;;  %832 = vrot.lane.b32.xlu0 %v785_v39, %s3790_s0 }
 0x24c   :  { %834 = vrot.lane.b32.xlu1 %v789_v40, %s3790_s0  ;;  %853 = vrot.lane.b32.xlu0 %v783_v35, %s3791_s27 }
 0x250   :  { %855 = vrot.lane.b32.xlu1 %v784_v14, %s3791_s27  ;;  %857 = vrot.lane.b32.xlu0 %v785_v39, %s3791_s27 }
 0x254   :  { %859 = vrot.lane.b32.xlu1 %v789_v40, %s3791_s27  ;;  %880 = vrot.lane.b32.xlu0 %v783_v35, %s3792_s28 }
 0x258   :  { %882 = vrot.lane.b32.xlu1 %v784_v14, %s3792_s28  ;;  %884 = vrot.lane.b32.xlu0 %v785_v39, %s3792_s28 }
 0x25c   :  { %886 = vrot.lane.b32.xlu1 %v789_v40, %s3792_s28  ;;  %905 = vrot.lane.b32.xlu0 %v783_v35, %s3793_s29 }
 0x260   :  { %907 = vrot.lane.b32.xlu1 %v784_v14, %s3793_s29  ;;  %909 = vrot.lane.b32.xlu0 %v785_v39, %s3793_s29 }
 0x264   :  { %911 = vrot.lane.b32.xlu1 %v789_v40, %s3793_s29  ;;  %932 = vrot.lane.b32.xlu0 %v783_v35, %s3794_s30 }
 0x268   :  { %934 = vrot.lane.b32.xlu1 %v784_v14, %s3794_s30  ;;  %936 = vrot.lane.b32.xlu0 %v785_v39, %s3794_s30 }
 0x26c   :  { %938 = vrot.lane.b32.xlu1 %v789_v40, %s3794_s30  ;;  %957 = vrot.lane.b32.xlu0 %v3839_v7, %s3799_s8 }
 0x270   :  { %959 = vrot.lane.b32.xlu1 %v3850_v10, %s3799_s8  ;;  %961 = vrot.lane.b32.xlu0 %v3844_v9, %s3799_s8  ;;  %v4203_v10 = vcombine.high %v4196_v52, %v4196_v52 }
 0x272   :  { %3496 = vst.sshfl [vmem:[#allocation2 + $0x18] sm:$0xf pattern:$0x76325410] %v4203_v10 }
 0x274   :  { %963 = vrot.lane.b32.xlu1 %v3858_v11, %s3799_s8 }
 0x2ae   :  { %v802_v48 = vpop.permute.xlu0 %801 }
 0x2b2   :  { %v804_v51 = vpop.permute.xlu1 %803  ;;  %v806_v55 = vpop.permute.xlu0 %805 }
 0x2b3   :  { %v809_v19 = vsel %vm61_vm0, %v802_v48, %v804_v51  ;;  %v810_v7 = vsel %vm61_vm0, %v804_v51, %v806_v55 }
 0x2b4   :  { %v3455_v56 = vcombine.low %v809_v19, %v810_v7 }
 0x2b6   :  { %v808_v57 = vpop.permute.xlu1 %807  ;;  %v822_v58 = vrot.slane %v3455_v56, 6  ;;  %v829_v18 = vpop.permute.xlu0 %828 }
 0x2b7   :  { %v811_v9 = vsel %vm61_vm0, %v806_v55, %v808_v57  ;;  %v814_v11 = vsel %vm61_vm0, %v808_v57, %v802_v48 }
 0x2b8   :  { %v3456_v59 = vcombine.low %v811_v9, %v814_v11  ;;  %826 = vst [vmem:[#allocation2 + $0x1c0] sm:$0xcc] %v822_v58 }
 0x2ba   :  { %v823_v60 = vrot.slane %v3456_v59, 6  ;;  %v831_v61 = vpop.permute.xlu1 %830  ;;  %v833_v62 = vpop.permute.xlu0 %832 }
 0x2bb   :  { %v836_v63 = vsel %vm90_vm1, %v829_v18, %v831_v61  ;;  %v837_v0 = vsel %vm90_vm1, %v831_v61, %v833_v62 }
 0x2bc   :  { %827 = vst [vmem:[#allocation2 + $0x1c8] sm:$0xcc] %v823_v60  ;;  %v3457_v1 = vcombine.low %v836_v63, %v837_v0 }
 0x2be   :  { %v835_v2 = vpop.permute.xlu1 %834  ;;  %851 = vst [vmem:[#allocation2 + $0x1e0] sm:$0x33] %v3457_v1  ;;  %v854_v21 = vpop.permute.xlu0 %853 }
 0x2bf   :  { %v838_v3 = vsel %vm90_vm1, %v833_v62, %v835_v2  ;;  %v841_v4 = vsel %vm90_vm1, %v835_v2, %v829_v18  ;;  %v2614_v38 = vld [vmem:[#allocation2 + $0x1c0] sm:$0xff] }
 0x2c0   :  { %v3458_v8 = vcombine.low %v838_v3, %v841_v4 }
 0x2c2   :  { %852 = vst [vmem:[#allocation2 + $0x1e8] sm:$0x33] %v3458_v8  ;;  %v856_v22 = vpop.permute.xlu1 %855  ;;  %v858_v6 = vpop.permute.xlu0 %857 }
 0x2c3   :  { %v861_v23 = vsel %vm117_vm2, %v854_v21, %v856_v22  ;;  %v862_v13 = vsel %vm117_vm2, %v856_v22, %v858_v6  ;;  %v2615_v17 = vld [vmem:[#allocation2 + $0x1c8] sm:$0xff] }
 0x2c4   :  { %v3459_v20 = vcombine.low %v861_v23, %v862_v13 }
 0x2c6   :  { %v860_v24 = vpop.permute.xlu1 %859  ;;  %v874_v12 = vrot.slane %v3459_v20, 6  ;;  %v881_v28 = vpop.permute.xlu0 %880 }
 0x2c7   :  { %v863_v25 = vsel %vm117_vm2, %v858_v6, %v860_v24  ;;  %v866_v26 = vsel %vm117_vm2, %v860_v24, %v854_v21 }
 0x2c8   :  { %v3460_v27 = vcombine.low %v863_v25, %v866_v26  ;;  %878 = vst [vmem:[#allocation2 + $0x1e0] sm:$0xcc] %v874_v12 }
 0x2ca   :  { %v875_v29 = vrot.slane %v3460_v27, 6  ;;  %v883_v30 = vpop.permute.xlu1 %882  ;;  %v885_v31 = vpop.permute.xlu0 %884 }
 0x2cb   :  { %v888_v15 = vsel %vm146_vm3, %v881_v28, %v883_v30  ;;  %v889_v32 = vsel %vm146_vm3, %v883_v30, %v885_v31 }
 0x2cc   :  { %879 = vst [vmem:[#allocation2 + $0x1e8] sm:$0xcc] %v875_v29  ;;  %v3461_v33 = vcombine.low %v888_v15, %v889_v32  ;;  %v4288_v15 = vrot.slane %v4196_v52, %v3836_v5 }
 0x2ce   :  { %v887_v34 = vpop.permute.xlu1 %886  ;;  %903 = vst [vmem:[#allocation2 + $0x200] sm:$0x33] %v3461_v33  ;;  %v906_v37 = vpop.permute.xlu0 %905  ;;  %v4296_v32 = vcombine.high %v4288_v15, %v4288_v15  ;;  %v4300_v33 = vrot.slane %v4203_v10, %v3836_v5 }
 0x2cf   :  { %v890_v35 = vsel %vm146_vm3, %v885_v31, %v887_v34  ;;  %v893_v36 = vsel %vm146_vm3, %v887_v34, %v881_v28  ;;  %v2618_v39 = vld [vmem:[#allocation2 + $0x1e0] sm:$0xff] }
 0x2d0   :  { %v3462_v14 = vcombine.low %v890_v35, %v893_v36  ;;  %v3652_v41 = vcombine.high %v2614_v38, %v2618_v39  ;;  %v3651_v42 = vcombine.low %v2614_v38, %v2618_v39  ;;  %v4308_v52 = vcombine.high %v4300_v33, %v4300_v33 }
 0x2d2   :  { %904 = vst [vmem:[#allocation2 + $0x208] sm:$0x33] %v3462_v14  ;;  %v908_v40 = vpop.permute.xlu1 %907  ;;  %v910_v44 = vpop.permute.xlu0 %909  ;;  %3213 = vmatprep.subr.bf16.mxu0 %v3652_v41 }
 0x2d3   :  { %v2619_v43 = vld [vmem:[#allocation2 + $0x1e8] sm:$0xff]  ;;  %v913_v16 = vsel %vm173_vm4, %v906_v37, %v908_v40  ;;  %v914_v47 = vsel %vm173_vm4, %v908_v40, %v910_v44  ;;  %3214 = vmatpush1.bf16.msra.mxu0 %v3651_v42 }
 0x2d4   :  { %v3654_v45 = vcombine.high %v2615_v17, %v2619_v43  ;;  %v3653_v46 = vcombine.low %v2615_v17, %v2619_v43  ;;  %v3463_v48 = vcombine.low %v913_v16, %v914_v47 }
 0x2d6   :  { %3254 = vmatprep.subr.bf16.mxu1 %v3654_v45  ;;  %v912_v51 = vpop.permute.xlu1 %911  ;;  %v926_v7 = vrot.slane %v3463_v48, 6  ;;  %v933_v57 = vpop.permute.xlu0 %932 }
 0x2d7   :  { %v915_v55 = vsel %vm173_vm4, %v910_v44, %v912_v51  ;;  %v918_v19 = vsel %vm173_vm4, %v912_v51, %v906_v37  ;;  %3255 = vmatpush1.bf16.msra.mxu1 %v3653_v46 }
 0x2d8   :  { %v3464_v56 = vcombine.low %v915_v55, %v918_v19  ;;  %930 = vst [vmem:[#allocation2 + $0x200] sm:$0xcc] %v926_v7 }
 0x2da   :  { %v927_v9 = vrot.slane %v3464_v56, 6  ;;  %v935_v11 = vpop.permute.xlu1 %934  ;;  %v937_v58 = vpop.permute.xlu0 %936 }
 0x2db   :  { %v940_v59 = vsel %vm202_vm5, %v933_v57, %v935_v11  ;;  %v941_v18 = vsel %vm202_vm5, %v935_v11, %v937_v58 }
 0x2dc   :  { %931 = vst [vmem:[#allocation2 + $0x208] sm:$0xcc] %v927_v9  ;;  %v3465_v60 = vcombine.low %v940_v59, %v941_v18 }
 0x2de   :  { %v939_v61 = vpop.permute.xlu1 %938  ;;  %955 = vst [vmem:[#allocation2 + $0x220] sm:$0x33] %v3465_v60  ;;  %v958_v1 = vpop.permute.xlu0 %957 }
 0x2df   :  { %v942_v62 = vsel %vm202_vm5, %v937_v58, %v939_v61  ;;  %v945_v63 = vsel %vm202_vm5, %v939_v61, %v933_v57  ;;  %v2622_v25 = vld [vmem:[#allocation2 + $0x200] sm:$0xff] }
 0x2e0   :  { %v3466_v0 = vcombine.low %v942_v62, %v945_v63 }
 0x2e2   :  { %956 = vst [vmem:[#allocation2 + $0x228] sm:$0x33] %v3466_v0  ;;  %v960_v2 = vpop.permute.xlu1 %959  ;;  %v962_v4 = vpop.permute.xlu0 %961 }
 0x2e3   :  { %v966_v3 = vsel %vm965_vm10, %v958_v1, %v960_v2  ;;  %v967_v8 = vsel %vm965_vm10, %v960_v2, %v962_v4  ;;  %v2623_v28 = vld [vmem:[#allocation2 + $0x208] sm:$0xff] }
 0x2e4   :  { %986 = vrot.lane.b32.xlu0 %v966_v3, %s3789_s26  ;;  %v3467_v21 = vcombine.low %v966_v3, %v967_v8  ;;  %988 = vrot.lane.b32.xlu1 %v967_v8, %s3789_s26 }
 0x2e6   :  { %v964_v22 = vpop.permute.xlu1 %963  ;;  %v980_v13 = vrot.slane %v3467_v21, 6 }
 0x2e7   :  { %v968_v6 = vsel %vm965_vm10, %v962_v4, %v964_v22  ;;  %v972_v23 = vsel %vm965_vm10, %v964_v22, %v958_v1 }
 0x2e8   :  { %v3468_v20 = vcombine.low %v968_v6, %v972_v23  ;;  %990 = vrot.lane.b32.xlu0 %v968_v6, %s3789_s26  ;;  %984 = vst [vmem:[#allocation2 + $0x220] sm:$0xcc] %v980_v13  ;;  %992 = vrot.lane.b32.xlu1 %v972_v23, %s3789_s26 }
 0x2ea   :  { %v981_v24 = vrot.slane %v3468_v20, 6 }
 0x2ec   :  { %985 = vst [vmem:[#allocation2 + $0x228] sm:$0xcc] %v981_v24  ;;  %1011 = vrot.lane.b32.xlu0 %v966_v3, %s3790_s0  ;;  %1013 = vrot.lane.b32.xlu1 %v967_v8, %s3790_s0 }
 0x2ef   :  { %v2626_v26 = vld [vmem:[#allocation2 + $0x220] sm:$0xff] }
 0x2f0   :  { %1015 = vrot.lane.b32.xlu0 %v968_v6, %s3790_s0  ;;  %1017 = vrot.lane.b32.xlu1 %v972_v23, %s3790_s0  ;;  %v3660_v12 = vcombine.high %v2622_v25, %v2626_v26  ;;  %v3659_v27 = vcombine.low %v2622_v25, %v2626_v26 }
 0x2f2   :  { %3215 = vmatprep.subr.bf16.mxu0 %v3660_v12 }
 0x2f3   :  { %v2627_v29 = vld [vmem:[#allocation2 + $0x228] sm:$0xff]  ;;  %3216 = vmatpush1.bf16.msra.mxu0 %v3659_v27 }
 0x2f4   :  { %1038 = vrot.lane.b32.xlu0 %v966_v3, %s3791_s27  ;;  %v3662_v30 = vcombine.high %v2623_v28, %v2627_v29  ;;  %v3661_v31 = vcombine.low %v2623_v28, %v2627_v29  ;;  %1040 = vrot.lane.b32.xlu1 %v967_v8, %s3791_s27 }
 0x2f6   :  { %3256 = vmatprep.subr.bf16.mxu1 %v3662_v30 }
 0x2f7   :  { %3257 = vmatpush1.bf16.msra.mxu1 %v3661_v31 }
 0x2f8   :  { %1042 = vrot.lane.b32.xlu0 %v968_v6, %s3791_s27  ;;  %1044 = vrot.lane.b32.xlu1 %v972_v23, %s3791_s27 }
 0x2fc   :  { %1063 = vrot.lane.b32.xlu0 %v966_v3, %s3792_s28  ;;  %1065 = vrot.lane.b32.xlu1 %v967_v8, %s3792_s28 }
 0x300   :  { %1067 = vrot.lane.b32.xlu0 %v968_v6, %s3792_s28  ;;  %1069 = vrot.lane.b32.xlu1 %v972_v23, %s3792_s28 }
 0x304   :  { %1090 = vrot.lane.b32.xlu0 %v966_v3, %s3793_s29  ;;  %1092 = vrot.lane.b32.xlu1 %v967_v8, %s3793_s29 }
 0x308   :  { %1094 = vrot.lane.b32.xlu0 %v968_v6, %s3793_s29  ;;  %1096 = vrot.lane.b32.xlu1 %v972_v23, %s3793_s29 }
 0x30c   :  { %1115 = vrot.lane.b32.xlu0 %v966_v3, %s3794_s30  ;;  %1117 = vrot.lane.b32.xlu1 %v967_v8, %s3794_s30 }
 0x310   :  { %1119 = vrot.lane.b32.xlu0 %v968_v6, %s3794_s30  ;;  %1121 = vrot.lane.b32.xlu1 %v972_v23, %s3794_s30 }
 0x314   :  { %1148 = vrot.lane.b32.xlu0 %v3932_v50, %s3789_s26  ;;  %1150 = vrot.lane.b32.xlu1 %v3937_v53, %s3789_s26 }
 0x318   :  { %1152 = vrot.lane.b32.xlu0 %v3940_v54, %s3789_s26  ;;  %1154 = vrot.lane.b32.xlu1 %v3929_v49, %s3789_s26 }
 0x31c   :  { %1175 = vrot.lane.b32.xlu0 %v3932_v50, %s3790_s0  ;;  %1177 = vrot.lane.b32.xlu1 %v3937_v53, %s3790_s0 }
 0x320   :  { %1179 = vrot.lane.b32.xlu0 %v3940_v54, %s3790_s0  ;;  %1181 = vrot.lane.b32.xlu1 %v3929_v49, %s3790_s0 }
 0x324   :  { %1200 = vrot.lane.b32.xlu0 %v3932_v50, %s3791_s27  ;;  %1202 = vrot.lane.b32.xlu1 %v3937_v53, %s3791_s27 }
 0x328   :  { %1204 = vrot.lane.b32.xlu0 %v3940_v54, %s3791_s27  ;;  %1206 = vrot.lane.b32.xlu1 %v3929_v49, %s3791_s27 }
 0x32c   :  { %1227 = vrot.lane.b32.xlu0 %v3932_v50, %s3792_s28  ;;  %1229 = vrot.lane.b32.xlu1 %v3937_v53, %s3792_s28 }
 0x330   :  { %1231 = vrot.lane.b32.xlu0 %v3940_v54, %s3792_s28  ;;  %1233 = vrot.lane.b32.xlu1 %v3929_v49, %s3792_s28 }
 0x334   :  { %1252 = vrot.lane.b32.xlu0 %v3932_v50, %s3793_s29  ;;  %1484 = vrot.lane.b32.xlu1 %v4288_v15, %s3795_s4 }
 0x338   :  { %1486 = vrot.lane.b32.xlu0 %v4296_v32, %s3795_s4  ;;  %1488 = vrot.lane.b32.xlu1 %v4300_v33, %s3795_s4 }
 0x33c   :  { %1490 = vrot.lane.b32.xlu0 %v4308_v52, %s3795_s4  ;;  %1667 = vrot.lane.b32.xlu1 %v4288_v15, %s3796_s5 }
 0x340   :  { %1669 = vrot.lane.b32.xlu0 %v4296_v32, %s3796_s5  ;;  %1671 = vrot.lane.b32.xlu1 %v4300_v33, %s3796_s5 }
 0x344   :  { %1673 = vrot.lane.b32.xlu0 %v4308_v52, %s3796_s5  ;;  %1848 = vrot.lane.b32.xlu1 %v4288_v15, %s3797_s6 }
 0x348   :  { %1850 = vrot.lane.b32.xlu0 %v4296_v32, %s3797_s6  ;;  %1852 = vrot.lane.b32.xlu1 %v4300_v33, %s3797_s6 }
 0x34c   :  { %1854 = vrot.lane.b32.xlu0 %v4308_v52, %s3797_s6  ;;  %2031 = vrot.lane.b32.xlu1 %v4288_v15, %s3798_s7 }
 0x350   :  { %2033 = vrot.lane.b32.xlu0 %v4296_v32, %s3798_s7  ;;  %2035 = vrot.lane.b32.xlu1 %v4300_v33, %s3798_s7 }
 0x354   :  { %2037 = vrot.lane.b32.xlu0 %v4308_v52, %s3798_s7  ;;  %2212 = vrot.lane.b32.xlu1 %v4288_v15, %s3799_s8 }
 0x356   :  { %v987_v5 = vpop.permute.xlu0 %986  ;;  %v989_v10 = vpop.permute.xlu1 %988 }
 0x357   :  { %v994_v35 = vsel %vm61_vm0, %v987_v5, %v989_v10 }
 0x358   :  { %2214 = vrot.lane.b32.xlu0 %v4296_v32, %s3799_s8  ;;  %2216 = vrot.lane.b32.xlu1 %v4300_v33, %s3799_s8 }
 0x35a   :  { %v991_v34 = vpop.permute.xlu0 %990  ;;  %v993_v37 = vpop.permute.xlu1 %992 }
 0x35b   :  { %v995_v36 = vsel %vm61_vm0, %v989_v10, %v991_v34  ;;  %v996_v38 = vsel %vm61_vm0, %v991_v34, %v993_v37  ;;  %v999_v39 = vsel %vm61_vm0, %v993_v37, %v987_v5 }
 0x35c   :  { %v3469_v14 = vcombine.low %v994_v35, %v995_v36  ;;  %2218 = vrot.lane.b32.xlu0 %v4308_v52, %s3799_s8  ;;  %v3470_v40 = vcombine.low %v996_v38, %v999_v39  ;;  %1407 = vrot.lane.b32.xlu1 %v4288_v15, %s3792_s28 }
 0x35e   :  { %1009 = vst [vmem:[#allocation2 + $0x240] sm:$0x33] %v3469_v14  ;;  %v1012_v41 = vpop.permute.xlu0 %1011  ;;  %1010 = vst [vmem:[#allocation2 + $0x248] sm:$0x33] %v3470_v40  ;;  %v1014_v42 = vpop.permute.xlu1 %1013 }
 0x35f   :  { %v1019_v43 = vsel %vm90_vm1, %v1012_v41, %v1014_v42 }
 0x360   :  { %1409 = vrot.lane.b32.xlu0 %v4296_v32, %s3792_s28  ;;  %1411 = vrot.lane.b32.xlu1 %v4300_v33, %s3792_s28 }
 0x362   :  { %v1016_v17 = vpop.permute.xlu0 %1015  ;;  %v1018_v46 = vpop.permute.xlu1 %1017 }
 0x363   :  { %v1020_v44 = vsel %vm90_vm1, %v1014_v42, %v1016_v17  ;;  %v1021_v16 = vsel %vm90_vm1, %v1016_v17, %v1018_v46  ;;  %v1024_v47 = vsel %vm90_vm1, %v1018_v46, %v1012_v41  ;;  %v4413_v42 = vld [vmem:[%s5073_s1] sm:$0xff] }
 0x364   :  { %v3471_v45 = vcombine.low %v1019_v43, %v1020_v44  ;;  %1413 = vrot.lane.b32.xlu0 %v4308_v52, %s3792_s28  ;;  %v3472_v51 = vcombine.low %v1021_v16, %v1024_v47  ;;  %1254 = vrot.lane.b32.xlu1 %v3937_v53, %s3793_s29 }
 0x366   :  { %v1032_v48 = vrot.slane %v3471_v45, 6  ;;  %v1039_v55 = vpop.permute.xlu0 %1038  ;;  %v1033_v19 = vrot.slane %v3472_v51, 6  ;;  %v1041_v7 = vpop.permute.xlu1 %1040  ;;  %v4419_v45 = vcombine.high %v4413_v42, %v4413_v42 }
 0x367   :  { %v1046_v57 = vsel %vm117_vm2, %v1039_v55, %v1041_v7 }
 0x368   :  { %1036 = vst [vmem:[#allocation2 + $0x240] sm:$0xcc] %v1032_v48  ;;  %1256 = vrot.lane.b32.xlu0 %v3940_v54, %s3793_s29  ;;  %1037 = vst [vmem:[#allocation2 + $0x248] sm:$0xcc] %v1033_v19  ;;  %1258 = vrot.lane.b32.xlu1 %v3929_v49, %s3793_s29 }
 0x369   :  { %3700 = vmatprep.mubr.msk.bf16.mxu0 %vm3170_vm11, %v4419_v45  ;;  %3702 = vmatprep.mubr.msk.bf16.mxu1 %vm3170_vm11, %v4419_v45 }
 0x36a   :  { %v1043_v56 = vpop.permute.xlu0 %1042  ;;  %v1045_v58 = vpop.permute.xlu1 %1044 }
 0x36b   :  { %v1047_v9 = vsel %vm117_vm2, %v1041_v7, %v1043_v56  ;;  %v1048_v59 = vsel %vm117_vm2, %v1043_v56, %v1045_v58  ;;  %v1051_v18 = vsel %vm117_vm2, %v1045_v58, %v1039_v55 }
 0x36c   :  { %v3473_v11 = vcombine.low %v1046_v57, %v1047_v9  ;;  %1279 = vrot.lane.b32.xlu0 %v3932_v50, %s3794_s30  ;;  %v3474_v60 = vcombine.low %v1048_v59, %v1051_v18  ;;  %1281 = vrot.lane.b32.xlu1 %v3937_v53, %s3794_s30 }
 0x36e   :  { %1061 = vst [vmem:[#allocation2 + $0x260] sm:$0x33] %v3473_v11  ;;  %v1064_v61 = vpop.permute.xlu0 %1063  ;;  %1062 = vst [vmem:[#allocation2 + $0x268] sm:$0x33] %v3474_v60  ;;  %v1066_v62 = vpop.permute.xlu1 %1065 }
 0x36f   :  { %v1071_v63 = vsel %vm146_vm3, %v1064_v61, %v1066_v62  ;;  %v2630_v27 = vld [vmem:[#allocation2 + $0x240] sm:$0xff]  ;;  %v2631_v5 = vld [vmem:[#allocation2 + $0x248] sm:$0xff] }
 0x370   :  { %1283 = vrot.lane.b32.xlu0 %v3940_v54, %s3794_s30  ;;  %1285 = vrot.lane.b32.xlu1 %v3929_v49, %s3794_s30 }
 0x372   :  { %v1068_v50 = vpop.permute.xlu0 %1067  ;;  %v1070_v2 = vpop.permute.xlu1 %1069 }
 0x373   :  { %v1072_v0 = vsel %vm146_vm3, %v1066_v62, %v1068_v50  ;;  %v1073_v53 = vsel %vm146_vm3, %v1068_v50, %v1070_v2  ;;  %v1076_v3 = vsel %vm146_vm3, %v1070_v2, %v1064_v61 }
 0x374   :  { %v3475_v1 = vcombine.low %v1071_v63, %v1072_v0  ;;  %1328 = vrot.lane.b32.xlu0 %v4288_v15, %s3789_s26  ;;  %v3476_v54 = vcombine.low %v1073_v53, %v1076_v3  ;;  %1330 = vrot.lane.b32.xlu1 %v4296_v32, %s3789_s26 }
 0x376   :  { %v1084_v4 = vrot.slane %v3475_v1, 6  ;;  %v1091_v49 = vpop.permute.xlu0 %1090  ;;  %v1085_v8 = vrot.slane %v3476_v54, 6  ;;  %v1093_v21 = vpop.permute.xlu1 %1092 }
 0x377   :  { %v1098_v6 = vsel %vm173_vm4, %v1091_v49, %v1093_v21 }
 0x378   :  { %1088 = vst [vmem:[#allocation2 + $0x260] sm:$0xcc] %v1084_v4  ;;  %1332 = vrot.lane.b32.xlu0 %v4300_v33, %s3789_s26  ;;  %1089 = vst [vmem:[#allocation2 + $0x268] sm:$0xcc] %v1085_v8  ;;  %1334 = vrot.lane.b32.xlu1 %v4308_v52, %s3789_s26 }
 0x37a   :  { %v1095_v22 = vpop.permute.xlu0 %1094  ;;  %v1097_v20 = vpop.permute.xlu1 %1096 }
 0x37b   :  { %v1099_v23 = vsel %vm173_vm4, %v1093_v21, %v1095_v22  ;;  %v1100_v24 = vsel %vm173_vm4, %v1095_v22, %v1097_v20  ;;  %v1103_v25 = vsel %vm173_vm4, %v1097_v20, %v1091_v49 }
 0x37c   :  { %v3477_v13 = vcombine.low %v1098_v6, %v1099_v23  ;;  %1380 = vrot.lane.b32.xlu0 %v4288_v15, %s3791_s27  ;;  %v3478_v26 = vcombine.low %v1100_v24, %v1103_v25  ;;  %1382 = vrot.lane.b32.xlu1 %v4296_v32, %s3791_s27 }
 0x37e   :  { %1113 = vst [vmem:[#allocation2 + $0x280] sm:$0x33] %v3477_v13  ;;  %v1116_v12 = vpop.permute.xlu0 %1115  ;;  %1114 = vst [vmem:[#allocation2 + $0x288] sm:$0x33] %v3478_v26  ;;  %v1118_v29 = vpop.permute.xlu1 %1117 }
 0x37f   :  { %v2634_v28 = vld [vmem:[#allocation2 + $0x260] sm:$0xff]  ;;  %v2635_v10 = vld [vmem:[#allocation2 + $0x268] sm:$0xff]  ;;  %v1123_v14 = vsel %vm202_vm5, %v1116_v12, %v1118_v29 }
 0x380   :  { %1384 = vrot.lane.b32.xlu0 %v4300_v33, %s3791_s27  ;;  %v3668_v30 = vcombine.high %v2630_v27, %v2634_v28  ;;  %v3667_v31 = vcombine.low %v2630_v27, %v2634_v28  ;;  %1386 = vrot.lane.b32.xlu1 %v4308_v52, %s3791_s27  ;;  %v3670_v35 = vcombine.high %v2631_v5, %v2635_v10 }
 0x381   :  { %v3669_v36 = vcombine.low %v2631_v5, %v2635_v10 }
 0x382   :  { %v1120_v34 = vpop.permute.xlu0 %1119  ;;  %3217 = vmatprep.subr.bf16.mxu0 %v3668_v30  ;;  %3258 = vmatprep.subr.bf16.mxu1 %v3670_v35  ;;  %v1122_v39 = vpop.permute.xlu1 %1121 }
 0x383   :  { %v1124_v37 = vsel %vm202_vm5, %v1118_v29, %v1120_v34  ;;  %3218 = vmatpush1.bf16.msra.mxu0 %v3667_v31  ;;  %v1125_v40 = vsel %vm202_vm5, %v1120_v34, %v1122_v39  ;;  %v1128_v41 = vsel %vm202_vm5, %v1122_v39, %v1116_v12  ;;  %3259 = vmatpush1.bf16.msra.mxu1 %v3669_v36 }
 0x384   :  { %v3479_v38 = vcombine.low %v1123_v14, %v1124_v37  ;;  %1355 = vrot.lane.b32.xlu0 %v4288_v15, %s3790_s0  ;;  %v3480_v43 = vcombine.low %v1125_v40, %v1128_v41  ;;  %1357 = vrot.lane.b32.xlu1 %v4296_v32, %s3790_s0 }
 0x386   :  { %v1136_v17 = vrot.slane %v3479_v38, 6  ;;  %v1149_v44 = vpop.permute.xlu0 %1148  ;;  %v1137_v46 = vrot.slane %v3480_v43, 6  ;;  %v1151_v16 = vpop.permute.xlu1 %1150 }
 0x387   :  { %v1156_v48 = vsel %vm61_vm0, %v1149_v44, %v1151_v16 }
 0x388   :  { %1140 = vst [vmem:[#allocation2 + $0x280] sm:$0xcc] %v1136_v17  ;;  %1359 = vrot.lane.b32.xlu0 %v4300_v33, %s3790_s0  ;;  %1141 = vst [vmem:[#allocation2 + $0x288] sm:$0xcc] %v1137_v46  ;;  %1361 = vrot.lane.b32.xlu1 %v4308_v52, %s3790_s0 }
 0x38a   :  { %v1153_v47 = vpop.permute.xlu0 %1152  ;;  %v1155_v19 = vpop.permute.xlu1 %1154 }
 0x38b   :  { %v1157_v51 = vsel %vm61_vm0, %v1151_v16, %v1153_v47  ;;  %v1158_v7 = vsel %vm61_vm0, %v1153_v47, %v1155_v19  ;;  %v1161_v56 = vsel %vm61_vm0, %v1155_v19, %v1149_v44 }
 0x38c   :  { %v3483_v55 = vcombine.low %v1156_v48, %v1157_v51  ;;  %1432 = vrot.lane.b32.xlu0 %v4288_v15, %s3793_s29  ;;  %v3484_v9 = vcombine.low %v1158_v7, %v1161_v56  ;;  %1434 = vrot.lane.b32.xlu1 %v4296_v32, %s3793_s29 }
 0x38e   :  { %v1169_v57 = vrot.slane %v3483_v55, 6  ;;  %v1176_v11 = vpop.permute.xlu0 %1175  ;;  %v1170_v58 = vrot.slane %v3484_v9, 6  ;;  %v1178_v59 = vpop.permute.xlu1 %1177 }
 0x38f   :  { %v1183_v60 = vsel %vm90_vm1, %v1176_v11, %v1178_v59  ;;  %v2638_v53 = vld [vmem:[#allocation2 + $0x280] sm:$0xff]  ;;  %v2639_v49 = vld [vmem:[#allocation2 + $0x288] sm:$0xff] }
 0x390   :  { %1173 = vst [vmem:[#allocation2 + $0x2a0] sm:$0xcc] %v1169_v57  ;;  %1436 = vrot.lane.b32.xlu0 %v4300_v33, %s3793_s29  ;;  %1174 = vst [vmem:[#allocation2 + $0x2a8] sm:$0xcc] %v1170_v58  ;;  %1438 = vrot.lane.b32.xlu1 %v4308_v52, %s3793_s29 }
 0x392   :  { %v1180_v18 = vpop.permute.xlu0 %1179  ;;  %v1182_v50 = vpop.permute.xlu1 %1181 }
 0x393   :  { %v1184_v61 = vsel %vm90_vm1, %v1178_v59, %v1180_v18  ;;  %v1185_v63 = vsel %vm90_vm1, %v1180_v18, %v1182_v50  ;;  %v1188_v0 = vsel %vm90_vm1, %v1182_v50, %v1176_v11 }
 0x394   :  { %v3485_v62 = vcombine.low %v1183_v60, %v1184_v61  ;;  %1459 = vrot.lane.b32.xlu0 %v4288_v15, %s3794_s30  ;;  %v3486_v1 = vcombine.low %v1185_v63, %v1188_v0  ;;  %1461 = vrot.lane.b32.xlu1 %v4296_v32, %s3794_s30 }
 0x396   :  { %1198 = vst [vmem:[#allocation2 + $0x2c0] sm:$0x33] %v3485_v62  ;;  %v1201_v2 = vpop.permute.xlu0 %1200  ;;  %1199 = vst [vmem:[#allocation2 + $0x2c8] sm:$0x33] %v3486_v1  ;;  %v1203_v4 = vpop.permute.xlu1 %1202 }
 0x397   :  { %v2642_v3 = vld [vmem:[#allocation2 + $0x2a0] sm:$0xff]  ;;  %v2643_v8 = vld [vmem:[#allocation2 + $0x2a8] sm:$0xff]  ;;  %v1208_v32 = vsel %vm117_vm2, %v1201_v2, %v1203_v4 }
 0x398   :  { %1463 = vrot.lane.b32.xlu0 %v4300_v33, %s3794_s30  ;;  %v3676_v54 = vcombine.high %v2638_v53, %v2642_v3  ;;  %v3675_v15 = vcombine.low %v2638_v53, %v2642_v3  ;;  %1465 = vrot.lane.b32.xlu1 %v4308_v52, %s3794_s30  ;;  %v3678_v22 = vcombine.high %v2639_v49, %v2643_v8 }
 0x399   :  { %v3677_v6 = vcombine.low %v2639_v49, %v2643_v8 }
 0x39a   :  { %v1205_v21 = vpop.permute.xlu0 %1204  ;;  %3219 = vmatprep.subr.bf16.mxu0 %v3676_v54  ;;  %3260 = vmatprep.subr.bf16.mxu1 %v3678_v22  ;;  %v1207_v33 = vpop.permute.xlu1 %1206 }
 0x39b   :  { %v1209_v23 = vsel %vm117_vm2, %v1203_v4, %v1205_v21  ;;  %3220 = vmatpush1.bf16.msra.mxu0 %v3675_v15  ;;  %v1210_v20 = vsel %vm117_vm2, %v1205_v21, %v1207_v33  ;;  %v1213_v24 = vsel %vm117_vm2, %v1207_v33, %v1201_v2  ;;  %3261 = vmatpush1.bf16.msra.mxu1 %v3677_v6 }
 0x39c   :  { %v3487_v13 = vcombine.low %v1208_v32, %v1209_v23  ;;  %v3488_v26 = vcombine.low %v1210_v20, %v1213_v24 }
 0x39e   :  { %v1221_v25 = vrot.slane %v3487_v13, 6  ;;  %v1228_v52 = vpop.permute.xlu0 %1227  ;;  %v1222_v12 = vrot.slane %v3488_v26, 6  ;;  %v1230_v27 = vpop.permute.xlu1 %1229 }
 0x39f   :  { %v1235_v29 = vsel %vm146_vm3, %v1228_v52, %v1230_v27 }
 0x3a0   :  { %1225 = vst [vmem:[#allocation2 + $0x2c0] sm:$0xcc] %v1221_v25  ;;  %1226 = vst [vmem:[#allocation2 + $0x2c8] sm:$0xcc] %v1222_v12 }
 0x3a2   :  { %v1232_v28 = vpop.permute.xlu0 %1231  ;;  %v1234_v5 = vpop.permute.xlu1 %1233 }
 0x3a3   :  { %v1236_v30 = vsel %vm146_vm3, %v1230_v27, %v1232_v28  ;;  %v1237_v10 = vsel %vm146_vm3, %v1232_v28, %v1234_v5  ;;  %v1240_v34 = vsel %vm146_vm3, %v1234_v5, %v1228_v52 }
 0x3a4   :  { %v3489_v31 = vcombine.low %v1235_v29, %v1236_v30  ;;  %v3490_v35 = vcombine.low %v1237_v10, %v1240_v34 }
 0x3a6   :  { %1250 = vst [vmem:[#allocation2 + $0x2e0] sm:$0x33] %v3489_v31  ;;  %v4461_v36 = vpop.permute.xlu0 %1252  ;;  %1251 = vst [vmem:[#allocation2 + $0x2e8] sm:$0x33] %v3490_v35  ;;  %v1485_v14 = vpop.permute.xlu1 %1484 }
 0x3aa   :  { %v1487_v37 = vpop.permute.xlu0 %1486  ;;  %v1489_v39 = vpop.permute.xlu1 %1488 }
 0x3ab   :  { %v4464_v38 = vsel %vm229_vm6, %v1485_v14, %v1487_v37  ;;  %v4469_v40 = vsel %vm229_vm6, %v1487_v37, %v1489_v39 }
 0x3ac   :  { %1536 = vrot.lane.b32.xlu0 %v4464_v38, %s3790_s0  ;;  %v3509_v41 = vcombine.low %v4464_v38, %v4469_v40  ;;  %1538 = vrot.lane.b32.xlu1 %v4469_v40, %s3790_s0 }
 0x3ae   :  { %v1491_v17 = vpop.permute.xlu0 %1490  ;;  %v1505_v46 = vrot.slane %v3509_v41, 6  ;;  %v1668_v47 = vpop.permute.xlu1 %1667 }
 0x3af   :  { %v4476_v43 = vsel %vm229_vm6, %v1489_v39, %v1491_v17  ;;  %v4479_v44 = vsel %vm229_vm6, %v1491_v17, %v1485_v14 }
 0x3b0   :  { %v3510_v16 = vcombine.low %v4476_v43, %v4479_v44  ;;  %1540 = vrot.lane.b32.xlu0 %v4476_v43, %s3790_s0  ;;  %1509 = vst [vmem:[#allocation2 + $0x70] sm:$0xcc] %v1505_v46  ;;  %1542 = vrot.lane.b32.xlu1 %v4479_v44, %s3790_s0 }
 0x3b2   :  { %v1506_v48 = vrot.slane %v3510_v16, 6  ;;  %v1670_v51 = vpop.permute.xlu0 %1669  ;;  %v1672_v19 = vpop.permute.xlu1 %1671 }
 0x3b3   :  { %v4488_v55 = vsel %vm414_vm7, %v1668_v47, %v1670_v51  ;;  %v4493_v7 = vsel %vm414_vm7, %v1670_v51, %v1672_v19 }
 0x3b4   :  { %1510 = vst [vmem:[#allocation2 + $0x78] sm:$0xcc] %v1506_v48  ;;  %1588 = vrot.lane.b32.xlu0 %v4464_v38, %s3792_s28  ;;  %v3523_v56 = vcombine.low %v4488_v55, %v4493_v7  ;;  %1590 = vrot.lane.b32.xlu1 %v4469_v40, %s3792_s28 }
 0x3b6   :  { %v1674_v57 = vpop.permute.xlu0 %1673  ;;  %1690 = vst [vmem:[#allocation2 + $0xf0] sm:$0x33] %v3523_v56  ;;  %v1849_v59 = vpop.permute.xlu1 %1848 }
 0x3b7   :  { %v4500_v9 = vsel %vm414_vm7, %v1672_v19, %v1674_v57  ;;  %v4503_v11 = vsel %vm414_vm7, %v1674_v57, %v1668_v47 }
 0x3b8   :  { %v3524_v58 = vcombine.low %v4500_v9, %v4503_v11  ;;  %1592 = vrot.lane.b32.xlu0 %v4476_v43, %s3792_s28  ;;  %1594 = vrot.lane.b32.xlu1 %v4479_v44, %s3792_s28 }
 0x3ba   :  { %1691 = vst [vmem:[#allocation2 + $0xf8] sm:$0x33] %v3524_v58  ;;  %v1851_v18 = vpop.permute.xlu0 %1850  ;;  %v1853_v61 = vpop.permute.xlu1 %1852 }
 0x3bb   :  { %v4512_v60 = vsel %vm597_vm8, %v1849_v59, %v1851_v18  ;;  %v4517_v62 = vsel %vm597_vm8, %v1851_v18, %v1853_v61 }
 0x3bc   :  { %1511 = vrot.lane.b32.xlu0 %v4464_v38, %s3789_s26  ;;  %v3537_v50 = vcombine.low %v4512_v60, %v4517_v62  ;;  %1513 = vrot.lane.b32.xlu1 %v4469_v40, %s3789_s26 }
 0x3be   :  { %v1855_v63 = vpop.permute.xlu0 %1854  ;;  %v1869_v2 = vrot.slane %v3537_v50, 6  ;;  %v2032_v3 = vpop.permute.xlu1 %2031 }
 0x3bf   :  { %v4524_v0 = vsel %vm597_vm8, %v1853_v61, %v1855_v63  ;;  %v4527_v1 = vsel %vm597_vm8, %v1855_v63, %v1849_v59 }
 0x3c0   :  { %v3538_v53 = vcombine.low %v4524_v0, %v4527_v1  ;;  %1515 = vrot.lane.b32.xlu0 %v4476_v43, %s3789_s26  ;;  %1873 = vst [vmem:[#allocation2 + $0x150] sm:$0xcc] %v1869_v2  ;;  %1517 = vrot.lane.b32.xlu1 %v4479_v44, %s3789_s26 }
 0x3c2   :  { %v1870_v4 = vrot.slane %v3538_v53, 6  ;;  %v2034_v54 = vpop.permute.xlu0 %2033  ;;  %v2036_v49 = vpop.permute.xlu1 %2035 }
 0x3c3   :  { %v4536_v15 = vsel %vm782_vm9, %v2032_v3, %v2034_v54  ;;  %v4541_v8 = vsel %vm782_vm9, %v2034_v54, %v2036_v49 }
 0x3c4   :  { %1874 = vst [vmem:[#allocation2 + $0x158] sm:$0xcc] %v1870_v4  ;;  %1563 = vrot.lane.b32.xlu0 %v4464_v38, %s3791_s27  ;;  %v3551_v21 = vcombine.low %v4536_v15, %v4541_v8  ;;  %1565 = vrot.lane.b32.xlu1 %v4469_v40, %s3791_s27 }
 0x3c6   :  { %v2038_v22 = vpop.permute.xlu0 %2037  ;;  %2054 = vst [vmem:[#allocation2 + $0x1d0] sm:$0x33] %v3551_v21  ;;  %v2213_v13 = vpop.permute.xlu1 %2212 }
 0x3c7   :  { %v4548_v6 = vsel %vm782_vm9, %v2036_v49, %v2038_v22  ;;  %v4551_v32 = vsel %vm782_vm9, %v2038_v22, %v2032_v3 }
 0x3c8   :  { %v3552_v23 = vcombine.low %v4548_v6, %v4551_v32  ;;  %1567 = vrot.lane.b32.xlu0 %v4476_v43, %s3791_s27  ;;  %1569 = vrot.lane.b32.xlu1 %v4479_v44, %s3791_s27 }
 0x3ca   :  { %2055 = vst [vmem:[#allocation2 + $0x1d8] sm:$0x33] %v3552_v23  ;;  %v2215_v33 = vpop.permute.xlu0 %2214  ;;  %v2217_v24 = vpop.permute.xlu1 %2216 }
 0x3cb   :  { %v4560_v20 = vsel %vm965_vm10, %v2213_v13, %v2215_v33  ;;  %v4565_v25 = vsel %vm965_vm10, %v2215_v33, %v2217_v24 }
 0x3cc   :  { %1640 = vrot.lane.b32.xlu0 %v4464_v38, %s3794_s30  ;;  %v3565_v26 = vcombine.low %v4560_v20, %v4565_v25  ;;  %1642 = vrot.lane.b32.xlu1 %v4469_v40, %s3794_s30 }
 0x3ce   :  { %v2219_v52 = vpop.permute.xlu0 %2218  ;;  %v2233_v28 = vrot.slane %v3565_v26, 6  ;;  %v1408_v30 = vpop.permute.xlu1 %1407 }
 0x3cf   :  { %v4572_v12 = vsel %vm965_vm10, %v2217_v24, %v2219_v52  ;;  %v4575_v27 = vsel %vm965_vm10, %v2219_v52, %v2213_v13  ;;  %v2647_v24 = vld [vmem:[#allocation2 + $0x2c8] sm:$0xff] }
 0x3d0   :  { %v3566_v29 = vcombine.low %v4572_v12, %v4575_v27  ;;  %1644 = vrot.lane.b32.xlu0 %v4476_v43, %s3794_s30  ;;  %2237 = vst [vmem:[#allocation2 + $0x230] sm:$0xcc] %v2233_v28  ;;  %1646 = vrot.lane.b32.xlu1 %v4479_v44, %s3794_s30 }
 0x3d2   :  { %v2234_v31 = vrot.slane %v3566_v29, 6  ;;  %v1410_v5 = vpop.permute.xlu0 %1409  ;;  %v1412_v34 = vpop.permute.xlu1 %1411 }
 0x3d3   :  { %v4584_v10 = vsel %vm146_vm3, %v1408_v30, %v1410_v5  ;;  %v4589_v35 = vsel %vm146_vm3, %v1410_v5, %v1412_v34 }
 0x3d4   :  { %2238 = vst [vmem:[#allocation2 + $0x238] sm:$0xcc] %v2234_v31  ;;  %1692 = vrot.lane.b32.xlu0 %v4488_v55, %s3789_s26  ;;  %v3503_v14 = vcombine.low %v4584_v10, %v4589_v35  ;;  %1694 = vrot.lane.b32.xlu1 %v4493_v7, %s3789_s26 }
 0x3d6   :  { %v1414_v37 = vpop.permute.xlu0 %1413  ;;  %1430 = vst [vmem:[#allocation2 + $0x50] sm:$0x33] %v3503_v14  ;;  %v1255_v47 = vpop.permute.xlu1 %1254 }
 0x3d7   :  { %v4596_v39 = vsel %vm146_vm3, %v1412_v34, %v1414_v37  ;;  %v4599_v41 = vsel %vm146_vm3, %v1414_v37, %v1408_v30  ;;  %v1260_v51 = vsel %vm173_vm4, %v4461_v36, %v1255_v47 }
 0x3d8   :  { %v3504_v17 = vcombine.low %v4596_v39, %v4599_v41  ;;  %v3579_v46 = vcombine.low %v4589_v35, %v4596_v39  ;;  %v3580_v16 = vcombine.low %v4599_v41, %v4584_v10  ;;  %1696 = vrot.lane.b32.xlu0 %v4500_v9, %s3789_s26  ;;  %1698 = vrot.lane.b32.xlu1 %v4503_v11, %s3789_s26 }
 0x3da   :  { %1431 = vst [vmem:[#allocation2 + $0x58] sm:$0x33] %v3504_v17  ;;  %2399 = vst [vmem:[#allocation2 + $0x2b0] sm:$0x33] %v3579_v46  ;;  %v1257_v48 = vpop.permute.xlu0 %1256  ;;  %v1259_v57 = vpop.permute.xlu1 %1258 }
 0x3db   :  { %2400 = vst [vmem:[#allocation2 + $0x2b8] sm:$0x33] %v3580_v16  ;;  %v1261_v19 = vsel %vm173_vm4, %v1255_v47, %v1257_v48  ;;  %v1262_v58 = vsel %vm173_vm4, %v1257_v48, %v1259_v57  ;;  %v1265_v59 = vsel %vm173_vm4, %v1259_v57, %v4461_v36 }
 0x3dc   :  { %v3491_v56 = vcombine.low %v1260_v51, %v1261_v19  ;;  %1615 = vrot.lane.b32.xlu0 %v4464_v38, %s3793_s29  ;;  %v3492_v61 = vcombine.low %v1262_v58, %v1265_v59  ;;  %1617 = vrot.lane.b32.xlu1 %v4469_v40, %s3793_s29  ;;  %v4647_v19 = vcombine.low %v4413_v42, %v4413_v42 }
 0x3de   :  { %v1273_v18 = vrot.slane %v3491_v56, 6  ;;  %v1280_v50 = vpop.permute.xlu0 %1279  ;;  %v1274_v63 = vrot.slane %v3492_v61, 6  ;;  %v1282_v2 = vpop.permute.xlu1 %1281 }
 0x3df   :  { %v1287_v53 = vsel %vm202_vm5, %v1280_v50, %v1282_v2 }
 0x3e0   :  { %1277 = vst [vmem:[#allocation2 + $0x2e0] sm:$0xcc] %v1273_v18  ;;  %1619 = vrot.lane.b32.xlu0 %v4476_v43, %s3793_s29  ;;  %1278 = vst [vmem:[#allocation2 + $0x2e8] sm:$0xcc] %v1274_v63  ;;  %1621 = vrot.lane.b32.xlu1 %v4479_v44, %s3793_s29  ;;  %v2646_v44 = vld [vmem:[#allocation2 + $0x2c0] sm:$0xff] }
 0x3e2   :  { %v1284_v38 = vpop.permute.xlu0 %1283  ;;  %v1286_v40 = vpop.permute.xlu1 %1285 }
 0x3e3   :  { %v1288_v36 = vsel %vm202_vm5, %v1282_v2, %v1284_v38  ;;  %v1289_v4 = vsel %vm202_vm5, %v1284_v38, %v1286_v40  ;;  %v1292_v54 = vsel %vm202_vm5, %v1286_v40, %v1280_v50 }
 0x3e4   :  { %v3493_v3 = vcombine.low %v1287_v53, %v1288_v36  ;;  %1744 = vrot.lane.b32.xlu0 %v4488_v55, %s3791_s27  ;;  %v3494_v43 = vcombine.low %v1289_v4, %v1292_v54  ;;  %1746 = vrot.lane.b32.xlu1 %v4493_v7, %s3791_s27 }
 0x3e6   :  { %1302 = vst [vmem:[#allocation2 + $0x300] sm:$0x33] %v3493_v3  ;;  %v1329_v49 = vpop.permute.xlu0 %1328  ;;  %1303 = vst [vmem:[#allocation2 + $0x308] sm:$0x33] %v3494_v43  ;;  %v1331_v22 = vpop.permute.xlu1 %1330 }
 0x3e7   :  { %v2650_v21 = vld [vmem:[#allocation2 + $0x2e0] sm:$0xff]  ;;  %v1336_v33 = vsel %vm61_vm0, %v1329_v49, %v1331_v22  ;;  %v2651_v26 = vld [vmem:[#allocation2 + $0x2e8] sm:$0xff] }
 0x3e8   :  { %1748 = vrot.lane.b32.xlu0 %v4500_v9, %s3791_s27  ;;  %v3684_v23 = vcombine.high %v2646_v44, %v2650_v21  ;;  %v3683_v13 = vcombine.low %v2646_v44, %v2650_v21  ;;  %1750 = vrot.lane.b32.xlu1 %v4503_v11, %s3791_s27  ;;  %v3686_v28 = vcombine.high %v2647_v24, %v2651_v26 }
 0x3e9   :  { %v3685_v29 = vcombine.low %v2647_v24, %v2651_v26 }
 0x3ea   :  { %v1333_v52 = vpop.permute.xlu0 %1332  ;;  %3221 = vmatprep.subr.bf16.mxu0 %v3684_v23  ;;  %3262 = vmatprep.subr.bf16.mxu1 %v3686_v28  ;;  %v1335_v5 = vpop.permute.xlu1 %1334 }
 0x3eb   :  { %v1337_v30 = vsel %vm61_vm0, %v1331_v22, %v1333_v52  ;;  %3222 = vmatpush1.bf16.msra.mxu0 %v3683_v13  ;;  %v1338_v34 = vsel %vm61_vm0, %v1333_v52, %v1335_v5  ;;  %v1341_v14 = vsel %vm61_vm0, %v1335_v5, %v1329_v49  ;;  %3263 = vmatpush1.bf16.msra.mxu1 %v3685_v29 }
 0x3ec   :  { %v3497_v31 = vcombine.low %v1336_v33, %v1337_v30  ;;  %1796 = vrot.lane.b32.xlu0 %v4488_v55, %s3793_s29  ;;  %v3498_v46 = vcombine.low %v1338_v34, %v1341_v14  ;;  %1798 = vrot.lane.b32.xlu1 %v4493_v7, %s3793_s29 }
 0x3ed   :  { %v2654_v37 = vld [vmem:[#allocation2 + $0x300] sm:$0x33]  ;;  %v2655_v51 = vld [vmem:[#allocation2 + $0x308] sm:$0x33] }
 0x3ee   :  { %v1349_v17 = vrot.slane %v3497_v31, 6  ;;  %v1381_v16 = vpop.permute.xlu0 %1380  ;;  %v3692_v47 = vcombine.high %v2654_v37, %v2654_v37  ;;  %v3691_v48 = vcombine.low %v2654_v37, %v2654_v37  ;;  %v1350_v56 = vrot.slane %v3498_v46, 6  ;;  %v1383_v57 = vpop.permute.xlu1 %1382 }
 0x3ef   :  { %v3694_v59 = vcombine.high %v2655_v51, %v2655_v51  ;;  %v3693_v18 = vcombine.low %v2655_v51, %v2655_v51  ;;  %v1388_v61 = vsel %vm117_vm2, %v1381_v16, %v1383_v57 }
 0x3f0   :  { %1353 = vst [vmem:[#allocation2 + $0x10] sm:$0xcc] %v1349_v17  ;;  %1800 = vrot.lane.b32.xlu0 %v4500_v9, %s3793_s29  ;;  %3699 = vmatprep.subr.msk.bf16.mxu0 %vm3174_vm12, %v3692_v47  ;;  %v3176_v58 = vsel %vm3174_vm12, %v3691_v48, 0  ;;  %1354 = vst [vmem:[#allocation2 + $0x18] sm:$0xcc] %v1350_v56 }
 0x3f1   :  { %3224 = vmatpush1.bf16.msra.mxu0 %v3176_v58  ;;  %1802 = vrot.lane.b32.xlu1 %v4503_v11, %s3793_s29  ;;  %v3182_v42 = vsel %vm3174_vm12, %v3693_v18, 0 }
 0x3f2   :  { %v1385_v50 = vpop.permute.xlu0 %1384  ;;  %3701 = vmatprep.subr.msk.bf16.mxu1 %vm3174_vm12, %v3694_v59  ;;  %v1387_v38 = vpop.permute.xlu1 %1386 }
 0x3f3   :  { %v1389_v63 = vsel %vm117_vm2, %v1383_v57, %v1385_v50  ;;  %3265 = vmatpush1.bf16.msra.mxu1 %v3182_v42  ;;  %v1390_v53 = vsel %vm117_vm2, %v1385_v50, %v1387_v38  ;;  %v1393_v36 = vsel %vm117_vm2, %v1387_v38, %v1381_v16 }
 0x3f4   :  { %v3501_v2 = vcombine.low %v1388_v61, %v1389_v63  ;;  %1719 = vrot.lane.b32.xlu0 %v4488_v55, %s3790_s0  ;;  %3232 = vmatmul.mubr.bf16.vlgmr.msra.gmra.mrb[0].mxu0 %v4647_v19  ;;  %v3502_v40 = vcombine.low %v1390_v53, %v1393_v36 }
 0x3f5   :  { %3704 = vmatprep.mubr.msk.bf16.mxu0 %vm3170_vm11, %v4419_v45  ;;  %1721 = vrot.lane.b32.xlu1 %v4493_v7, %s3790_s0 }
 0x3f6   :  { %v1401_v3 = vrot.slane %v3501_v2, 6  ;;  %v1356_v4 = vpop.permute.xlu0 %1355  ;;  %3273 = vmatmul.mubr.bf16.vlgmr.msra.gmra.mrb[0].mxu1 %v4647_v19  ;;  %v1402_v54 = vrot.slane %v3502_v40, 6  ;;  %v1358_v43 = vpop.permute.xlu1 %1357 }
 0x3f7   :  { %3706 = vmatprep.mubr.msk.bf16.mxu1 %vm3170_vm11, %v4419_v45  ;;  %v1363_v49 = vsel %vm90_vm1, %v1356_v4, %v1358_v43  ;;  %v2560_v30 = vld [vmem:[#allocation2 + $0x10] sm:$0xff]  ;;  %v2561_v51 = vld [vmem:[#allocation2 + $0x18] sm:$0xff] }
 0x3f8   :  { %1405 = vst [vmem:[#allocation2 + $0x30] sm:$0xcc] %v1401_v3  ;;  %1723 = vrot.lane.b32.xlu0 %v4500_v9, %s3790_s0  ;;  %1406 = vst [vmem:[#allocation2 + $0x38] sm:$0xcc] %v1402_v54 }
 0x3f9   :  { %1725 = vrot.lane.b32.xlu1 %v4503_v11, %s3790_s0 }
 0x3fa   :  { %v1360_v44 = vpop.permute.xlu0 %1359  ;;  %v1362_v45 = vpop.permute.xlu1 %1361 }
 0x3fb   :  { %v1364_v21 = vsel %vm90_vm1, %v1358_v43, %v1360_v44  ;;  %v1365_v23 = vsel %vm90_vm1, %v1360_v44, %v1362_v45  ;;  %v1368_v13 = vsel %vm90_vm1, %v1362_v45, %v1356_v4 }
 0x3fc   :  { %v3499_v22 = vcombine.low %v1363_v49, %v1364_v21  ;;  %1771 = vrot.lane.b32.xlu0 %v4488_v55, %s3792_s28  ;;  %v3500_v33 = vcombine.low %v1365_v23, %v1368_v13 }
 0x3fd   :  { %1773 = vrot.lane.b32.xlu1 %v4493_v7, %s3792_s28 }
 0x3fe   :  { %1378 = vst [vmem:[#allocation2 + $0x30] sm:$0x33] %v3499_v22  ;;  %v1433_v24 = vpop.permute.xlu0 %1432  ;;  %1379 = vst [vmem:[#allocation2 + $0x38] sm:$0x33] %v3500_v33  ;;  %v1435_v26 = vpop.permute.xlu1 %1434 }
 0x3ff   :  { %v1440_v52 = vsel %vm173_vm4, %v1433_v24, %v1435_v26 }
 0x400   :  { %1775 = vrot.lane.b32.xlu0 %v4500_v9, %s3792_s28 }
 0x401   :  { %1777 = vrot.lane.b32.xlu1 %v4503_v11, %s3792_s28 }
 0x402   :  { %v1437_v28 = vpop.permute.xlu0 %1436  ;;  %v1439_v5 = vpop.permute.xlu1 %1438 }
 0x403   :  { %v1441_v29 = vsel %vm173_vm4, %v1435_v26, %v1437_v28  ;;  %v1442_v34 = vsel %vm173_vm4, %v1437_v28, %v1439_v5  ;;  %v1445_v14 = vsel %vm173_vm4, %v1439_v5, %v1433_v24 }
 0x404   :  { %v3505_v31 = vcombine.low %v1440_v52, %v1441_v29  ;;  %1900 = vrot.lane.b32.xlu0 %v4512_v60, %s3790_s0  ;;  %v3506_v46 = vcombine.low %v1442_v34, %v1445_v14 }
 0x405   :  { %v2564_v37 = vld [vmem:[#allocation2 + $0x30] sm:$0xff]  ;;  %1902 = vrot.lane.b32.xlu1 %v4517_v62, %s3790_s0  ;;  %v2565_v56 = vld [vmem:[#allocation2 + $0x38] sm:$0xff] }
 0x406   :  { %v1453_v17 = vrot.slane %v3505_v31, 6  ;;  %v1460_v16 = vpop.permute.xlu0 %1459  ;;  %v3599_v47 = vcombine.low %v2560_v30, %v2564_v37  ;;  %v3600_v48 = vcombine.high %v2560_v30, %v2564_v37  ;;  %v1454_v57 = vrot.slane %v3506_v46, 6  ;;  %v1462_v58 = vpop.permute.xlu1 %1461 }
 0x407   :  { %v3601_v59 = vcombine.low %v2561_v51, %v2565_v56  ;;  %v3602_v18 = vcombine.high %v2561_v51, %v2565_v56  ;;  %v1467_v61 = vsel %vm202_vm5, %v1460_v16, %v1462_v58 }
 0x408   :  { %1457 = vst [vmem:[#allocation2 + $0x50] sm:$0xcc] %v1453_v17  ;;  %1904 = vrot.lane.b32.xlu0 %v4524_v0, %s3790_s0  ;;  %3281 = vmatprep.subr.bf16.mxu0 %v3600_v48  ;;  %1458 = vst [vmem:[#allocation2 + $0x58] sm:$0xcc] %v1454_v57 }
 0x409   :  { %3282 = vmatpush1.bf16.msra.mxu0 %v3599_v47  ;;  %1906 = vrot.lane.b32.xlu1 %v4527_v1, %s3790_s0 }
 0x40a   :  { %v1464_v50 = vpop.permute.xlu0 %1463  ;;  %3322 = vmatprep.subr.bf16.mxu1 %v3602_v18  ;;  %v1466_v2 = vpop.permute.xlu1 %1465 }
 0x40b   :  { %v1468_v42 = vsel %vm202_vm5, %v1462_v58, %v1464_v50  ;;  %3323 = vmatpush1.bf16.msra.mxu1 %v3601_v59  ;;  %v1469_v38 = vsel %vm202_vm5, %v1464_v50, %v1466_v2  ;;  %v1472_v53 = vsel %vm202_vm5, %v1466_v2, %v1460_v16 }
 0x40c   :  { %v3507_v63 = vcombine.low %v1467_v61, %v1468_v42  ;;  %1823 = vrot.lane.b32.xlu0 %v4488_v55, %s3794_s30  ;;  %v3508_v36 = vcombine.low %v1469_v38, %v1472_v53 }
 0x40d   :  { %1825 = vrot.lane.b32.xlu1 %v4493_v7, %s3794_s30 }
 0x40e   :  { %1482 = vst [vmem:[#allocation2 + $0x70] sm:$0x33] %v3507_v63  ;;  %1483 = vst [vmem:[#allocation2 + $0x78] sm:$0x33] %v3508_v36 }
 0x40f   :  { %v2568_v55 = vld [vmem:[#allocation2 + $0x50] sm:$0xff]  ;;  %v2569_v54 = vld [vmem:[#allocation2 + $0x58] sm:$0xff] }
 0x410   :  { %1827 = vrot.lane.b32.xlu0 %v4500_v9, %s3794_s30 }
 0x411   :  { %1829 = vrot.lane.b32.xlu1 %v4503_v11, %s3794_s30 }
 0x414   :  { %1875 = vrot.lane.b32.xlu0 %v4512_v60, %s3789_s26 }
 0x415   :  { %v2572_v3 = vld [vmem:[#allocation2 + $0x70] sm:$0xff]  ;;  %1877 = vrot.lane.b32.xlu1 %v4517_v62, %s3789_s26  ;;  %v2573_v43 = vld [vmem:[#allocation2 + $0x78] sm:$0xff] }
 0x416   :  { %v3607_v40 = vcombine.low %v2568_v55, %v2572_v3  ;;  %v3608_v4 = vcombine.high %v2568_v55, %v2572_v3  ;;  %v3609_v7 = vcombine.low %v2569_v54, %v2573_v43  ;;  %v3610_v9 = vcombine.high %v2569_v54, %v2573_v43 }
 0x418   :  { %1879 = vrot.lane.b32.xlu0 %v4524_v0, %s3789_s26  ;;  %3283 = vmatprep.subr.bf16.mxu0 %v3608_v4 }
 0x419   :  { %3284 = vmatpush1.bf16.msra.mxu0 %v3607_v40  ;;  %1881 = vrot.lane.b32.xlu1 %v4527_v1, %s3789_s26 }
 0x41a   :  { %3324 = vmatprep.subr.bf16.mxu1 %v3610_v9 }
 0x41b   :  { %3325 = vmatpush1.bf16.msra.mxu1 %v3609_v7 }
 0x41c   :  { %1952 = vrot.lane.b32.xlu0 %v4512_v60, %s3792_s28 }
 0x41d   :  { %1954 = vrot.lane.b32.xlu1 %v4517_v62, %s3792_s28 }
 0x41e   :  { %v1537_v11 = vpop.permute.xlu0 %1536  ;;  %v1539_v49 = vpop.permute.xlu1 %1538 }
 0x41f   :  { %v1544_v21 = vsel %vm90_vm1, %v1537_v11, %v1539_v49 }
 0x420   :  { %1956 = vrot.lane.b32.xlu0 %v4524_v0, %s3792_s28 }
 0x421   :  { %1958 = vrot.lane.b32.xlu1 %v4527_v1, %s3792_s28 }
 0x422   :  { %v1541_v44 = vpop.permute.xlu0 %1540  ;;  %v1543_v23 = vpop.permute.xlu1 %1542 }
 0x423   :  { %v1545_v22 = vsel %vm90_vm1, %v1539_v49, %v1541_v44  ;;  %v1546_v13 = vsel %vm90_vm1, %v1541_v44, %v1543_v23  ;;  %v1549_v33 = vsel %vm90_vm1, %v1543_v23, %v1537_v11 }
 0x424   :  { %v3513_v45 = vcombine.low %v1544_v21, %v1545_v22  ;;  %2004 = vrot.lane.b32.xlu0 %v4512_v60, %s3794_s30  ;;  %v3514_v26 = vcombine.low %v1546_v13, %v1549_v33 }
 0x425   :  { %2006 = vrot.lane.b32.xlu1 %v4517_v62, %s3794_s30 }
 0x426   :  { %v1557_v24 = vrot.slane %v3513_v45, 6  ;;  %v1589_v52 = vpop.permute.xlu0 %1588  ;;  %v1558_v28 = vrot.slane %v3514_v26, 6  ;;  %v1591_v29 = vpop.permute.xlu1 %1590 }
 0x427   :  { %v1596_v31 = vsel %vm146_vm3, %v1589_v52, %v1591_v29 }
 0x428   :  { %1561 = vst [vmem:[#allocation2 + $0x90] sm:$0xcc] %v1557_v24  ;;  %2008 = vrot.lane.b32.xlu0 %v4524_v0, %s3794_s30  ;;  %1562 = vst [vmem:[#allocation2 + $0x98] sm:$0xcc] %v1558_v28 }
 0x429   :  { %2010 = vrot.lane.b32.xlu1 %v4527_v1, %s3794_s30 }
 0x42a   :  { %v1593_v30 = vpop.permute.xlu0 %1592  ;;  %v1595_v14 = vpop.permute.xlu1 %1594 }
 0x42b   :  { %v1597_v5 = vsel %vm146_vm3, %v1591_v29, %v1593_v30  ;;  %v1598_v37 = vsel %vm146_vm3, %v1593_v30, %v1595_v14  ;;  %v1601_v17 = vsel %vm146_vm3, %v1595_v14, %v1589_v52 }
 0x42c   :  { %v3517_v34 = vcombine.low %v1596_v31, %v1597_v5  ;;  %1927 = vrot.lane.b32.xlu0 %v4512_v60, %s3791_s27  ;;  %v3518_v16 = vcombine.low %v1598_v37, %v1601_v17 }
 0x42d   :  { %1929 = vrot.lane.b32.xlu1 %v4517_v62, %s3791_s27 }
 0x42e   :  { %v1609_v46 = vrot.slane %v3517_v34, 6  ;;  %v1512_v47 = vpop.permute.xlu0 %1511  ;;  %v1610_v48 = vrot.slane %v3518_v16, 6  ;;  %v1514_v51 = vpop.permute.xlu1 %1513 }
 0x42f   :  { %v1519_v57 = vsel %vm61_vm0, %v1512_v47, %v1514_v51 }
 0x430   :  { %1613 = vst [vmem:[#allocation2 + $0xb0] sm:$0xcc] %v1609_v46  ;;  %1931 = vrot.lane.b32.xlu0 %v4524_v0, %s3791_s27  ;;  %1614 = vst [vmem:[#allocation2 + $0xb8] sm:$0xcc] %v1610_v48 }
 0x431   :  { %1933 = vrot.lane.b32.xlu1 %v4527_v1, %s3791_s27 }
 0x432   :  { %v1516_v56 = vpop.permute.xlu0 %1515  ;;  %v1518_v18 = vpop.permute.xlu1 %1517 }
 0x433   :  { %v1520_v58 = vsel %vm61_vm0, %v1514_v51, %v1516_v56  ;;  %v1521_v61 = vsel %vm61_vm0, %v1516_v56, %v1518_v18  ;;  %v1524_v50 = vsel %vm61_vm0, %v1518_v18, %v1512_v47 }
 0x434   :  { %v3511_v59 = vcombine.low %v1519_v57, %v1520_v58  ;;  %1979 = vrot.lane.b32.xlu0 %v4512_v60, %s3793_s29  ;;  %v3512_v42 = vcombine.low %v1521_v61, %v1524_v50 }
 0x435   :  { %1981 = vrot.lane.b32.xlu1 %v4517_v62, %s3793_s29 }
 0x436   :  { %1534 = vst [vmem:[#allocation2 + $0x90] sm:$0x33] %v3511_v59  ;;  %v1564_v63 = vpop.permute.xlu0 %1563  ;;  %1535 = vst [vmem:[#allocation2 + $0x98] sm:$0x33] %v3512_v42  ;;  %v1566_v2 = vpop.permute.xlu1 %1565 }
 0x437   :  { %v1571_v60 = vsel %vm117_vm2, %v1564_v63, %v1566_v2 }
 0x438   :  { %1983 = vrot.lane.b32.xlu0 %v4524_v0, %s3793_s29 }
 0x439   :  { %1985 = vrot.lane.b32.xlu1 %v4527_v1, %s3793_s29 }
 0x43a   :  { %v1568_v38 = vpop.permute.xlu0 %1567  ;;  %v1570_v55 = vpop.permute.xlu1 %1569 }
 0x43b   :  { %v1572_v53 = vsel %vm117_vm2, %v1566_v2, %v1568_v38  ;;  %v1573_v62 = vsel %vm117_vm2, %v1568_v38, %v1570_v55  ;;  %v1576_v3 = vsel %vm117_vm2, %v1570_v55, %v1564_v63 }
 0x43c   :  { %v3515_v36 = vcombine.low %v1571_v60, %v1572_v53  ;;  %2056 = vrot.lane.b32.xlu0 %v4536_v15, %s3789_s26  ;;  %v3516_v0 = vcombine.low %v1573_v62, %v1576_v3 }
 0x43d   :  { %2058 = vrot.lane.b32.xlu1 %v4541_v8, %s3789_s26  ;;  %v2576_v44 = vld [vmem:[#allocation2 + $0x90] sm:$0xff]  ;;  %v2577_v24 = vld [vmem:[#allocation2 + $0x98] sm:$0xff] }
 0x43e   :  { %1586 = vst [vmem:[#allocation2 + $0xb0] sm:$0x33] %v3515_v36  ;;  %v1641_v40 = vpop.permute.xlu0 %1640  ;;  %1587 = vst [vmem:[#allocation2 + $0xb8] sm:$0x33] %v3516_v0  ;;  %v1643_v1 = vpop.permute.xlu1 %1642 }
 0x43f   :  { %v1648_v54 = vsel %vm202_vm5, %v1641_v40, %v1643_v1 }
 0x440   :  { %2060 = vrot.lane.b32.xlu0 %v4548_v6, %s3789_s26 }
 0x441   :  { %2062 = vrot.lane.b32.xlu1 %v4551_v32, %s3789_s26 }
 0x442   :  { %v1645_v4 = vpop.permute.xlu0 %1644  ;;  %v1647_v9 = vpop.permute.xlu1 %1646 }
 0x443   :  { %v1649_v43 = vsel %vm202_vm5, %v1643_v1, %v1645_v4  ;;  %v1650_v11 = vsel %vm202_vm5, %v1645_v4, %v1647_v9  ;;  %v1653_v49 = vsel %vm202_vm5, %v1647_v9, %v1641_v40 }
 0x444   :  { %v3521_v7 = vcombine.low %v1648_v54, %v1649_v43  ;;  %2108 = vrot.lane.b32.xlu0 %v4536_v15, %s3791_s27  ;;  %v3522_v45 = vcombine.low %v1650_v11, %v1653_v49 }
 0x445   :  { %v2580_v21 = vld [vmem:[#allocation2 + $0xb0] sm:$0xff]  ;;  %2110 = vrot.lane.b32.xlu1 %v4541_v8, %s3791_s27  ;;  %v2581_v26 = vld [vmem:[#allocation2 + $0xb8] sm:$0xff] }
 0x446   :  { %v1661_v22 = vrot.slane %v3521_v7, 6  ;;  %v1693_v23 = vpop.permute.xlu0 %1692  ;;  %v3615_v13 = vcombine.low %v2576_v44, %v2580_v21  ;;  %v3616_v33 = vcombine.high %v2576_v44, %v2580_v21  ;;  %v1662_v52 = vrot.slane %v3522_v45, 6  ;;  %v1695_v28 = vpop.permute.xlu1 %1694 }
 0x447   :  { %v3617_v29 = vcombine.low %v2577_v24, %v2581_v26  ;;  %v3618_v30 = vcombine.high %v2577_v24, %v2581_v26  ;;  %v1700_v5 = vsel %vm61_vm0, %v1693_v23, %v1695_v28 }
 0x448   :  { %1665 = vst [vmem:[#allocation2 + $0xd0] sm:$0xcc] %v1661_v22  ;;  %2112 = vrot.lane.b32.xlu0 %v4548_v6, %s3791_s27  ;;  %3285 = vmatprep.subr.bf16.mxu0 %v3616_v33  ;;  %1666 = vst [vmem:[#allocation2 + $0xd8] sm:$0xcc] %v1662_v52 }
 0x449   :  { %3286 = vmatpush1.bf16.msra.mxu0 %v3615_v13  ;;  %2114 = vrot.lane.b32.xlu1 %v4551_v32, %s3791_s27 }
 0x44a   :  { %v1697_v31 = vpop.permute.xlu0 %1696  ;;  %3326 = vmatprep.subr.bf16.mxu1 %v3618_v30  ;;  %v1699_v37 = vpop.permute.xlu1 %1698 }
 0x44b   :  { %v1701_v34 = vsel %vm61_vm0, %v1695_v28, %v1697_v31  ;;  %3327 = vmatpush1.bf16.msra.mxu1 %v3617_v29  ;;  %v1702_v17 = vsel %vm61_vm0, %v1697_v31, %v1699_v37  ;;  %v1705_v46 = vsel %vm61_vm0, %v1699_v37, %v1693_v23 }
 0x44c   :  { %v3525_v14 = vcombine.low %v1700_v5, %v1701_v34  ;;  %2083 = vrot.lane.b32.xlu0 %v4536_v15, %s3790_s0  ;;  %v3526_v47 = vcombine.low %v1702_v17, %v1705_v46 }
 0x44d   :  { %2085 = vrot.lane.b32.xlu1 %v4541_v8, %s3790_s0 }
 0x44e   :  { %v1713_v16 = vrot.slane %v3525_v14, 6  ;;  %v1616_v48 = vpop.permute.xlu0 %1615  ;;  %v1714_v51 = vrot.slane %v3526_v47, 6  ;;  %v1618_v56 = vpop.permute.xlu1 %1617 }
 0x44f   :  { %v1623_v58 = vsel %vm173_vm4, %v1616_v48, %v1618_v56 }
 0x450   :  { %1717 = vst [vmem:[#allocation2 + $0xf0] sm:$0xcc] %v1713_v16  ;;  %2087 = vrot.lane.b32.xlu0 %v4548_v6, %s3790_s0  ;;  %1718 = vst [vmem:[#allocation2 + $0xf8] sm:$0xcc] %v1714_v51 }
 0x451   :  { %2089 = vrot.lane.b32.xlu1 %v4551_v32, %s3790_s0 }
 0x452   :  { %v1620_v57 = vpop.permute.xlu0 %1619  ;;  %v1622_v61 = vpop.permute.xlu1 %1621 }
 0x453   :  { %v1624_v59 = vsel %vm173_vm4, %v1618_v56, %v1620_v57  ;;  %v1625_v50 = vsel %vm173_vm4, %v1620_v57, %v1622_v61  ;;  %v1628_v42 = vsel %vm173_vm4, %v1622_v61, %v1616_v48 }
 0x454   :  { %v3519_v18 = vcombine.low %v1623_v58, %v1624_v59  ;;  %2160 = vrot.lane.b32.xlu0 %v4536_v15, %s3793_s29  ;;  %v3520_v63 = vcombine.low %v1625_v50, %v1628_v42 }
 0x455   :  { %2162 = vrot.lane.b32.xlu1 %v4541_v8, %s3793_s29 }
 0x456   :  { %1638 = vst [vmem:[#allocation2 + $0xd0] sm:$0x33] %v3519_v18  ;;  %v1745_v2 = vpop.permute.xlu0 %1744  ;;  %1639 = vst [vmem:[#allocation2 + $0xd8] sm:$0x33] %v3520_v63  ;;  %v1747_v38 = vpop.permute.xlu1 %1746 }
 0x457   :  { %v1752_v53 = vsel %vm117_vm2, %v1745_v2, %v1747_v38  ;;  %v2588_v1 = vld [vmem:[#allocation2 + $0xf0] sm:$0xff]  ;;  %v2589_v49 = vld [vmem:[#allocation2 + $0xf8] sm:$0xff] }
 0x458   :  { %2164 = vrot.lane.b32.xlu0 %v4548_v6, %s3793_s29 }
 0x459   :  { %2166 = vrot.lane.b32.xlu1 %v4551_v32, %s3793_s29 }
 0x45a   :  { %v1749_v60 = vpop.permute.xlu0 %1748  ;;  %v1751_v62 = vpop.permute.xlu1 %1750 }
 0x45b   :  { %v1753_v36 = vsel %vm117_vm2, %v1747_v38, %v1749_v60  ;;  %v1754_v3 = vsel %vm117_vm2, %v1749_v60, %v1751_v62  ;;  %v1757_v0 = vsel %vm117_vm2, %v1751_v62, %v1745_v2 }
 0x45c   :  { %v3529_v55 = vcombine.low %v1752_v53, %v1753_v36  ;;  %2135 = vrot.lane.b32.xlu0 %v4536_v15, %s3792_s28  ;;  %v3530_v54 = vcombine.low %v1754_v3, %v1757_v0 }
 0x45d   :  { %v2584_v40 = vld [vmem:[#allocation2 + $0xd0] sm:$0xff]  ;;  %2137 = vrot.lane.b32.xlu1 %v4541_v8, %s3792_s28  ;;  %v2585_v11 = vld [vmem:[#allocation2 + $0xd8] sm:$0xff] }
 0x45e   :  { %v1765_v4 = vrot.slane %v3529_v55, 6  ;;  %v1797_v43 = vpop.permute.xlu0 %1796  ;;  %v3623_v7 = vcombine.low %v2584_v40, %v2588_v1  ;;  %v3624_v9 = vcombine.high %v2584_v40, %v2588_v1  ;;  %v1766_v44 = vrot.slane %v3530_v54, 6  ;;  %v1799_v21 = vpop.permute.xlu1 %1798 }
 0x45f   :  { %v3625_v22 = vcombine.low %v2585_v11, %v2589_v49  ;;  %v3626_v45 = vcombine.high %v2585_v11, %v2589_v49  ;;  %v1804_v13 = vsel %vm173_vm4, %v1797_v43, %v1799_v21 }
 0x460   :  { %1769 = vst [vmem:[#allocation2 + $0x110] sm:$0xcc] %v1765_v4  ;;  %2139 = vrot.lane.b32.xlu0 %v4548_v6, %s3792_s28  ;;  %3287 = vmatprep.subr.bf16.mxu0 %v3624_v9  ;;  %1770 = vst [vmem:[#allocation2 + $0x118] sm:$0xcc] %v1766_v44 }
 0x461   :  { %3288 = vmatpush1.bf16.msra.mxu0 %v3623_v7  ;;  %2141 = vrot.lane.b32.xlu1 %v4551_v32, %s3792_s28 }
 0x462   :  { %v1801_v23 = vpop.permute.xlu0 %1800  ;;  %3328 = vmatprep.subr.bf16.mxu1 %v3626_v45 }
 0x463   :  { %v1805_v33 = vsel %vm173_vm4, %v1799_v21, %v1801_v23  ;;  %3329 = vmatpush1.bf16.msra.mxu1 %v3625_v22  ;;  %v1803_v26 = vpop.permute.xlu1 %1802 }
 0x464   :  { %v3533_v24 = vcombine.low %v1804_v13, %v1805_v33  ;;  %2187 = vrot.lane.b32.xlu0 %v4536_v15, %s3794_s30  ;;  %v1806_v52 = vsel %vm173_vm4, %v1801_v23, %v1803_v26  ;;  %v1809_v28 = vsel %vm173_vm4, %v1803_v26, %v1797_v43 }
 0x465   :  { %v3534_v30 = vcombine.low %v1806_v52, %v1809_v28  ;;  %2189 = vrot.lane.b32.xlu1 %v4541_v8, %s3794_s30 }
 0x466   :  { %v1817_v29 = vrot.slane %v3533_v24, 6  ;;  %v1720_v31 = vpop.permute.xlu0 %1719 }
 0x467   :  { %v1818_v5 = vrot.slane %v3534_v30, 6  ;;  %v1722_v34 = vpop.permute.xlu1 %1721 }
 0x468   :  { %1821 = vst [vmem:[#allocation2 + $0x130] sm:$0xcc] %v1817_v29  ;;  %2191 = vrot.lane.b32.xlu0 %v4548_v6, %s3794_s30  ;;  %v1727_v15 = vsel %vm90_vm1, %v1720_v31, %v1722_v34 }
 0x469   :  { %1822 = vst [vmem:[#allocation2 + $0x138] sm:$0xcc] %v1818_v5  ;;  %2193 = vrot.lane.b32.xlu1 %v4551_v32, %s3794_s30 }
 0x46a   :  { %v1724_v14 = vpop.permute.xlu0 %1723 }
 0x46b   :  { %v1728_v37 = vsel %vm90_vm1, %v1722_v34, %v1724_v14  ;;  %v1726_v8 = vpop.permute.xlu1 %1725 }
 0x46c   :  { %v3527_v17 = vcombine.low %v1727_v15, %v1728_v37  ;;  %2264 = vrot.lane.b32.xlu0 %v4560_v20, %s3790_s0  ;;  %v1729_v46 = vsel %vm90_vm1, %v1724_v14, %v1726_v8  ;;  %v1732_v16 = vsel %vm90_vm1, %v1726_v8, %v1720_v31 }
 0x46d   :  { %v3528_v6 = vcombine.low %v1729_v46, %v1732_v16  ;;  %2266 = vrot.lane.b32.xlu1 %v4565_v25, %s3790_s0 }
 0x46e   :  { %1742 = vst [vmem:[#allocation2 + $0x110] sm:$0x33] %v3527_v17  ;;  %v1772_v47 = vpop.permute.xlu0 %1771 }
 0x46f   :  { %1743 = vst [vmem:[#allocation2 + $0x118] sm:$0x33] %v3528_v6  ;;  %v1774_v32 = vpop.permute.xlu1 %1773 }
 0x470   :  { %2268 = vrot.lane.b32.xlu0 %v4572_v12, %s3790_s0  ;;  %v1779_v51 = vsel %vm146_vm3, %v1772_v47, %v1774_v32 }
 0x471   :  { %2270 = vrot.lane.b32.xlu1 %v4575_v27, %s3790_s0 }
 0x472   :  { %v1776_v48 = vpop.permute.xlu0 %1775 }
 0x473   :  { %v1780_v56 = vsel %vm146_vm3, %v1774_v32, %v1776_v48  ;;  %v1778_v58 = vpop.permute.xlu1 %1777 }
 0x474   :  { %v3531_v57 = vcombine.low %v1779_v51, %v1780_v56  ;;  %2316 = vrot.lane.b32.xlu0 %v4560_v20, %s3792_s28  ;;  %v1781_v59 = vsel %vm146_vm3, %v1776_v48, %v1778_v58  ;;  %v1784_v18 = vsel %vm146_vm3, %v1778_v58, %v1772_v47 }
 0x475   :  { %v3532_v61 = vcombine.low %v1781_v59, %v1784_v18  ;;  %2318 = vrot.lane.b32.xlu1 %v4565_v25, %s3792_s28  ;;  %v2592_v62 = vld [vmem:[#allocation2 + $0x110] sm:$0xff] }
 0x476   :  { %1794 = vst [vmem:[#allocation2 + $0x130] sm:$0x33] %v3531_v57  ;;  %v1901_v50 = vpop.permute.xlu0 %1900  ;;  %v2593_v43 = vld [vmem:[#allocation2 + $0x118] sm:$0xff] }
 0x477   :  { %1795 = vst [vmem:[#allocation2 + $0x138] sm:$0x33] %v3532_v61  ;;  %v1903_v42 = vpop.permute.xlu1 %1902 }
 0x478   :  { %2320 = vrot.lane.b32.xlu0 %v4572_v12, %s3792_s28  ;;  %v1908_v2 = vsel %vm90_vm1, %v1901_v50, %v1903_v42 }
 0x479   :  { %2322 = vrot.lane.b32.xlu1 %v4575_v27, %s3792_s28 }
 0x47a   :  { %v1905_v63 = vpop.permute.xlu0 %1904 }
 0x47b   :  { %v1909_v38 = vsel %vm90_vm1, %v1903_v42, %v1905_v63  ;;  %v1907_v53 = vpop.permute.xlu1 %1906 }
 0x47c   :  { %v3541_v60 = vcombine.low %v1908_v2, %v1909_v38  ;;  %2239 = vrot.lane.b32.xlu0 %v4560_v20, %s3789_s26  ;;  %v1910_v36 = vsel %vm90_vm1, %v1905_v63, %v1907_v53  ;;  %v1913_v55 = vsel %vm90_vm1, %v1907_v53, %v1901_v50 }
 0x47d   :  { %v2596_v3 = vld [vmem:[#allocation2 + $0x130] sm:$0xff]  ;;  %v3542_v40 = vcombine.low %v1910_v36, %v1913_v55  ;;  %2241 = vrot.lane.b32.xlu1 %v4565_v25, %s3789_s26 }
 0x47e   :  { %v1921_v0 = vrot.slane %v3541_v60, 6  ;;  %v1824_v1 = vpop.permute.xlu0 %1823  ;;  %v3631_v4 = vcombine.low %v2592_v62, %v2596_v3  ;;  %v3632_v54 = vcombine.high %v2592_v62, %v2596_v3  ;;  %v2597_v7 = vld [vmem:[#allocation2 + $0x138] sm:$0xff] }
 0x47f   :  { %v1922_v9 = vrot.slane %v3542_v40, 6  ;;  %v1826_v11 = vpop.permute.xlu1 %1825  ;;  %v3633_v49 = vcombine.low %v2593_v43, %v2597_v7  ;;  %v3634_v44 = vcombine.high %v2593_v43, %v2597_v7 }
 0x480   :  { %1925 = vst [vmem:[#allocation2 + $0x170] sm:$0xcc] %v1921_v0  ;;  %2243 = vrot.lane.b32.xlu0 %v4572_v12, %s3789_s26  ;;  %3289 = vmatprep.subr.bf16.mxu0 %v3632_v54  ;;  %v1831_v22 = vsel %vm202_vm5, %v1824_v1, %v1826_v11 }
 0x481   :  { %3290 = vmatpush1.bf16.msra.mxu0 %v3631_v4  ;;  %1926 = vst [vmem:[#allocation2 + $0x178] sm:$0xcc] %v1922_v9  ;;  %2245 = vrot.lane.b32.xlu1 %v4575_v27, %s3789_s26 }
 0x482   :  { %v1828_v21 = vpop.permute.xlu0 %1827  ;;  %3330 = vmatprep.subr.bf16.mxu1 %v3634_v44 }
 0x483   :  { %v1832_v45 = vsel %vm202_vm5, %v1826_v11, %v1828_v21  ;;  %3331 = vmatpush1.bf16.msra.mxu1 %v3633_v49  ;;  %v1830_v13 = vpop.permute.xlu1 %1829 }
 0x484   :  { %v3535_v23 = vcombine.low %v1831_v22, %v1832_v45  ;;  %2291 = vrot.lane.b32.xlu0 %v4560_v20, %s3791_s27  ;;  %v1833_v33 = vsel %vm202_vm5, %v1828_v21, %v1830_v13  ;;  %v1836_v24 = vsel %vm202_vm5, %v1830_v13, %v1824_v1 }
 0x485   :  { %v3536_v26 = vcombine.low %v1833_v33, %v1836_v24  ;;  %2293 = vrot.lane.b32.xlu1 %v4565_v25, %s3791_s27 }
 0x486   :  { %1846 = vst [vmem:[#allocation2 + $0x150] sm:$0x33] %v3535_v23  ;;  %v1876_v52 = vpop.permute.xlu0 %1875 }
 0x487   :  { %1847 = vst [vmem:[#allocation2 + $0x158] sm:$0x33] %v3536_v26  ;;  %v1878_v28 = vpop.permute.xlu1 %1877 }
 0x488   :  { %2295 = vrot.lane.b32.xlu0 %v4572_v12, %s3791_s27  ;;  %v1883_v30 = vsel %vm61_vm0, %v1876_v52, %v1878_v28 }
 0x489   :  { %2297 = vrot.lane.b32.xlu1 %v4575_v27, %s3791_s27 }
 0x48a   :  { %v1880_v29 = vpop.permute.xlu0 %1879 }
 0x48b   :  { %v1884_v31 = vsel %vm61_vm0, %v1878_v28, %v1880_v29  ;;  %v1882_v34 = vpop.permute.xlu1 %1881 }
 0x48c   :  { %v3539_v5 = vcombine.low %v1883_v30, %v1884_v31  ;;  %2368 = vrot.lane.b32.xlu0 %v4560_v20, %s3794_s30  ;;  %v1885_v14 = vsel %vm61_vm0, %v1880_v29, %v1882_v34  ;;  %v1888_v15 = vsel %vm61_vm0, %v1882_v34, %v1876_v52 }
 0x48d   :  { %v3540_v37 = vcombine.low %v1885_v14, %v1888_v15  ;;  %2370 = vrot.lane.b32.xlu1 %v4565_v25, %s3794_s30  ;;  %v2600_v56 = vld [vmem:[#allocation2 + $0x150] sm:$0xff] }
 0x48e   :  { %1898 = vst [vmem:[#allocation2 + $0x170] sm:$0x33] %v3539_v5  ;;  %v1953_v17 = vpop.permute.xlu0 %1952  ;;  %v2601_v42 = vld [vmem:[#allocation2 + $0x158] sm:$0xff] }
 0x48f   :  { %1899 = vst [vmem:[#allocation2 + $0x178] sm:$0x33] %v3540_v37  ;;  %v1955_v8 = vpop.permute.xlu1 %1954 }
 0x490   :  { %2372 = vrot.lane.b32.xlu0 %v4572_v12, %s3794_s30  ;;  %v1960_v16 = vsel %vm146_vm3, %v1953_v17, %v1955_v8 }
 0x491   :  { %2374 = vrot.lane.b32.xlu1 %v4575_v27, %s3794_s30 }
 0x492   :  { %v1957_v46 = vpop.permute.xlu0 %1956 }
 0x493   :  { %v1961_v6 = vsel %vm146_vm3, %v1955_v8, %v1957_v46  ;;  %v1959_v32 = vpop.permute.xlu1 %1958 }
 0x494   :  { %v3545_v47 = vcombine.low %v1960_v16, %v1961_v6  ;;  %2401 = vrot.lane.b32.xlu0 %v4589_v35, %s3789_s26  ;;  %v1962_v48 = vsel %vm146_vm3, %v1957_v46, %v1959_v32  ;;  %v1965_v51 = vsel %vm146_vm3, %v1959_v32, %v1953_v17 }
 0x495   :  { %v2604_v57 = vld [vmem:[#allocation2 + $0x170] sm:$0xff]  ;;  %v3546_v59 = vcombine.low %v1962_v48, %v1965_v51  ;;  %2403 = vrot.lane.b32.xlu1 %v4596_v39, %s3789_s26 }
 0x496   :  { %v1973_v58 = vrot.slane %v3545_v47, 6  ;;  %v2005_v18 = vpop.permute.xlu0 %2004  ;;  %v3639_v61 = vcombine.low %v2600_v56, %v2604_v57  ;;  %v3640_v50 = vcombine.high %v2600_v56, %v2604_v57  ;;  %v2605_v63 = vld [vmem:[#allocation2 + $0x178] sm:$0xff] }
 0x497   :  { %v1974_v2 = vrot.slane %v3546_v59, 6  ;;  %v2007_v38 = vpop.permute.xlu1 %2006  ;;  %v3641_v60 = vcombine.low %v2601_v42, %v2605_v63  ;;  %v3642_v53 = vcombine.high %v2601_v42, %v2605_v63 }
 0x498   :  { %1977 = vst [vmem:[#allocation2 + $0x190] sm:$0xcc] %v1973_v58  ;;  %2405 = vrot.lane.b32.xlu0 %v4599_v41, %s3789_s26  ;;  %3291 = vmatprep.subr.bf16.mxu0 %v3640_v50  ;;  %v2012_v55 = vsel %vm202_vm5, %v2005_v18, %v2007_v38 }
 0x499   :  { %3292 = vmatpush1.bf16.msra.mxu0 %v3639_v61  ;;  %1978 = vst [vmem:[#allocation2 + $0x198] sm:$0xcc] %v1974_v2  ;;  %2407 = vrot.lane.b32.xlu1 %v4584_v10, %s3789_s26 }
 0x49a   :  { %v2009_v36 = vpop.permute.xlu0 %2008  ;;  %3332 = vmatprep.subr.bf16.mxu1 %v3642_v53 }
 0x49b   :  { %v2013_v62 = vsel %vm202_vm5, %v2007_v38, %v2009_v36  ;;  %3333 = vmatpush1.bf16.msra.mxu1 %v3641_v60  ;;  %v2011_v0 = vpop.permute.xlu1 %2010 }
 0x49c   :  { %v3549_v3 = vcombine.low %v2012_v55, %v2013_v62  ;;  %2343 = vrot.lane.b32.xlu0 %v4560_v20, %s3793_s29  ;;  %v2014_v40 = vsel %vm202_vm5, %v2009_v36, %v2011_v0  ;;  %v2017_v1 = vsel %vm202_vm5, %v2011_v0, %v2005_v18 }
 0x49d   :  { %v3550_v54 = vcombine.low %v2014_v40, %v2017_v1  ;;  %2345 = vrot.lane.b32.xlu1 %v4565_v25, %s3793_s29 }
 0x49e   :  { %v2025_v4 = vrot.slane %v3549_v3, 6  ;;  %v1928_v43 = vpop.permute.xlu0 %1927 }
 0x49f   :  { %v2026_v7 = vrot.slane %v3550_v54, 6  ;;  %v1930_v9 = vpop.permute.xlu1 %1929 }
 0x4a0   :  { %2029 = vst [vmem:[#allocation2 + $0x1b0] sm:$0xcc] %v2025_v4  ;;  %2347 = vrot.lane.b32.xlu0 %v4572_v12, %s3793_s29  ;;  %v1935_v20 = vsel %vm117_vm2, %v1928_v43, %v1930_v9 }
 0x4a1   :  { %2030 = vst [vmem:[#allocation2 + $0x1b8] sm:$0xcc] %v2026_v7  ;;  %2349 = vrot.lane.b32.xlu1 %v4575_v27, %s3793_s29 }
 0x4a2   :  { %v1932_v11 = vpop.permute.xlu0 %1931 }
 0x4a3   :  { %v1936_v49 = vsel %vm117_vm2, %v1930_v9, %v1932_v11  ;;  %v1934_v25 = vpop.permute.xlu1 %1933 }
 0x4a4   :  { %v3543_v44 = vcombine.low %v1935_v20, %v1936_v49  ;;  %2453 = vrot.lane.b32.xlu0 %v4589_v35, %s3791_s27  ;;  %v1937_v21 = vsel %vm117_vm2, %v1932_v11, %v1934_v25  ;;  %v1940_v22 = vsel %vm117_vm2, %v1934_v25, %v1928_v43 }
 0x4a5   :  { %v3544_v12 = vcombine.low %v1937_v21, %v1940_v22  ;;  %2455 = vrot.lane.b32.xlu1 %v4596_v39, %s3791_s27 }
 0x4a6   :  { %1950 = vst [vmem:[#allocation2 + $0x190] sm:$0x33] %v3543_v44  ;;  %v1980_v45 = vpop.permute.xlu0 %1979 }
 0x4a7   :  { %1951 = vst [vmem:[#allocation2 + $0x198] sm:$0x33] %v3544_v12  ;;  %v1982_v27 = vpop.permute.xlu1 %1981 }
 0x4a8   :  { %2457 = vrot.lane.b32.xlu0 %v4599_v41, %s3791_s27  ;;  %v1987_v13 = vsel %vm173_vm4, %v1980_v45, %v1982_v27 }
 0x4a9   :  { %2459 = vrot.lane.b32.xlu1 %v4584_v10, %s3791_s27 }
 0x4aa   :  { %v1984_v23 = vpop.permute.xlu0 %1983 }
 0x4ab   :  { %v1988_v33 = vsel %vm173_vm4, %v1982_v27, %v1984_v23  ;;  %v1986_v26 = vpop.permute.xlu1 %1985 }
 0x4ac   :  { %v3547_v24 = vcombine.low %v1987_v13, %v1988_v33  ;;  %2505 = vrot.lane.b32.xlu0 %v4589_v35, %s3793_s29  ;;  %v1989_v52 = vsel %vm173_vm4, %v1984_v23, %v1986_v26  ;;  %v1992_v28 = vsel %vm173_vm4, %v1986_v26, %v1980_v45 }
 0x4ad   :  { %v3548_v29 = vcombine.low %v1989_v52, %v1992_v28  ;;  %2507 = vrot.lane.b32.xlu1 %v4596_v39, %s3793_s29  ;;  %v2608_v46 = vld [vmem:[#allocation2 + $0x190] sm:$0xff] }
 0x4ae   :  { %2002 = vst [vmem:[#allocation2 + $0x1b0] sm:$0x33] %v3547_v24  ;;  %v2057_v30 = vpop.permute.xlu0 %2056  ;;  %v2609_v56 = vld [vmem:[#allocation2 + $0x198] sm:$0xff] }
 0x4af   :  { %2003 = vst [vmem:[#allocation2 + $0x1b8] sm:$0x33] %v3548_v29  ;;  %v2059_v31 = vpop.permute.xlu1 %2058 }
 0x4b0   :  { %2509 = vrot.lane.b32.xlu0 %v4599_v41, %s3793_s29  ;;  %v2064_v34 = vsel %vm61_vm0, %v2057_v30, %v2059_v31 }
 0x4b1   :  { %2511 = vrot.lane.b32.xlu1 %v4584_v10, %s3793_s29 }
 0x4b2   :  { %v2061_v5 = vpop.permute.xlu0 %2060 }
 0x4b3   :  { %v2065_v14 = vsel %vm61_vm0, %v2059_v31, %v2061_v5  ;;  %v2063_v37 = vpop.permute.xlu1 %2062 }
 0x4b4   :  { %v3553_v15 = vcombine.low %v2064_v34, %v2065_v14  ;;  %2428 = vrot.lane.b32.xlu0 %v4589_v35, %s3790_s0  ;;  %v2066_v17 = vsel %vm61_vm0, %v2061_v5, %v2063_v37  ;;  %v2069_v8 = vsel %vm61_vm0, %v2063_v37, %v2057_v30 }
 0x4b5   :  { %v2612_v16 = vld [vmem:[#allocation2 + $0x1b0] sm:$0xff]  ;;  %v3554_v47 = vcombine.low %v2066_v17, %v2069_v8  ;;  %2430 = vrot.lane.b32.xlu1 %v4596_v39, %s3790_s0 }
 0x4b6   :  { %v2077_v6 = vrot.slane %v3553_v15, 6  ;;  %v2109_v32 = vpop.permute.xlu0 %2108  ;;  %v3647_v48 = vcombine.low %v2608_v46, %v2612_v16  ;;  %v3648_v51 = vcombine.high %v2608_v46, %v2612_v16  ;;  %v2613_v57 = vld [vmem:[#allocation2 + $0x1b8] sm:$0xff]  ;;  %v3800_v15 = vmov 0  }
 0x4b7   :  { %v2078_v58 = vrot.slane %v3554_v47, 6  ;;  %v2111_v59 = vpop.permute.xlu1 %2110  ;;  %v3649_v18 = vcombine.low %v2609_v56, %v2613_v57  ;;  %v3650_v61 = vcombine.high %v2609_v56, %v2613_v57  ;;  %3726 = vset.pattern.permute.xlu0 %v3800_v15 }
 0x4b8   :  { %2081 = vst [vmem:[#allocation2 + $0x1d0] sm:$0xcc] %v2077_v6  ;;  %2432 = vrot.lane.b32.xlu0 %v4599_v41, %s3790_s0  ;;  %3293 = vmatprep.subr.bf16.mxu0 %v3648_v51  ;;  %v2116_v42 = vsel %vm117_vm2, %v2109_v32, %v2111_v59 }
 0x4b9   :  { %3294 = vmatpush1.bf16.msra.mxu0 %v3647_v48  ;;  %2082 = vst [vmem:[#allocation2 + $0x1d8] sm:$0xcc] %v2078_v58  ;;  %2434 = vrot.lane.b32.xlu1 %v4584_v10, %s3790_s0 }
 0x4ba   :  { %v2113_v50 = vpop.permute.xlu0 %2112  ;;  %3334 = vmatprep.subr.bf16.mxu1 %v3650_v61 }
 0x4bb   :  { %v2117_v63 = vsel %vm117_vm2, %v2111_v59, %v2113_v50  ;;  %3335 = vmatpush1.bf16.msra.mxu1 %v3649_v18  ;;  %v2115_v38 = vpop.permute.xlu1 %2114 }
 0x4bc   :  { %v3557_v2 = vcombine.low %v2116_v42, %v2117_v63  ;;  %2480 = vrot.lane.b32.xlu0 %v4589_v35, %s3792_s28  ;;  %v2118_v60 = vsel %vm117_vm2, %v2113_v50, %v2115_v38  ;;  %v2121_v53 = vsel %vm117_vm2, %v2115_v38, %v2109_v32 }
 0x4bd   :  { %v3558_v55 = vcombine.low %v2118_v60, %v2121_v53  ;;  %2482 = vrot.lane.b32.xlu1 %v4596_v39, %s3792_s28 }
 0x4be   :  { %v2129_v36 = vrot.slane %v3557_v2, 6  ;;  %v2084_v62 = vpop.permute.xlu0 %2083 }
 0x4bf   :  { %v2130_v3 = vrot.slane %v3558_v55, 6  ;;  %v2086_v0 = vpop.permute.xlu1 %2085 }
 0x4c0   :  { %2133 = vst [vmem:[#allocation2 + $0x1f0] sm:$0xcc] %v2129_v36  ;;  %2484 = vrot.lane.b32.xlu0 %v4599_v41, %s3792_s28  ;;  %v2091_v1 = vsel %vm90_vm1, %v2084_v62, %v2086_v0  ;;  %v2617_v52 = vld [vmem:[#allocation2 + $0x1d8] sm:$0xff] }
 0x4c1   :  { %2134 = vst [vmem:[#allocation2 + $0x1f8] sm:$0xcc] %v2130_v3  ;;  %2486 = vrot.lane.b32.xlu1 %v4584_v10, %s3792_s28 }
 0x4c2   :  { %v2088_v40 = vpop.permute.xlu0 %2087 }
 0x4c3   :  { %v2092_v4 = vsel %vm90_vm1, %v2086_v0, %v2088_v40  ;;  %v2090_v43 = vpop.permute.xlu1 %2089 }
 0x4c4   :  { %v3555_v54 = vcombine.low %v2091_v1, %v2092_v4  ;;  %2532 = vrot.lane.b32.xlu0 %v4589_v35, %s3794_s30  ;;  %v2093_v7 = vsel %vm90_vm1, %v2088_v40, %v2090_v43  ;;  %v2096_v9 = vsel %vm90_vm1, %v2090_v43, %v2084_v62 }
 0x4c5   :  { %v3556_v11 = vcombine.low %v2093_v7, %v2096_v9  ;;  %2534 = vrot.lane.b32.xlu1 %v4596_v39, %s3794_s30  ;;  %v2616_v39 = vld [vmem:[#allocation2 + $0x1d0] sm:$0xff] }
 0x4c6   :  { %2106 = vst [vmem:[#allocation2 + $0x1f0] sm:$0x33] %v3555_v54  ;;  %v2161_v20 = vpop.permute.xlu0 %2160 }
 0x4c7   :  { %2107 = vst [vmem:[#allocation2 + $0x1f8] sm:$0x33] %v3556_v11  ;;  %v2163_v49 = vpop.permute.xlu1 %2162  ;;  %v4986_v26 = vpop.f32.mrb[0].mxu0 }
 0x4c8   :  { %2536 = vrot.lane.b32.xlu0 %v4599_v41, %s3794_s30  ;;  %v2168_v35 = vsel %vm173_vm4, %v2161_v20, %v2163_v49  ;;  %v4990_v30 = vpop.f32.mrb[1].mxu0 }
 0x4c9   :  { %2538 = vrot.lane.b32.xlu1 %v4584_v10, %s3794_s30  ;;  %v2658_v10 = vld [vmem:[%s5074_s2] sm:$0xff]  ;;  %v4988_v29 = vpop.f32.mrb[0].mxu1  ;;  %v3237_v17 = vpop.f32.mrb[2].mxu0  ;;  %s3801_s2 = smov [#allocation6]  }
 0x4ca   :  { %v2165_v44 = vpop.permute.xlu0 %2164  ;;  %v4992_v37 = vpop.f32.mrb[1].mxu1  ;;  %s3385_s12 = sshll.u32 %s3801_s2, 4  ;;  %s3386_s12 = int_to_ptr.vmem [resolvable:$true] %s3385_s12 }
 0x4cb   :  { %v2169_v25 = vsel %vm173_vm4, %v2163_v49, %v2165_v44  ;;  %v2167_v22 = vpop.permute.xlu1 %2166  ;;  %v3278_v8 = vpop.f32.mrb[2].mxu1  ;;  %s3759_s13 = scalar_lea.vmem %s3386_s12, 1024  ;;  %p3764_p9 = scmp.lt.s32.totalorder %s3386_s12, %s3386_s12 }
 0x4cc   :  { %v3561_v21 = vcombine.low %v2168_v35, %v2169_v25  ;;  %v2170_v12 = vsel %vm173_vm4, %v2165_v44, %v2167_v22  ;;  %v2173_v45 = vsel %vm173_vm4, %v2167_v22, %v2161_v20  ;;  %2661 = vperm.xlu0 %3726, %v2658_v10   ;;  %v3238_v16 = vpop.f32.mrb[3].mxu0  ;;  %v3279_v32 = vpop.f32.mrb[3].mxu1  ;;  %p3760_p8 = scmp.ne.s32.totalorder %s3386_s12, %s3759_s13  ;;  %p3765_p10 = scmp.lt.s32.totalorder %s3759_s13, %s3759_s13 }
 0x4cd   :  { %v2620_v27 = vld [vmem:[#allocation2 + $0x1f0] sm:$0xff]  ;;  %v3562_v13 = vcombine.low %v2170_v12, %v2173_v45 }
 0x4ce   :  { %v2181_v23 = vrot.slane %v3561_v21, 6  ;;  %v2136_v41 = vpop.permute.xlu0 %2135  ;;  %v3655_v33 = vcombine.low %v2616_v39, %v2620_v27  ;;  %v3656_v24 = vcombine.high %v2616_v39, %v2620_v27  ;;  %v2621_v28 = vld [vmem:[#allocation2 + $0x1f8] sm:$0xff]  ;;  %p3766_p11 = por %p3765_p10, %p3764_p9 }
 0x4cf   :  { %v2182_v31 = vrot.slane %v3562_v13, 6  ;;  %v2138_v5 = vpop.permute.xlu1 %2137  ;;  %v3657_v34 = vcombine.low %v2617_v52, %v2621_v28  ;;  %v3658_v14 = vcombine.high %v2617_v52, %v2621_v28 }
 0x4d0   :  { %2185 = vst [vmem:[#allocation2 + $0x210] sm:$0xcc] %v2181_v23  ;;  %3295 = vmatprep.subr.bf16.mxu0 %v3656_v24  ;;  %v2143_v6 = vsel %vm146_vm3, %v2136_v41, %v2138_v5  ;;  %p3767_p12 = pnand %p3766_p11, %p3760_p8 }
 0x4d1   :  { %3296 = vmatpush1.bf16.msra.mxu0 %v3655_v33  ;;  %2186 = vst [vmem:[#allocation2 + $0x218] sm:$0xcc] %v2182_v31  ;;  %3336 = vmatprep.subr.bf16.mxu1 %v3658_v14 }
 0x4d2   :  { %v2140_v46 = vpop.permute.xlu0 %2139  ;;  %3337 = vmatpush1.bf16.msra.mxu1 %v3657_v34 }
 0x4d3   :  { %v2144_v47 = vsel %vm146_vm3, %v2138_v5, %v2140_v46  ;;  %v2142_v51 = vpop.permute.xlu1 %2141 }
 0x4d4   :  { %v3559_v48 = vcombine.low %v2143_v6, %v2144_v47  ;;  %v2145_v56 = vsel %vm146_vm3, %v2140_v46, %v2142_v51  ;;  %v2148_v57 = vsel %vm146_vm3, %v2142_v51, %v2136_v41 }
 0x4d5   :  { %v3560_v58 = vcombine.low %v2145_v56, %v2148_v57 }
 0x4d6   :  { %2158 = vst [vmem:[#allocation2 + $0x210] sm:$0x33] %v3559_v48  ;;  %v2188_v59 = vpop.permute.xlu0 %2187 }
 0x4d7   :  { %2159 = vst [vmem:[#allocation2 + $0x218] sm:$0x33] %v3560_v58  ;;  %v2190_v18 = vpop.permute.xlu1 %2189 }
 0x4d8   :  { %v2195_v50 = vsel %vm202_vm5, %v2188_v59, %v2190_v18 }
 0x4da   :  { %v2192_v61 = vpop.permute.xlu0 %2191 }
 0x4db   :  { %v2196_v42 = vsel %vm202_vm5, %v2190_v18, %v2192_v61  ;;  %v2194_v2 = vpop.permute.xlu1 %2193 }
 0x4dc   :  { %v3563_v63 = vcombine.low %v2195_v50, %v2196_v42  ;;  %v2197_v38 = vsel %vm202_vm5, %v2192_v61, %v2194_v2  ;;  %v2200_v60 = vsel %vm202_vm5, %v2194_v2, %v2188_v59 }
 0x4dd   :  { %v3564_v53 = vcombine.low %v2197_v38, %v2200_v60  ;;  %v2624_v43 = vld [vmem:[#allocation2 + $0x210] sm:$0xff] }
 0x4de   :  { %2210 = vst [vmem:[#allocation2 + $0x230] sm:$0x33] %v3563_v63  ;;  %v2265_v36 = vpop.permute.xlu0 %2264  ;;  %v2625_v35 = vld [vmem:[#allocation2 + $0x218] sm:$0xff] }
 0x4df   :  { %2211 = vst [vmem:[#allocation2 + $0x238] sm:$0x33] %v3564_v53  ;;  %v2267_v55 = vpop.permute.xlu1 %2266 }
 0x4e0   :  { %v2272_v3 = vsel %vm90_vm1, %v2265_v36, %v2267_v55 }
 0x4e2   :  { %v2269_v62 = vpop.permute.xlu0 %2268 }
 0x4e3   :  { %v2273_v0 = vsel %vm90_vm1, %v2267_v55, %v2269_v62  ;;  %v2271_v1 = vpop.permute.xlu1 %2270 }
 0x4e4   :  { %v3569_v40 = vcombine.low %v2272_v3, %v2273_v0  ;;  %v2274_v4 = vsel %vm90_vm1, %v2269_v62, %v2271_v1  ;;  %v2277_v54 = vsel %vm90_vm1, %v2271_v1, %v2265_v36 }
 0x4e5   :  { %v2628_v7 = vld [vmem:[#allocation2 + $0x230] sm:$0xff]  ;;  %v3570_v11 = vcombine.low %v2274_v4, %v2277_v54 }
 0x4e6   :  { %v2285_v9 = vrot.slane %v3569_v40, 6  ;;  %v2317_v20 = vpop.permute.xlu0 %2316  ;;  %v3663_v49 = vcombine.low %v2624_v43, %v2628_v7  ;;  %v3664_v44 = vcombine.high %v2624_v43, %v2628_v7  ;;  %v2629_v25 = vld [vmem:[#allocation2 + $0x238] sm:$0xff] }
 0x4e7   :  { %v2286_v21 = vrot.slane %v3570_v11, 6  ;;  %v2319_v22 = vpop.permute.xlu1 %2318  ;;  %v3665_v12 = vcombine.low %v2625_v35, %v2629_v25  ;;  %v3666_v45 = vcombine.high %v2625_v35, %v2629_v25 }
 0x4e8   :  { %2289 = vst [vmem:[#allocation2 + $0x250] sm:$0xcc] %v2285_v9  ;;  %3297 = vmatprep.subr.bf16.mxu0 %v3664_v44  ;;  %v2324_v27 = vsel %vm146_vm3, %v2317_v20, %v2319_v22 }
 0x4e9   :  { %3298 = vmatpush1.bf16.msra.mxu0 %v3663_v49  ;;  %2290 = vst [vmem:[#allocation2 + $0x258] sm:$0xcc] %v2286_v21  ;;  %3338 = vmatprep.subr.bf16.mxu1 %v3666_v45 }
 0x4ea   :  { %v2321_v39 = vpop.permute.xlu0 %2320  ;;  %3339 = vmatpush1.bf16.msra.mxu1 %v3665_v12 }
 0x4eb   :  { %v2325_v23 = vsel %vm146_vm3, %v2319_v22, %v2321_v39  ;;  %v2323_v41 = vpop.permute.xlu1 %2322 }
 0x4ec   :  { %v3573_v13 = vcombine.low %v2324_v27, %v2325_v23  ;;  %v2326_v33 = vsel %vm146_vm3, %v2321_v39, %v2323_v41  ;;  %v2329_v24 = vsel %vm146_vm3, %v2323_v41, %v2317_v20 }
 0x4ed   :  { %v3574_v52 = vcombine.low %v2326_v33, %v2329_v24 }
 0x4ee   :  { %v2337_v10 = vrot.slane %v3573_v13, 6  ;;  %v2240_v28 = vpop.permute.xlu0 %2239 }
 0x4ef   :  { %v2338_v31 = vrot.slane %v3574_v52, 6  ;;  %v2242_v5 = vpop.permute.xlu1 %2241 }
 0x4f0   :  { %2341 = vst [vmem:[#allocation2 + $0x270] sm:$0xcc] %v2337_v10  ;;  %v2247_v14 = vsel %vm61_vm0, %v2240_v28, %v2242_v5 }
 0x4f1   :  { %2342 = vst [vmem:[#allocation2 + $0x278] sm:$0xcc] %v2338_v31 }
 0x4f2   :  { %v2244_v34 = vpop.permute.xlu0 %2243 }
 0x4f3   :  { %v2248_v15 = vsel %vm61_vm0, %v2242_v5, %v2244_v34  ;;  %v2246_v8 = vpop.permute.xlu1 %2245 }
 0x4f4   :  { %v3567_v17 = vcombine.low %v2247_v14, %v2248_v15  ;;  %v2249_v46 = vsel %vm61_vm0, %v2244_v34, %v2246_v8  ;;  %v2252_v16 = vsel %vm61_vm0, %v2246_v8, %v2240_v28 }
 0x4f5   :  { %v3568_v6 = vcombine.low %v2249_v46, %v2252_v16 }
 0x4f6   :  { %2262 = vst [vmem:[#allocation2 + $0x250] sm:$0x33] %v3567_v17  ;;  %v2292_v47 = vpop.permute.xlu0 %2291 }
 0x4f7   :  { %2263 = vst [vmem:[#allocation2 + $0x258] sm:$0x33] %v3568_v6  ;;  %v2294_v32 = vpop.permute.xlu1 %2293 }
 0x4f8   :  { %v2299_v51 = vsel %vm117_vm2, %v2292_v47, %v2294_v32 }
 0x4fa   :  { %v2296_v48 = vpop.permute.xlu0 %2295 }
 0x4fb   :  { %v2300_v56 = vsel %vm117_vm2, %v2294_v32, %v2296_v48  ;;  %v2298_v58 = vpop.permute.xlu1 %2297 }
 0x4fc   :  { %v3571_v57 = vcombine.low %v2299_v51, %v2300_v56  ;;  %v2301_v59 = vsel %vm117_vm2, %v2296_v48, %v2298_v58  ;;  %v2304_v18 = vsel %vm117_vm2, %v2298_v58, %v2292_v47 }
 0x4fd   :  { %v3572_v61 = vcombine.low %v2301_v59, %v2304_v18  ;;  %v2632_v62 = vld [vmem:[#allocation2 + $0x250] sm:$0xff] }
 0x4fe   :  { %2314 = vst [vmem:[#allocation2 + $0x270] sm:$0x33] %v3571_v57  ;;  %v2369_v50 = vpop.permute.xlu0 %2368  ;;  %v2633_v43 = vld [vmem:[#allocation2 + $0x258] sm:$0xff] }
 0x4ff   :  { %2315 = vst [vmem:[#allocation2 + $0x278] sm:$0x33] %v3572_v61  ;;  %v2371_v42 = vpop.permute.xlu1 %2370 }
 0x500   :  { %v2376_v2 = vsel %vm202_vm5, %v2369_v50, %v2371_v42 }
 0x502   :  { %v2373_v63 = vpop.permute.xlu0 %2372 }
 0x503   :  { %v2377_v38 = vsel %vm202_vm5, %v2371_v42, %v2373_v63  ;;  %v2375_v53 = vpop.permute.xlu1 %2374 }
 0x504   :  { %v3577_v60 = vcombine.low %v2376_v2, %v2377_v38  ;;  %v2378_v36 = vsel %vm202_vm5, %v2373_v63, %v2375_v53  ;;  %v2381_v55 = vsel %vm202_vm5, %v2375_v53, %v2369_v50 }
 0x505   :  { %v2636_v3 = vld [vmem:[#allocation2 + $0x270] sm:$0xff]  ;;  %v3578_v40 = vcombine.low %v2378_v36, %v2381_v55 }
 0x506   :  { %v2389_v0 = vrot.slane %v3577_v60, 6  ;;  %v2402_v1 = vpop.permute.xlu0 %2401  ;;  %v3671_v4 = vcombine.low %v2632_v62, %v2636_v3  ;;  %v3672_v54 = vcombine.high %v2632_v62, %v2636_v3  ;;  %v2637_v7 = vld [vmem:[#allocation2 + $0x278] sm:$0xff] }
 0x507   :  { %v2390_v9 = vrot.slane %v3578_v40, 6  ;;  %v2404_v11 = vpop.permute.xlu1 %2403  ;;  %v3673_v20 = vcombine.low %v2633_v43, %v2637_v7  ;;  %v3674_v49 = vcombine.high %v2633_v43, %v2637_v7 }
 0x508   :  { %2393 = vst [vmem:[#allocation2 + $0x290] sm:$0xcc] %v2389_v0  ;;  %3299 = vmatprep.subr.bf16.mxu0 %v3672_v54  ;;  %v2409_v35 = vsel %vm61_vm0, %v2402_v1, %v2404_v11 }
 0x509   :  { %3300 = vmatpush1.bf16.msra.mxu0 %v3671_v4  ;;  %2394 = vst [vmem:[#allocation2 + $0x298] sm:$0xcc] %v2390_v9  ;;  %3340 = vmatprep.subr.bf16.mxu1 %v3674_v49 }
 0x50a   :  { %v2406_v44 = vpop.permute.xlu0 %2405  ;;  %3341 = vmatpush1.bf16.msra.mxu1 %v3673_v20 }
 0x50b   :  { %v2410_v25 = vsel %vm61_vm0, %v2404_v11, %v2406_v44  ;;  %v2408_v22 = vpop.permute.xlu1 %2407 }
 0x50c   :  { %v3581_v21 = vcombine.low %v2409_v35, %v2410_v25  ;;  %v2411_v12 = vsel %vm61_vm0, %v2406_v44, %v2408_v22  ;;  %v2414_v45 = vsel %vm61_vm0, %v2408_v22, %v2402_v1 }
 0x50d   :  { %v3582_v27 = vcombine.low %v2411_v12, %v2414_v45 }
 0x50e   :  { %v2422_v39 = vrot.slane %v3581_v21, 6  ;;  %v2344_v23 = vpop.permute.xlu0 %2343 }
 0x50f   :  { %v2423_v13 = vrot.slane %v3582_v27, 6  ;;  %v2346_v41 = vpop.permute.xlu1 %2345 }
 0x510   :  { %2426 = vst [vmem:[#allocation2 + $0x2b0] sm:$0xcc] %v2422_v39  ;;  %v2351_v24 = vsel %vm173_vm4, %v2344_v23, %v2346_v41 }
 0x511   :  { %2427 = vst [vmem:[#allocation2 + $0x2b8] sm:$0xcc] %v2423_v13 }
 0x512   :  { %v2348_v33 = vpop.permute.xlu0 %2347 }
 0x513   :  { %v2352_v10 = vsel %vm173_vm4, %v2346_v41, %v2348_v33  ;;  %v2350_v28 = vpop.permute.xlu1 %2349 }
 0x514   :  { %v3575_v52 = vcombine.low %v2351_v24, %v2352_v10  ;;  %v2353_v31 = vsel %vm173_vm4, %v2348_v33, %v2350_v28  ;;  %v2356_v5 = vsel %vm173_vm4, %v2350_v28, %v2344_v23 }
 0x515   :  { %v3576_v34 = vcombine.low %v2353_v31, %v2356_v5 }
 0x516   :  { %2366 = vst [vmem:[#allocation2 + $0x290] sm:$0x33] %v3575_v52  ;;  %v2454_v14 = vpop.permute.xlu0 %2453 }
 0x517   :  { %2367 = vst [vmem:[#allocation2 + $0x298] sm:$0x33] %v3576_v34  ;;  %v2456_v15 = vpop.permute.xlu1 %2455  ;;  %v2644_v51 = vld [vmem:[#allocation2 + $0x2b0] sm:$0xff] }
 0x518   :  { %v2461_v8 = vsel %vm117_vm2, %v2454_v14, %v2456_v15  ;;  %v2645_v50 = vld [vmem:[#allocation2 + $0x2b8] sm:$0xff] }
 0x51a   :  { %v2458_v17 = vpop.permute.xlu0 %2457 }
 0x51b   :  { %v2462_v46 = vsel %vm117_vm2, %v2456_v15, %v2458_v17  ;;  %v2460_v6 = vpop.permute.xlu1 %2459 }
 0x51c   :  { %v3585_v16 = vcombine.low %v2461_v8, %v2462_v46  ;;  %v2463_v47 = vsel %vm117_vm2, %v2458_v17, %v2460_v6  ;;  %v2466_v32 = vsel %vm117_vm2, %v2460_v6, %v2454_v14 }
 0x51d   :  { %v2640_v48 = vld [vmem:[#allocation2 + $0x290] sm:$0xff]  ;;  %v3586_v57 = vcombine.low %v2463_v47, %v2466_v32 }
 0x51e   :  { %v2474_v56 = vrot.slane %v3585_v16, 6  ;;  %v2506_v58 = vpop.permute.xlu0 %2505  ;;  %v3679_v59 = vcombine.low %v2640_v48, %v2644_v51  ;;  %v3680_v18 = vcombine.high %v2640_v48, %v2644_v51  ;;  %v2641_v61 = vld [vmem:[#allocation2 + $0x298] sm:$0xff] }
 0x51f   :  { %v2475_v42 = vrot.slane %v3586_v57, 6  ;;  %v2508_v63 = vpop.permute.xlu1 %2507  ;;  %v3681_v2 = vcombine.low %v2641_v61, %v2645_v50  ;;  %v3682_v38 = vcombine.high %v2641_v61, %v2645_v50 }
 0x520   :  { %2478 = vst [vmem:[#allocation2 + $0x2d0] sm:$0xcc] %v2474_v56  ;;  %3301 = vmatprep.subr.bf16.mxu0 %v3680_v18  ;;  %v2513_v53 = vsel %vm173_vm4, %v2506_v58, %v2508_v63 }
 0x521   :  { %3302 = vmatpush1.bf16.msra.mxu0 %v3679_v59  ;;  %2479 = vst [vmem:[#allocation2 + $0x2d8] sm:$0xcc] %v2475_v42  ;;  %3342 = vmatprep.subr.bf16.mxu1 %v3682_v38 }
 0x522   :  { %v2510_v60 = vpop.permute.xlu0 %2509  ;;  %3343 = vmatpush1.bf16.msra.mxu1 %v3681_v2 }
 0x523   :  { %v2514_v36 = vsel %vm173_vm4, %v2508_v63, %v2510_v60  ;;  %v2512_v62 = vpop.permute.xlu1 %2511 }
 0x524   :  { %v3589_v55 = vcombine.low %v2513_v53, %v2514_v36  ;;  %v2515_v3 = vsel %vm173_vm4, %v2510_v60, %v2512_v62  ;;  %v2518_v0 = vsel %vm173_vm4, %v2512_v62, %v2506_v58 }
 0x525   :  { %v3590_v1 = vcombine.low %v2515_v3, %v2518_v0 }
 0x526   :  { %v2526_v40 = vrot.slane %v3589_v55, 6  ;;  %v2429_v4 = vpop.permute.xlu0 %2428 }
 0x527   :  { %v2527_v54 = vrot.slane %v3590_v1, 6  ;;  %v2431_v43 = vpop.permute.xlu1 %2430 }
 0x528   :  { %2530 = vst [vmem:[#allocation2 + $0x2f0] sm:$0xcc] %v2526_v40  ;;  %v2436_v9 = vsel %vm90_vm1, %v2429_v4, %v2431_v43 }
 0x529   :  { %2531 = vst [vmem:[#allocation2 + $0x2f8] sm:$0xcc] %v2527_v54 }
 0x52a   :  { %v2433_v7 = vpop.permute.xlu0 %2432 }
 0x52b   :  { %v2437_v11 = vsel %vm90_vm1, %v2431_v43, %v2433_v7  ;;  %v2435_v49 = vpop.permute.xlu1 %2434 }
 0x52c   :  { %v3583_v20 = vcombine.low %v2436_v9, %v2437_v11  ;;  %v2438_v44 = vsel %vm90_vm1, %v2433_v7, %v2435_v49  ;;  %v2441_v35 = vsel %vm90_vm1, %v2435_v49, %v2429_v4 }
 0x52d   :  { %v3584_v25 = vcombine.low %v2438_v44, %v2441_v35 }
 0x52e   :  { %2451 = vst [vmem:[#allocation2 + $0x2d0] sm:$0x33] %v3583_v20  ;;  %v2481_v21 = vpop.permute.xlu0 %2480 }
 0x52f   :  { %2452 = vst [vmem:[#allocation2 + $0x2d8] sm:$0x33] %v3584_v25  ;;  %v2483_v22 = vpop.permute.xlu1 %2482 }
 0x530   :  { %v2488_v45 = vsel %vm146_vm3, %v2481_v21, %v2483_v22 }
 0x532   :  { %v2485_v12 = vpop.permute.xlu0 %2484 }
 0x533   :  { %v2489_v39 = vsel %vm146_vm3, %v2483_v22, %v2485_v12  ;;  %v2487_v23 = vpop.permute.xlu1 %2486 }
 0x534   :  { %v3587_v27 = vcombine.low %v2488_v45, %v2489_v39  ;;  %v2490_v13 = vsel %vm146_vm3, %v2485_v12, %v2487_v23  ;;  %v2493_v41 = vsel %vm146_vm3, %v2487_v23, %v2481_v21 }
 0x535   :  { %v3588_v33 = vcombine.low %v2490_v13, %v2493_v41  ;;  %v2648_v17 = vld [vmem:[#allocation2 + $0x2d0] sm:$0xff] }
 0x536   :  { %2503 = vst [vmem:[#allocation2 + $0x2f0] sm:$0x33] %v3587_v27  ;;  %v2533_v24 = vpop.permute.xlu0 %2532  ;;  %v2649_v47 = vld [vmem:[#allocation2 + $0x2d8] sm:$0xff] }
 0x537   :  { %2504 = vst [vmem:[#allocation2 + $0x2f8] sm:$0x33] %v3588_v33  ;;  %v2535_v10 = vpop.permute.xlu1 %2534 }
 0x538   :  { %v2540_v28 = vsel %vm202_vm5, %v2533_v24, %v2535_v10 }
 0x53a   :  { %v2537_v52 = vpop.permute.xlu0 %2536 }
 0x53b   :  { %v2541_v31 = vsel %vm202_vm5, %v2535_v10, %v2537_v52  ;;  %v2539_v34 = vpop.permute.xlu1 %2538 }
 0x53c   :  { %v3591_v5 = vcombine.low %v2540_v28, %v2541_v31  ;;  %v2542_v14 = vsel %vm202_vm5, %v2537_v52, %v2539_v34  ;;  %v2545_v15 = vsel %vm202_vm5, %v2539_v34, %v2533_v24 }
 0x53d   :  { %v2652_v8 = vld [vmem:[#allocation2 + $0x2f0] sm:$0xff]  ;;  %v3592_v46 = vcombine.low %v2542_v14, %v2545_v15 }
 0x53e   :  { %2555 = vst [vmem:[#allocation2 + $0x310] sm:$0x33] %v3591_v5  ;;  %v3687_v16 = vcombine.low %v2648_v17, %v2652_v8  ;;  %v3688_v6 = vcombine.high %v2648_v17, %v2652_v8  ;;  %v2653_v32 = vld [vmem:[#allocation2 + $0x2f8] sm:$0xff] }
 0x53f   :  { %2556 = vst [vmem:[#allocation2 + $0x318] sm:$0x33] %v3592_v46  ;;  %v3689_v48 = vcombine.low %v2649_v47, %v2653_v32  ;;  %v3690_v51 = vcombine.high %v2649_v47, %v2653_v32 }
 0x540   :  { %3303 = vmatprep.subr.bf16.mxu0 %v3688_v6 }
 0x541   :  { %3304 = vmatpush1.bf16.msra.mxu0 %v3687_v16  ;;  %3344 = vmatprep.subr.bf16.mxu1 %v3690_v51 }
 0x542   :  { %3345 = vmatpush1.bf16.msra.mxu1 %v3689_v48 }
 0x545   :  { %v2656_v56 = vld [vmem:[#allocation2 + $0x310] sm:$0x33] }
 0x546   :  { %v3696_v57 = vcombine.high %v2656_v56, %v2656_v56  ;;  %v3695_v58 = vcombine.low %v2656_v56, %v2656_v56  ;;  %v2657_v59 = vld [vmem:[#allocation2 + $0x318] sm:$0x33] }
 0x547   :  { %v3698_v61 = vcombine.high %v2657_v59, %v2657_v59  ;;  %v3697_v50 = vcombine.low %v2657_v59, %v2657_v59 }
 0x548   :  { %3703 = vmatprep.subr.msk.bf16.mxu0 %vm3174_vm12, %v3696_v57  ;;  %v3188_v18 = vsel %vm3174_vm12, %v3695_v58, 0 }
 0x549   :  { %3306 = vmatpush1.bf16.msra.mxu0 %v3188_v18  ;;  %3705 = vmatprep.subr.msk.bf16.mxu1 %vm3174_vm12, %v3698_v61  ;;  %v3194_v42 = vsel %vm3174_vm12, %v3697_v50, 0 }
 0x54a   :  { %3347 = vmatpush1.bf16.msra.mxu1 %v3194_v42 }
 0x54b   :  { %v2662_v63 = vpop.permute.xlu0 %2661 }
 0x54c   :  { %3314 = vmatmul.mubr.bf16.vlgmr.msra.gmra.mrb[4].mxu0 %v4647_v19  ;;  %v3234_v2 = vadd.f32 %v4986_v26, %v2662_v63  ;;  %v3236_v38 = vadd.f32 %v4990_v30, %v2662_v63  ;;  %v3275_v60 = vadd.f32 %v4988_v29, %v2662_v63  ;;  %v3277_v53 = vadd.f32 %v4992_v37, %v2662_v63 }
 0x54d   :  { %3355 = vmatmul.mubr.bf16.vlgmr.msra.gmra.mrb[4].mxu1 %v4647_v19 }
 0x54e   :  { %v3363_v36 = vmax.f32 %v3234_v2, 0.0  ;;  %v3364_v55 = vmax.f32 %v3236_v38, 0.0  ;;  %v3365_v62 = vmax.f32 %v3275_v60, 0.0  ;;  %v3366_v3 = vmax.f32 %v3277_v53, 0.0 }
 0x550   :  { %3371 = vst [vmem:[#allocation6] sm:$0xff] %v3363_v36  ;;  %3372 = vst [vmem:[#allocation6 + $0x8] sm:$0xff] %v3364_v55 }
 0x551   :  { %3373 = vst [vmem:[#allocation6 + $0x10] sm:$0xff] %v3365_v62  ;;  %3374 = vst [vmem:[#allocation6 + $0x18] sm:$0xff] %v3366_v3 }
 0x61f   :  { %v3315_v0 = vpop.f32.mrb[4].mxu0 }
 0x620   :  { %v3316_v40 = vadd.f32 %v3315_v0, %v2662_v63  ;;  %v3317_v19 = vpop.f32.mrb[5].mxu0  ;;  %v3356_v26 = vpop.f32.mrb[4].mxu1 }
 0x621   :  { %v3318_v1 = vadd.f32 %v3317_v19, %v2662_v63  ;;  %v3319_v4 = vpop.f32.mrb[6].mxu0  ;;  %v3357_v29 = vadd.f32 %v3356_v26, %v2662_v63  ;;  %v3358_v37 = vpop.f32.mrb[5].mxu1 }
 0x622   :  { %v3367_v30 = vmax.f32 %v3316_v40, 0.0  ;;  %v3320_v54 = vpop.f32.mrb[7].mxu0  ;;  %v3359_v7 = vadd.f32 %v3358_v37, %v2662_v63  ;;  %v3360_v9 = vpop.f32.mrb[6].mxu1 }
 0x623   :  { %v3368_v43 = vmax.f32 %v3318_v1, 0.0  ;;  %v3369_v11 = vmax.f32 %v3357_v29, 0.0  ;;  %v3361_v20 = vpop.f32.mrb[7].mxu1 }
 0x624   :  { %3376 = vst [vmem:[#allocation6 + $0x20] sm:$0xff] %v3367_v30  ;;  %v3370_v49 = vmax.f32 %v3359_v7, 0.0 }
 0x625   :  { %3377 = vst [vmem:[#allocation6 + $0x28] sm:$0xff] %v3368_v43  ;;  %3378 = vst [vmem:[#allocation6 + $0x30] sm:$0xff] %v3369_v11 }
 0x626   :  { %3379 = vst [vmem:[#allocation6 + $0x38] sm:$0xff] %v3370_v49 }
 0x627   :  { %3770 = shalt.err (!%p3767_p12)
}
 0x628   :  { %s3771_s16 = scalar_lea.hbm %s5075_s3, 1024 }
 0x629   :  { %p3772_p13 = scmp.ne.s32.totalorder %s5075_s3, %s3771_s16  ;;  %p3775_p0 = scmp.lt.u32.totalorder %s3771_s16, %s5075_s3 }
 0x62b   :  { %p3777_p1 = pnand %p3775_p0, %p3772_p13 }
 0x62d   :  { %3780 = shalt.err (!%p3777_p1)
}
 0x62e   :  { %s3802_s21 = smov 512   ;;  %s3803_s22 = smov 32  }
 0x62f   :  { %3391 = dma.vmem_to_hbm [thread:$0]  %s3386_s12, 1024, %s5075_s3, [#allocation5], %s3802_s21, %s3802_s21, %s3803_s22  }
 0x630   :  { %3783 = dma.done.wait [#allocation5], 1024  }
 0x631   :  { %3784 = vsyncadd [#allocation5], 4294966272 }
 0x632   :  { %3395 = vsyncpa [#allocation4], 1 }
 0x633   :  { %3396 = vsyncpa [#allocation5], 1 }

</bundles_post_ra>
